<compile_context>
chip_gen: v7x
topology: tpu7x:2x2x1
jax: 0.10.0
libtpu: 0.0.40
codegen_flags: <defaults>
</compile_context>

<pallas_src>
import functools

import jax
import jax.numpy as jnp
from jax import lax
from jax.experimental import pallas as pl
from jax.experimental.pallas import tpu as pltpu

EPS = 1e-5  # PyTorch InstanceNorm2d default eps


def _instance_norm(z):
    """Non-affine InstanceNorm on (C, HW): per-channel over HW lanes, f32,
    two-pass (centered) variance for numerical robustness."""
    mean = jnp.mean(z, axis=1, keepdims=True)            # (C, 1)
    centered = z - mean
    var = jnp.mean(centered * centered, axis=1, keepdims=True)
    return centered * lax.rsqrt(var + EPS)


def _resblock_kernel(x_ref, w1_ref, w2_ref, out_ref, *, H, W, Bt):
    # Block shapes (Bt images per grid step):
    #   x_ref   : (Bt, C, H*W)  f32, NCHW flattened over spatial dims
    #   w1/w2   : (3, C, 3*C)   bf16, row-grouped by dh; within a group the
    #                           K axis is k = dw*C + ci
    #   out_ref : (Bt, C, H*W)
    HW = H * W

    # --- per-tap validity masks (implicit zero padding), built once per grid
    #     step and shared by both convs and all Bt images. ---
    pos = lax.broadcasted_iota(jnp.int32, (1, HW), 1)
    if (W & (W - 1)) == 0:
        w_idx = pos & (W - 1)          # power-of-two width: no VPU div/mod
    else:
        w_idx = pos % W                # general fallback
    h_valid = {-1: pos >= W, 0: None, 1: pos < (H - 1) * W}
    w_valid = {-1: w_idx >= 1, 0: None, 1: w_idx <= W - 2}

    def tap(z, d_h, d_w):
        """Shifted + boundary-masked copy of z (f32) for tap (d_h, d_w)."""
        s = d_h * W + d_w
        shifted = z if s == 0 else pltpu.roll(z, shift=(-s) % HW, axis=1)
        m = h_valid[d_h]
        if w_valid[d_w] is not None:
            m = w_valid[d_w] if m is None else (m & w_valid[d_w])
        return shifted if m is None else jnp.where(m, shifted, 0.0)

    def conv3x3(z, w_ref):
        """3x3/stride1/pad1 conv as three accumulating K=3C GEMMs (grouped by
        dh). z: (C, HW) f32 -> (C, HW) f32. Operands fed to the MXU in bf16;
        accumulation in f32."""
        acc = None
        for g, d_h in enumerate((-1, 0, 1)):
            patch = jnp.concatenate(
                [tap(z, d_h, d_w) for d_w in (-1, 0, 1)], axis=0)   # (3C, HW) f32
            part = jnp.dot(w_ref[g], patch.astype(jnp.bfloat16),
                           preferred_element_type=jnp.float32)      # (C, HW) f32
            acc = part if acc is None else acc + part
        return acc

    def one_image(i, carry):
        x = x_ref[i].astype(jnp.float32)                             # (C, HW)
        # conv1 (bias exactly cancelled by InstanceNorm) -> IN -> ReLU
        y1 = jnp.maximum(_instance_norm(conv3x3(x, w1_ref)), 0.0)
        # conv2 -> IN
        y2 = _instance_norm(conv3x3(y1, w2_ref))
        # residual add, store lane-dense (C, HW) row
        out_ref[i] = (y2 + x).astype(out_ref.dtype)
        return carry

    lax.fori_loop(0, Bt, one_image, 0, unroll=True)


def _largest_divisor_leq(n, cap):
    best = 1
    for d in range(1, min(n, cap) + 1):
        if n % d == 0:
            best = d
    return best


def resblock_forward(x_nchw, w1, b1, w2, b2, *, max_batch_tile=8):
    """ResBlock forward.

    x_nchw : (B, C, H, W) float32 (PyTorch NCHW).
    w1, w2 : (C, C, 3, 3) PyTorch OIHW conv weights.
    b1, b2 : (C,) conv biases — accepted for API parity but unused: with
             non-affine InstanceNorm2d the bias is exactly cancelled by the
             mean subtraction (zero numerical effect).
    """
    del b1, b2
    B, C, H, W = x_nchw.shape
    HW = H * W

    # Free (contiguous) reshape; kernel stays NCHW-native with HW on lanes.
    x_flat = x_nchw.reshape(B, C, HW)

    def group_weights(w):
        # OIHW -> (3, C, 3C): group index = kh (dh), within-group K = kw*C + ci.
        # Cast to bf16 once here (not per grid step in the kernel).
        return (jnp.transpose(w, (2, 0, 3, 1))
                .reshape(3, C, 3 * C)
                .astype(jnp.bfloat16))

    w1g = group_weights(w1)
    w2g = group_weights(w2)

    # Batch several images per grid step to amortize per-step overhead.
    Bt = _largest_divisor_leq(B, max_batch_tile)
    kernel = functools.partial(_resblock_kernel, H=H, W=W, Bt=Bt)

    out_flat = pl.pallas_call(
        kernel,
        out_shape=jax.ShapeDtypeStruct((B, C, HW), x_nchw.dtype),
        grid_spec=pltpu.PrefetchScalarGridSpec(
            num_scalar_prefetch=0,
            grid=(B // Bt,),
            in_specs=[
                pl.BlockSpec((Bt, C, HW), lambda b: (b, 0, 0)),
                pl.BlockSpec((3, C, 3 * C), lambda b: (0, 0, 0)),
                pl.BlockSpec((3, C, 3 * C), lambda b: (0, 0, 0)),
            ],
            out_specs=pl.BlockSpec((Bt, C, HW), lambda b: (b, 0, 0)),
        ),
        compiler_params=pltpu.CompilerParams(
            dimension_semantics=("parallel",)),
    )(x_flat, w1g, w2g)

    return out_flat.reshape(B, C, H, W)


def _reference_resblock(x, w1, b1, w2, b2):
    """Plain-JAX reference (NCHW, f32), mirrors PyTorch semantics (with biases)."""
    def conv(y, w, b):
        z = lax.conv_general_dilated(
            y, w, window_strides=(1, 1), padding=((1, 1), (1, 1)),
            dimension_numbers=('NCHW', 'OIHW', 'NCHW'))
        return z + b[None, :, None, None]

    def inorm(y):
        m = jnp.mean(y, axis=(2, 3), keepdims=True)
        v = jnp.mean((y - m) ** 2, axis=(2, 3), keepdims=True)
        return (y - m) * lax.rsqrt(v + EPS)

    y = jnp.maximum(inorm(conv(x, w1, b1)), 0.0)
    y = inorm(conv(y, w2, b2))
    return y + x


if __name__ == "__main__":
    B, C, H, W = 2, 32, 16, 16
    key = jax.random.PRNGKey(0)
    kx, kw1, kb1, kw2, kb2 = jax.random.split(key, 5)

    x = jax.random.normal(kx, (B, C, H, W), dtype=jnp.float32)
    # deterministic synthetic parameters (PyTorch Conv2d layouts)
    w1 = jax.random.normal(kw1, (C, C, 3, 3), dtype=jnp.float32) * 0.1
    b1 = jax.random.normal(kb1, (C,), dtype=jnp.float32) * 0.1
    w2 = jax.random.normal(kw2, (C, C, 3, 3), dtype=jnp.float32) * 0.1
    b2 = jax.random.normal(kb2, (C,), dtype=jnp.float32) * 0.1

    out = jax.block_until_ready(resblock_forward(x, w1, b1, w2, b2))

    ref = jax.block_until_ready(_reference_resblock(x, w1, b1, w2, b2))
    assert out.shape == (B, C, H, W)
    # Tolerance accounts for bf16 MXU operands (weights/patches); norm,
    # activation, residual and accumulation are all f32.
    assert jnp.allclose(out, ref, atol=5e-2, rtol=5e-2), \
        f"max abs diff {jnp.max(jnp.abs(out - ref))}"

    print("KERNEL_OK")
</pallas_src>

<mosaic_0001>
module attributes {stable_mosaic.version = 11 : i64} {
  func.func @_resblock_kernel(%arg0: i32, %arg1: memref<2x32x256xf32, #tpu.memory_space<vmem>>, %arg2: memref<3x32x96xbf16, #tpu.memory_space<vmem>>, %arg3: memref<3x32x96xbf16, #tpu.memory_space<vmem>>, %arg4: memref<2x32x256xf32, #tpu.memory_space<vmem>>) attributes {dimension_semantics = [#tpu.dimension_semantics<parallel>], iteration_bounds = array<i64: 1>, scalar_prefetch = 0 : i64, scratch_operands = 0 : i64, tpu.core_type = #tpu.core_type<tc>, window_params = [{transform_indices = @transform_0, window_bounds = array<i64: 2, 32, 256>}, {pipeline_mode = #tpu.pipeline_mode<synchronous>, transform_indices = @transform_1, window_bounds = array<i64: 3, 32, 96>}, {pipeline_mode = #tpu.pipeline_mode<synchronous>, transform_indices = @transform_2, window_bounds = array<i64: 3, 32, 96>}, {transform_indices = @transform_3, window_bounds = array<i64: 2, 32, 256>}]} {
    %0 = tpu.iota {dimensions = array<i32: 1>} : vector<1x256xi32>
    %c15_i32 = arith.constant 15 : i32
    %1 = vector.broadcast %c15_i32 : i32 to vector<1x256xi32>
    %2 = arith.andi %0, %1 : vector<1x256xi32>
    %c16_i32 = arith.constant 16 : i32
    %3 = vector.broadcast %c16_i32 : i32 to vector<1x256xi32>
    %4 = arith.cmpi sge, %0, %3 : vector<1x256xi32>
    %c240_i32 = arith.constant 240 : i32
    %5 = vector.broadcast %c240_i32 : i32 to vector<1x256xi32>
    %6 = arith.cmpi slt, %0, %5 : vector<1x256xi32>
    %c1_i32 = arith.constant 1 : i32
    %7 = vector.broadcast %c1_i32 : i32 to vector<1x256xi32>
    %8 = arith.cmpi sge, %2, %7 : vector<1x256xi32>
    %c14_i32 = arith.constant 14 : i32
    %9 = vector.broadcast %c14_i32 : i32 to vector<1x256xi32>
    %10 = arith.cmpi sle, %2, %9 : vector<1x256xi32>
    %c0_i32 = arith.constant 0 : i32
    %11 = arith.index_cast %c0_i32 : i32 to index
    %c0 = arith.constant 0 : index
    %c0_0 = arith.constant 0 : index
    %12 = vector.load %arg1[%11, %c0, %c0_0] : memref<2x32x256xf32, #tpu.memory_space<vmem>>, vector<1x32x256xf32>
    %13 = vector.shape_cast %12 : vector<1x32x256xf32> to vector<32x256xf32>
    %c17_i32 = arith.constant 17 : i32
    %14 = tpu.dynamic_rotate %13 by %c17_i32 dim 1 : vector<32x256xf32>, i32 -> vector<32x256xf32>
    %15 = arith.andi %4, %8 : vector<1x256xi1>
    %cst = arith.constant 0.000000e+00 : f32
    %16 = vector.shape_cast %15 : vector<1x256xi1> to vector<1x256xi1>
    %17 = vector.broadcast %16 : vector<1x256xi1> to vector<32x256xi1>
    %18 = vector.broadcast %cst : f32 to vector<32x256xf32>
    %19 = arith.select %17, %14, %18 : vector<32x256xi1>, vector<32x256xf32>
    %c16_i32_1 = arith.constant 16 : i32
    %20 = tpu.dynamic_rotate %13 by %c16_i32_1 dim 1 : vector<32x256xf32>, i32 -> vector<32x256xf32>
    %cst_2 = arith.constant 0.000000e+00 : f32
    %21 = vector.shape_cast %4 : vector<1x256xi1> to vector<1x256xi1>
    %22 = vector.broadcast %21 : vector<1x256xi1> to vector<32x256xi1>
    %23 = vector.broadcast %cst_2 : f32 to vector<32x256xf32>
    %24 = arith.select %22, %20, %23 : vector<32x256xi1>, vector<32x256xf32>
    %c15_i32_3 = arith.constant 15 : i32
    %25 = tpu.dynamic_rotate %13 by %c15_i32_3 dim 1 : vector<32x256xf32>, i32 -> vector<32x256xf32>
    %26 = arith.andi %4, %10 : vector<1x256xi1>
    %cst_4 = arith.constant 0.000000e+00 : f32
    %27 = vector.shape_cast %26 : vector<1x256xi1> to vector<1x256xi1>
    %28 = vector.broadcast %27 : vector<1x256xi1> to vector<32x256xi1>
    %29 = vector.broadcast %cst_4 : f32 to vector<32x256xf32>
    %30 = arith.select %28, %25, %29 : vector<32x256xi1>, vector<32x256xf32>
    %31 = tpu.concatenate %19, %24, %30 in 0 : vector<32x256xf32>, vector<32x256xf32>, vector<32x256xf32> -> vector<96x256xf32>
    %c0_5 = arith.constant 0 : index
    %c0_6 = arith.constant 0 : index
    %c0_7 = arith.constant 0 : index
    %32 = vector.load %arg2[%c0_5, %c0_6, %c0_7] : memref<3x32x96xbf16, #tpu.memory_space<vmem>>, vector<1x32x96xbf16>
    %33 = vector.shape_cast %32 : vector<1x32x96xbf16> to vector<32x96xbf16>
    %34 = arith.truncf %31 : vector<96x256xf32> to vector<96x256xbf16>
    %cst_8 = arith.constant dense<0.000000e+00> : vector<32x256xf32>
    %35 = tpu.matmul %33, %34, %cst_8 {dimension_numbers = #tpu.dot_dimension_numbers<[1], [0], [0], [1], [0, 0, 1, 1], [], []>} : vector<32x96xbf16>, vector<96x256xbf16>, vector<32x256xf32> -> vector<32x256xf32>
    %c1_i32_9 = arith.constant 1 : i32
    %36 = tpu.dynamic_rotate %13 by %c1_i32_9 dim 1 : vector<32x256xf32>, i32 -> vector<32x256xf32>
    %cst_10 = arith.constant 0.000000e+00 : f32
    %37 = vector.shape_cast %8 : vector<1x256xi1> to vector<1x256xi1>
    %38 = vector.broadcast %37 : vector<1x256xi1> to vector<32x256xi1>
    %39 = vector.broadcast %cst_10 : f32 to vector<32x256xf32>
    %40 = arith.select %38, %36, %39 : vector<32x256xi1>, vector<32x256xf32>
    %c255_i32 = arith.constant 255 : i32
    %41 = tpu.dynamic_rotate %13 by %c255_i32 dim 1 : vector<32x256xf32>, i32 -> vector<32x256xf32>
    %cst_11 = arith.constant 0.000000e+00 : f32
    %42 = vector.shape_cast %10 : vector<1x256xi1> to vector<1x256xi1>
    %43 = vector.broadcast %42 : vector<1x256xi1> to vector<32x256xi1>
    %44 = vector.broadcast %cst_11 : f32 to vector<32x256xf32>
    %45 = arith.select %43, %41, %44 : vector<32x256xi1>, vector<32x256xf32>
    %46 = tpu.concatenate %40, %13, %45 in 0 : vector<32x256xf32>, vector<32x256xf32>, vector<32x256xf32> -> vector<96x256xf32>
    %c1 = arith.constant 1 : index
    %c0_12 = arith.constant 0 : index
    %c0_13 = arith.constant 0 : index
    %47 = vector.load %arg2[%c1, %c0_12, %c0_13] : memref<3x32x96xbf16, #tpu.memory_space<vmem>>, vector<1x32x96xbf16>
    %48 = vector.shape_cast %47 : vector<1x32x96xbf16> to vector<32x96xbf16>
    %49 = arith.truncf %46 : vector<96x256xf32> to vector<96x256xbf16>
    %cst_14 = arith.constant dense<0.000000e+00> : vector<32x256xf32>
    %50 = tpu.matmul %48, %49, %cst_14 {dimension_numbers = #tpu.dot_dimension_numbers<[1], [0], [0], [1], [0, 0, 1, 1], [], []>} : vector<32x96xbf16>, vector<96x256xbf16>, vector<32x256xf32> -> vector<32x256xf32>
    %51 = arith.addf %35, %50 : vector<32x256xf32>
    %c241_i32 = arith.constant 241 : i32
    %52 = tpu.dynamic_rotate %13 by %c241_i32 dim 1 : vector<32x256xf32>, i32 -> vector<32x256xf32>
    %53 = arith.andi %6, %8 : vector<1x256xi1>
    %cst_15 = arith.constant 0.000000e+00 : f32
    %54 = vector.shape_cast %53 : vector<1x256xi1> to vector<1x256xi1>
    %55 = vector.broadcast %54 : vector<1x256xi1> to vector<32x256xi1>
    %56 = vector.broadcast %cst_15 : f32 to vector<32x256xf32>
    %57 = arith.select %55, %52, %56 : vector<32x256xi1>, vector<32x256xf32>
    %c240_i32_16 = arith.constant 240 : i32
    %58 = tpu.dynamic_rotate %13 by %c240_i32_16 dim 1 : vector<32x256xf32>, i32 -> vector<32x256xf32>
    %cst_17 = arith.constant 0.000000e+00 : f32
    %59 = vector.shape_cast %6 : vector<1x256xi1> to vector<1x256xi1>
    %60 = vector.broadcast %59 : vector<1x256xi1> to vector<32x256xi1>
    %61 = vector.broadcast %cst_17 : f32 to vector<32x256xf32>
    %62 = arith.select %60, %58, %61 : vector<32x256xi1>, vector<32x256xf32>
    %c239_i32 = arith.constant 239 : i32
    %63 = tpu.dynamic_rotate %13 by %c239_i32 dim 1 : vector<32x256xf32>, i32 -> vector<32x256xf32>
    %64 = arith.andi %6, %10 : vector<1x256xi1>
    %cst_18 = arith.constant 0.000000e+00 : f32
    %65 = vector.shape_cast %64 : vector<1x256xi1> to vector<1x256xi1>
    %66 = vector.broadcast %65 : vector<1x256xi1> to vector<32x256xi1>
    %67 = vector.broadcast %cst_18 : f32 to vector<32x256xf32>
    %68 = arith.select %66, %63, %67 : vector<32x256xi1>, vector<32x256xf32>
    %69 = tpu.concatenate %57, %62, %68 in 0 : vector<32x256xf32>, vector<32x256xf32>, vector<32x256xf32> -> vector<96x256xf32>
    %c2 = arith.constant 2 : index
    %c0_19 = arith.constant 0 : index
    %c0_20 = arith.constant 0 : index
    %70 = vector.load %arg2[%c2, %c0_19, %c0_20] : memref<3x32x96xbf16, #tpu.memory_space<vmem>>, vector<1x32x96xbf16>
    %71 = vector.shape_cast %70 : vector<1x32x96xbf16> to vector<32x96xbf16>
    %72 = arith.truncf %69 : vector<96x256xf32> to vector<96x256xbf16>
    %cst_21 = arith.constant dense<0.000000e+00> : vector<32x256xf32>
    %73 = tpu.matmul %71, %72, %cst_21 {dimension_numbers = #tpu.dot_dimension_numbers<[1], [0], [0], [1], [0, 0, 1, 1], [], []>} : vector<32x96xbf16>, vector<96x256xbf16>, vector<32x256xf32> -> vector<32x256xf32>
    %74 = arith.addf %51, %73 : vector<32x256xf32>
    %cst_22 = arith.constant dense<0.000000e+00> : vector<32xf32>
    %75 = vector.multi_reduction <add>, %74, %cst_22 [1] : vector<32x256xf32> to vector<32xf32>
    %76 = vector.shape_cast %75 : vector<32xf32> to vector<32x1xf32>
    %cst_23 = arith.constant 2.560000e+02 : f32
    %77 = vector.broadcast %cst_23 : f32 to vector<32x1xf32>
    %78 = arith.divf %76, %77 : vector<32x1xf32>
    %79 = vector.broadcast %78 : vector<32x1xf32> to vector<32x256xf32>
    %80 = arith.subf %74, %79 : vector<32x256xf32>
    %81 = arith.mulf %80, %80 : vector<32x256xf32>
    %cst_24 = arith.constant dense<0.000000e+00> : vector<32xf32>
    %82 = vector.multi_reduction <add>, %81, %cst_24 [1] : vector<32x256xf32> to vector<32xf32>
    %83 = vector.shape_cast %82 : vector<32xf32> to vector<32x1xf32>
    %cst_25 = arith.constant 2.560000e+02 : f32
    %84 = vector.broadcast %cst_25 : f32 to vector<32x1xf32>
    %85 = arith.divf %83, %84 : vector<32x1xf32>
    %cst_26 = arith.constant 9.99999974E-6 : f32
    %86 = vector.broadcast %cst_26 : f32 to vector<32x1xf32>
    %87 = arith.addf %85, %86 : vector<32x1xf32>
    %88 = math.rsqrt %87 : vector<32x1xf32>
    %89 = vector.broadcast %88 : vector<32x1xf32> to vector<32x256xf32>
    %90 = arith.mulf %80, %89 : vector<32x256xf32>
    %cst_27 = arith.constant 0.000000e+00 : f32
    %91 = vector.broadcast %cst_27 : f32 to vector<32x256xf32>
    %92 = arith.maximumf %90, %91 : vector<32x256xf32>
    %c17_i32_28 = arith.constant 17 : i32
    %93 = tpu.dynamic_rotate %92 by %c17_i32_28 dim 1 : vector<32x256xf32>, i32 -> vector<32x256xf32>
    %94 = arith.andi %4, %8 : vector<1x256xi1>
    %cst_29 = arith.constant 0.000000e+00 : f32
    %95 = vector.shape_cast %94 : vector<1x256xi1> to vector<1x256xi1>
    %96 = vector.broadcast %95 : vector<1x256xi1> to vector<32x256xi1>
    %97 = vector.broadcast %cst_29 : f32 to vector<32x256xf32>
    %98 = arith.select %96, %93, %97 : vector<32x256xi1>, vector<32x256xf32>
    %c16_i32_30 = arith.constant 16 : i32
    %99 = tpu.dynamic_rotate %92 by %c16_i32_30 dim 1 : vector<32x256xf32>, i32 -> vector<32x256xf32>
    %cst_31 = arith.constant 0.000000e+00 : f32
    %100 = vector.shape_cast %4 : vector<1x256xi1> to vector<1x256xi1>
    %101 = vector.broadcast %100 : vector<1x256xi1> to vector<32x256xi1>
    %102 = vector.broadcast %cst_31 : f32 to vector<32x256xf32>
    %103 = arith.select %101, %99, %102 : vector<32x256xi1>, vector<32x256xf32>
    %c15_i32_32 = arith.constant 15 : i32
    %104 = tpu.dynamic_rotate %92 by %c15_i32_32 dim 1 : vector<32x256xf32>, i32 -> vector<32x256xf32>
    %105 = arith.andi %4, %10 : vector<1x256xi1>
    %cst_33 = arith.constant 0.000000e+00 : f32
    %106 = vector.shape_cast %105 : vector<1x256xi1> to vector<1x256xi1>
    %107 = vector.broadcast %106 : vector<1x256xi1> to vector<32x256xi1>
    %108 = vector.broadcast %cst_33 : f32 to vector<32x256xf32>
    %109 = arith.select %107, %104, %108 : vector<32x256xi1>, vector<32x256xf32>
    %110 = tpu.concatenate %98, %103, %109 in 0 : vector<32x256xf32>, vector<32x256xf32>, vector<32x256xf32> -> vector<96x256xf32>
    %c0_34 = arith.constant 0 : index
    %c0_35 = arith.constant 0 : index
    %c0_36 = arith.constant 0 : index
    %111 = vector.load %arg3[%c0_34, %c0_35, %c0_36] : memref<3x32x96xbf16, #tpu.memory_space<vmem>>, vector<1x32x96xbf16>
    %112 = vector.shape_cast %111 : vector<1x32x96xbf16> to vector<32x96xbf16>
    %113 = arith.truncf %110 : vector<96x256xf32> to vector<96x256xbf16>
    %cst_37 = arith.constant dense<0.000000e+00> : vector<32x256xf32>
    %114 = tpu.matmul %112, %113, %cst_37 {dimension_numbers = #tpu.dot_dimension_numbers<[1], [0], [0], [1], [0, 0, 1, 1], [], []>} : vector<32x96xbf16>, vector<96x256xbf16>, vector<32x256xf32> -> vector<32x256xf32>
    %c1_i32_38 = arith.constant 1 : i32
    %115 = tpu.dynamic_rotate %92 by %c1_i32_38 dim 1 : vector<32x256xf32>, i32 -> vector<32x256xf32>
    %cst_39 = arith.constant 0.000000e+00 : f32
    %116 = vector.shape_cast %8 : vector<1x256xi1> to vector<1x256xi1>
    %117 = vector.broadcast %116 : vector<1x256xi1> to vector<32x256xi1>
    %118 = vector.broadcast %cst_39 : f32 to vector<32x256xf32>
    %119 = arith.select %117, %115, %118 : vector<32x256xi1>, vector<32x256xf32>
    %c255_i32_40 = arith.constant 255 : i32
    %120 = tpu.dynamic_rotate %92 by %c255_i32_40 dim 1 : vector<32x256xf32>, i32 -> vector<32x256xf32>
    %cst_41 = arith.constant 0.000000e+00 : f32
    %121 = vector.shape_cast %10 : vector<1x256xi1> to vector<1x256xi1>
    %122 = vector.broadcast %121 : vector<1x256xi1> to vector<32x256xi1>
    %123 = vector.broadcast %cst_41 : f32 to vector<32x256xf32>
    %124 = arith.select %122, %120, %123 : vector<32x256xi1>, vector<32x256xf32>
    %125 = tpu.concatenate %119, %92, %124 in 0 : vector<32x256xf32>, vector<32x256xf32>, vector<32x256xf32> -> vector<96x256xf32>
    %c1_42 = arith.constant 1 : index
    %c0_43 = arith.constant 0 : index
    %c0_44 = arith.constant 0 : index
    %126 = vector.load %arg3[%c1_42, %c0_43, %c0_44] : memref<3x32x96xbf16, #tpu.memory_space<vmem>>, vector<1x32x96xbf16>
    %127 = vector.shape_cast %126 : vector<1x32x96xbf16> to vector<32x96xbf16>
    %128 = arith.truncf %125 : vector<96x256xf32> to vector<96x256xbf16>
    %cst_45 = arith.constant dense<0.000000e+00> : vector<32x256xf32>
    %129 = tpu.matmul %127, %128, %cst_45 {dimension_numbers = #tpu.dot_dimension_numbers<[1], [0], [0], [1], [0, 0, 1, 1], [], []>} : vector<32x96xbf16>, vector<96x256xbf16>, vector<32x256xf32> -> vector<32x256xf32>
    %130 = arith.addf %114, %129 : vector<32x256xf32>
    %c241_i32_46 = arith.constant 241 : i32
    %131 = tpu.dynamic_rotate %92 by %c241_i32_46 dim 1 : vector<32x256xf32>, i32 -> vector<32x256xf32>
    %132 = arith.andi %6, %8 : vector<1x256xi1>
    %cst_47 = arith.constant 0.000000e+00 : f32
    %133 = vector.shape_cast %132 : vector<1x256xi1> to vector<1x256xi1>
    %134 = vector.broadcast %133 : vector<1x256xi1> to vector<32x256xi1>
    %135 = vector.broadcast %cst_47 : f32 to vector<32x256xf32>
    %136 = arith.select %134, %131, %135 : vector<32x256xi1>, vector<32x256xf32>
    %c240_i32_48 = arith.constant 240 : i32
    %137 = tpu.dynamic_rotate %92 by %c240_i32_48 dim 1 : vector<32x256xf32>, i32 -> vector<32x256xf32>
    %cst_49 = arith.constant 0.000000e+00 : f32
    %138 = vector.shape_cast %6 : vector<1x256xi1> to vector<1x256xi1>
    %139 = vector.broadcast %138 : vector<1x256xi1> to vector<32x256xi1>
    %140 = vector.broadcast %cst_49 : f32 to vector<32x256xf32>
    %141 = arith.select %139, %137, %140 : vector<32x256xi1>, vector<32x256xf32>
    %c239_i32_50 = arith.constant 239 : i32
    %142 = tpu.dynamic_rotate %92 by %c239_i32_50 dim 1 : vector<32x256xf32>, i32 -> vector<32x256xf32>
    %143 = arith.andi %6, %10 : vector<1x256xi1>
    %cst_51 = arith.constant 0.000000e+00 : f32
    %144 = vector.shape_cast %143 : vector<1x256xi1> to vector<1x256xi1>
    %145 = vector.broadcast %144 : vector<1x256xi1> to vector<32x256xi1>
    %146 = vector.broadcast %cst_51 : f32 to vector<32x256xf32>
    %147 = arith.select %145, %142, %146 : vector<32x256xi1>, vector<32x256xf32>
    %148 = tpu.concatenate %136, %141, %147 in 0 : vector<32x256xf32>, vector<32x256xf32>, vector<32x256xf32> -> vector<96x256xf32>
    %c2_52 = arith.constant 2 : index
    %c0_53 = arith.constant 0 : index
    %c0_54 = arith.constant 0 : index
    %149 = vector.load %arg3[%c2_52, %c0_53, %c0_54] : memref<3x32x96xbf16, #tpu.memory_space<vmem>>, vector<1x32x96xbf16>
    %150 = vector.shape_cast %149 : vector<1x32x96xbf16> to vector<32x96xbf16>
    %151 = arith.truncf %148 : vector<96x256xf32> to vector<96x256xbf16>
    %cst_55 = arith.constant dense<0.000000e+00> : vector<32x256xf32>
    %152 = tpu.matmul %150, %151, %cst_55 {dimension_numbers = #tpu.dot_dimension_numbers<[1], [0], [0], [1], [0, 0, 1, 1], [], []>} : vector<32x96xbf16>, vector<96x256xbf16>, vector<32x256xf32> -> vector<32x256xf32>
    %153 = arith.addf %130, %152 : vector<32x256xf32>
    %cst_56 = arith.constant dense<0.000000e+00> : vector<32xf32>
    %154 = vector.multi_reduction <add>, %153, %cst_56 [1] : vector<32x256xf32> to vector<32xf32>
    %155 = vector.shape_cast %154 : vector<32xf32> to vector<32x1xf32>
    %cst_57 = arith.constant 2.560000e+02 : f32
    %156 = vector.broadcast %cst_57 : f32 to vector<32x1xf32>
    %157 = arith.divf %155, %156 : vector<32x1xf32>
    %158 = vector.broadcast %157 : vector<32x1xf32> to vector<32x256xf32>
    %159 = arith.subf %153, %158 : vector<32x256xf32>
    %160 = arith.mulf %159, %159 : vector<32x256xf32>
    %cst_58 = arith.constant dense<0.000000e+00> : vector<32xf32>
    %161 = vector.multi_reduction <add>, %160, %cst_58 [1] : vector<32x256xf32> to vector<32xf32>
    %162 = vector.shape_cast %161 : vector<32xf32> to vector<32x1xf32>
    %cst_59 = arith.constant 2.560000e+02 : f32
    %163 = vector.broadcast %cst_59 : f32 to vector<32x1xf32>
    %164 = arith.divf %162, %163 : vector<32x1xf32>
    %cst_60 = arith.constant 9.99999974E-6 : f32
    %165 = vector.broadcast %cst_60 : f32 to vector<32x1xf32>
    %166 = arith.addf %164, %165 : vector<32x1xf32>
    %167 = math.rsqrt %166 : vector<32x1xf32>
    %168 = vector.broadcast %167 : vector<32x1xf32> to vector<32x256xf32>
    %169 = arith.mulf %159, %168 : vector<32x256xf32>
    %170 = arith.addf %169, %13 : vector<32x256xf32>
    %171 = arith.index_cast %c0_i32 : i32 to index
    %c0_61 = arith.constant 0 : index
    %c0_62 = arith.constant 0 : index
    %172 = vector.load %arg4[%171, %c0_61, %c0_62] : memref<2x32x256xf32, #tpu.memory_space<vmem>>, vector<1x32x256xf32>
    %173 = vector.shape_cast %172 : vector<1x32x256xf32> to vector<32x256xf32>
    %174 = vector.shape_cast %170 : vector<32x256xf32> to vector<1x32x256xf32>
    tpu.vector_store %arg4[%171, %c0_61, %c0_62], %174 {strides = array<i32>} : memref<2x32x256xf32, #tpu.memory_space<vmem>>, vector<1x32x256xf32>,
    %c1_i32_63 = arith.constant 1 : i32
    %175 = arith.index_cast %c1_i32_63 : i32 to index
    %c0_64 = arith.constant 0 : index
    %c0_65 = arith.constant 0 : index
    %176 = vector.load %arg1[%175, %c0_64, %c0_65] : memref<2x32x256xf32, #tpu.memory_space<vmem>>, vector<1x32x256xf32>
    %177 = vector.shape_cast %176 : vector<1x32x256xf32> to vector<32x256xf32>
    %c17_i32_66 = arith.constant 17 : i32
    %178 = tpu.dynamic_rotate %177 by %c17_i32_66 dim 1 : vector<32x256xf32>, i32 -> vector<32x256xf32>
    %179 = arith.andi %4, %8 : vector<1x256xi1>
    %cst_67 = arith.constant 0.000000e+00 : f32
    %180 = vector.shape_cast %179 : vector<1x256xi1> to vector<1x256xi1>
    %181 = vector.broadcast %180 : vector<1x256xi1> to vector<32x256xi1>
    %182 = vector.broadcast %cst_67 : f32 to vector<32x256xf32>
    %183 = arith.select %181, %178, %182 : vector<32x256xi1>, vector<32x256xf32>
    %c16_i32_68 = arith.constant 16 : i32
    %184 = tpu.dynamic_rotate %177 by %c16_i32_68 dim 1 : vector<32x256xf32>, i32 -> vector<32x256xf32>
    %cst_69 = arith.constant 0.000000e+00 : f32
    %185 = vector.shape_cast %4 : vector<1x256xi1> to vector<1x256xi1>
    %186 = vector.broadcast %185 : vector<1x256xi1> to vector<32x256xi1>
    %187 = vector.broadcast %cst_69 : f32 to vector<32x256xf32>
    %188 = arith.select %186, %184, %187 : vector<32x256xi1>, vector<32x256xf32>
    %c15_i32_70 = arith.constant 15 : i32
    %189 = tpu.dynamic_rotate %177 by %c15_i32_70 dim 1 : vector<32x256xf32>, i32 -> vector<32x256xf32>
    %190 = arith.andi %4, %10 : vector<1x256xi1>
    %cst_71 = arith.constant 0.000000e+00 : f32
    %191 = vector.shape_cast %190 : vector<1x256xi1> to vector<1x256xi1>
    %192 = vector.broadcast %191 : vector<1x256xi1> to vector<32x256xi1>
    %193 = vector.broadcast %cst_71 : f32 to vector<32x256xf32>
    %194 = arith.select %192, %189, %193 : vector<32x256xi1>, vector<32x256xf32>
    %195 = tpu.concatenate %183, %188, %194 in 0 : vector<32x256xf32>, vector<32x256xf32>, vector<32x256xf32> -> vector<96x256xf32>
    %c0_72 = arith.constant 0 : index
    %c0_73 = arith.constant 0 : index
    %c0_74 = arith.constant 0 : index
    %196 = vector.load %arg2[%c0_72, %c0_73, %c0_74] : memref<3x32x96xbf16, #tpu.memory_space<vmem>>, vector<1x32x96xbf16>
    %197 = vector.shape_cast %196 : vector<1x32x96xbf16> to vector<32x96xbf16>
    %198 = arith.truncf %195 : vector<96x256xf32> to vector<96x256xbf16>
    %cst_75 = arith.constant dense<0.000000e+00> : vector<32x256xf32>
    %199 = tpu.matmul %197, %198, %cst_75 {dimension_numbers = #tpu.dot_dimension_numbers<[1], [0], [0], [1], [0, 0, 1, 1], [], []>} : vector<32x96xbf16>, vector<96x256xbf16>, vector<32x256xf32> -> vector<32x256xf32>
    %c1_i32_76 = arith.constant 1 : i32
    %200 = tpu.dynamic_rotate %177 by %c1_i32_76 dim 1 : vector<32x256xf32>, i32 -> vector<32x256xf32>
    %cst_77 = arith.constant 0.000000e+00 : f32
    %201 = vector.shape_cast %8 : vector<1x256xi1> to vector<1x256xi1>
    %202 = vector.broadcast %201 : vector<1x256xi1> to vector<32x256xi1>
    %203 = vector.broadcast %cst_77 : f32 to vector<32x256xf32>
    %204 = arith.select %202, %200, %203 : vector<32x256xi1>, vector<32x256xf32>
    %c255_i32_78 = arith.constant 255 : i32
    %205 = tpu.dynamic_rotate %177 by %c255_i32_78 dim 1 : vector<32x256xf32>, i32 -> vector<32x256xf32>
    %cst_79 = arith.constant 0.000000e+00 : f32
    %206 = vector.shape_cast %10 : vector<1x256xi1> to vector<1x256xi1>
    %207 = vector.broadcast %206 : vector<1x256xi1> to vector<32x256xi1>
    %208 = vector.broadcast %cst_79 : f32 to vector<32x256xf32>
    %209 = arith.select %207, %205, %208 : vector<32x256xi1>, vector<32x256xf32>
    %210 = tpu.concatenate %204, %177, %209 in 0 : vector<32x256xf32>, vector<32x256xf32>, vector<32x256xf32> -> vector<96x256xf32>
    %c1_80 = arith.constant 1 : index
    %c0_81 = arith.constant 0 : index
    %c0_82 = arith.constant 0 : index
    %211 = vector.load %arg2[%c1_80, %c0_81, %c0_82] : memref<3x32x96xbf16, #tpu.memory_space<vmem>>, vector<1x32x96xbf16>
    %212 = vector.shape_cast %211 : vector<1x32x96xbf16> to vector<32x96xbf16>
    %213 = arith.truncf %210 : vector<96x256xf32> to vector<96x256xbf16>
    %cst_83 = arith.constant dense<0.000000e+00> : vector<32x256xf32>
    %214 = tpu.matmul %212, %213, %cst_83 {dimension_numbers = #tpu.dot_dimension_numbers<[1], [0], [0], [1], [0, 0, 1, 1], [], []>} : vector<32x96xbf16>, vector<96x256xbf16>, vector<32x256xf32> -> vector<32x256xf32>
    %215 = arith.addf %199, %214 : vector<32x256xf32>
    %c241_i32_84 = arith.constant 241 : i32
    %216 = tpu.dynamic_rotate %177 by %c241_i32_84 dim 1 : vector<32x256xf32>, i32 -> vector<32x256xf32>
    %217 = arith.andi %6, %8 : vector<1x256xi1>
    %cst_85 = arith.constant 0.000000e+00 : f32
    %218 = vector.shape_cast %217 : vector<1x256xi1> to vector<1x256xi1>
    %219 = vector.broadcast %218 : vector<1x256xi1> to vector<32x256xi1>
    %220 = vector.broadcast %cst_85 : f32 to vector<32x256xf32>
    %221 = arith.select %219, %216, %220 : vector<32x256xi1>, vector<32x256xf32>
    %c240_i32_86 = arith.constant 240 : i32
    %222 = tpu.dynamic_rotate %177 by %c240_i32_86 dim 1 : vector<32x256xf32>, i32 -> vector<32x256xf32>
    %cst_87 = arith.constant 0.000000e+00 : f32
    %223 = vector.shape_cast %6 : vector<1x256xi1> to vector<1x256xi1>
    %224 = vector.broadcast %223 : vector<1x256xi1> to vector<32x256xi1>
    %225 = vector.broadcast %cst_87 : f32 to vector<32x256xf32>
    %226 = arith.select %224, %222, %225 : vector<32x256xi1>, vector<32x256xf32>
    %c239_i32_88 = arith.constant 239 : i32
    %227 = tpu.dynamic_rotate %177 by %c239_i32_88 dim 1 : vector<32x256xf32>, i32 -> vector<32x256xf32>
    %228 = arith.andi %6, %10 : vector<1x256xi1>
    %cst_89 = arith.constant 0.000000e+00 : f32
    %229 = vector.shape_cast %228 : vector<1x256xi1> to vector<1x256xi1>
    %230 = vector.broadcast %229 : vector<1x256xi1> to vector<32x256xi1>
    %231 = vector.broadcast %cst_89 : f32 to vector<32x256xf32>
    %232 = arith.select %230, %227, %231 : vector<32x256xi1>, vector<32x256xf32>
    %233 = tpu.concatenate %221, %226, %232 in 0 : vector<32x256xf32>, vector<32x256xf32>, vector<32x256xf32> -> vector<96x256xf32>
    %c2_90 = arith.constant 2 : index
    %c0_91 = arith.constant 0 : index
    %c0_92 = arith.constant 0 : index
    %234 = vector.load %arg2[%c2_90, %c0_91, %c0_92] : memref<3x32x96xbf16, #tpu.memory_space<vmem>>, vector<1x32x96xbf16>
    %235 = vector.shape_cast %234 : vector<1x32x96xbf16> to vector<32x96xbf16>
    %236 = arith.truncf %233 : vector<96x256xf32> to vector<96x256xbf16>
    %cst_93 = arith.constant dense<0.000000e+00> : vector<32x256xf32>
    %237 = tpu.matmul %235, %236, %cst_93 {dimension_numbers = #tpu.dot_dimension_numbers<[1], [0], [0], [1], [0, 0, 1, 1], [], []>} : vector<32x96xbf16>, vector<96x256xbf16>, vector<32x256xf32> -> vector<32x256xf32>
    %238 = arith.addf %215, %237 : vector<32x256xf32>
    %cst_94 = arith.constant dense<0.000000e+00> : vector<32xf32>
    %239 = vector.multi_reduction <add>, %238, %cst_94 [1] : vector<32x256xf32> to vector<32xf32>
    %240 = vector.shape_cast %239 : vector<32xf32> to vector<32x1xf32>
    %cst_95 = arith.constant 2.560000e+02 : f32
    %241 = vector.broadcast %cst_95 : f32 to vector<32x1xf32>
    %242 = arith.divf %240, %241 : vector<32x1xf32>
    %243 = vector.broadcast %242 : vector<32x1xf32> to vector<32x256xf32>
    %244 = arith.subf %238, %243 : vector<32x256xf32>
    %245 = arith.mulf %244, %244 : vector<32x256xf32>
    %cst_96 = arith.constant dense<0.000000e+00> : vector<32xf32>
    %246 = vector.multi_reduction <add>, %245, %cst_96 [1] : vector<32x256xf32> to vector<32xf32>
    %247 = vector.shape_cast %246 : vector<32xf32> to vector<32x1xf32>
    %cst_97 = arith.constant 2.560000e+02 : f32
    %248 = vector.broadcast %cst_97 : f32 to vector<32x1xf32>
    %249 = arith.divf %247, %248 : vector<32x1xf32>
    %cst_98 = arith.constant 9.99999974E-6 : f32
    %250 = vector.broadcast %cst_98 : f32 to vector<32x1xf32>
    %251 = arith.addf %249, %250 : vector<32x1xf32>
    %252 = math.rsqrt %251 : vector<32x1xf32>
    %253 = vector.broadcast %252 : vector<32x1xf32> to vector<32x256xf32>
    %254 = arith.mulf %244, %253 : vector<32x256xf32>
    %cst_99 = arith.constant 0.000000e+00 : f32
    %255 = vector.broadcast %cst_99 : f32 to vector<32x256xf32>
    %256 = arith.maximumf %254, %255 : vector<32x256xf32>
    %c17_i32_100 = arith.constant 17 : i32
    %257 = tpu.dynamic_rotate %256 by %c17_i32_100 dim 1 : vector<32x256xf32>, i32 -> vector<32x256xf32>
    %258 = arith.andi %4, %8 : vector<1x256xi1>
    %cst_101 = arith.constant 0.000000e+00 : f32
    %259 = vector.shape_cast %258 : vector<1x256xi1> to vector<1x256xi1>
    %260 = vector.broadcast %259 : vector<1x256xi1> to vector<32x256xi1>
    %261 = vector.broadcast %cst_101 : f32 to vector<32x256xf32>
    %262 = arith.select %260, %257, %261 : vector<32x256xi1>, vector<32x256xf32>
    %c16_i32_102 = arith.constant 16 : i32
    %263 = tpu.dynamic_rotate %256 by %c16_i32_102 dim 1 : vector<32x256xf32>, i32 -> vector<32x256xf32>
    %cst_103 = arith.constant 0.000000e+00 : f32
    %264 = vector.shape_cast %4 : vector<1x256xi1> to vector<1x256xi1>
    %265 = vector.broadcast %264 : vector<1x256xi1> to vector<32x256xi1>
    %266 = vector.broadcast %cst_103 : f32 to vector<32x256xf32>
    %267 = arith.select %265, %263, %266 : vector<32x256xi1>, vector<32x256xf32>
    %c15_i32_104 = arith.constant 15 : i32
    %268 = tpu.dynamic_rotate %256 by %c15_i32_104 dim 1 : vector<32x256xf32>, i32 -> vector<32x256xf32>
    %269 = arith.andi %4, %10 : vector<1x256xi1>
    %cst_105 = arith.constant 0.000000e+00 : f32
    %270 = vector.shape_cast %269 : vector<1x256xi1> to vector<1x256xi1>
    %271 = vector.broadcast %270 : vector<1x256xi1> to vector<32x256xi1>
    %272 = vector.broadcast %cst_105 : f32 to vector<32x256xf32>
    %273 = arith.select %271, %268, %272 : vector<32x256xi1>, vector<32x256xf32>
    %274 = tpu.concatenate %262, %267, %273 in 0 : vector<32x256xf32>, vector<32x256xf32>, vector<32x256xf32> -> vector<96x256xf32>
    %c0_106 = arith.constant 0 : index
    %c0_107 = arith.constant 0 : index
    %c0_108 = arith.constant 0 : index
    %275 = vector.load %arg3[%c0_106, %c0_107, %c0_108] : memref<3x32x96xbf16, #tpu.memory_space<vmem>>, vector<1x32x96xbf16>
    %276 = vector.shape_cast %275 : vector<1x32x96xbf16> to vector<32x96xbf16>
    %277 = arith.truncf %274 : vector<96x256xf32> to vector<96x256xbf16>
    %cst_109 = arith.constant dense<0.000000e+00> : vector<32x256xf32>
    %278 = tpu.matmul %276, %277, %cst_109 {dimension_numbers = #tpu.dot_dimension_numbers<[1], [0], [0], [1], [0, 0, 1, 1], [], []>} : vector<32x96xbf16>, vector<96x256xbf16>, vector<32x256xf32> -> vector<32x256xf32>
    %c1_i32_110 = arith.constant 1 : i32
    %279 = tpu.dynamic_rotate %256 by %c1_i32_110 dim 1 : vector<32x256xf32>, i32 -> vector<32x256xf32>
    %cst_111 = arith.constant 0.000000e+00 : f32
    %280 = vector.shape_cast %8 : vector<1x256xi1> to vector<1x256xi1>
    %281 = vector.broadcast %280 : vector<1x256xi1> to vector<32x256xi1>
    %282 = vector.broadcast %cst_111 : f32 to vector<32x256xf32>
    %283 = arith.select %281, %279, %282 : vector<32x256xi1>, vector<32x256xf32>
    %c255_i32_112 = arith.constant 255 : i32
    %284 = tpu.dynamic_rotate %256 by %c255_i32_112 dim 1 : vector<32x256xf32>, i32 -> vector<32x256xf32>
    %cst_113 = arith.constant 0.000000e+00 : f32
    %285 = vector.shape_cast %10 : vector<1x256xi1> to vector<1x256xi1>
    %286 = vector.broadcast %285 : vector<1x256xi1> to vector<32x256xi1>
    %287 = vector.broadcast %cst_113 : f32 to vector<32x256xf32>
    %288 = arith.select %286, %284, %287 : vector<32x256xi1>, vector<32x256xf32>
    %289 = tpu.concatenate %283, %256, %288 in 0 : vector<32x256xf32>, vector<32x256xf32>, vector<32x256xf32> -> vector<96x256xf32>
    %c1_114 = arith.constant 1 : index
    %c0_115 = arith.constant 0 : index
    %c0_116 = arith.constant 0 : index
    %290 = vector.load %arg3[%c1_114, %c0_115, %c0_116] : memref<3x32x96xbf16, #tpu.memory_space<vmem>>, vector<1x32x96xbf16>
    %291 = vector.shape_cast %290 : vector<1x32x96xbf16> to vector<32x96xbf16>
    %292 = arith.truncf %289 : vector<96x256xf32> to vector<96x256xbf16>
    %cst_117 = arith.constant dense<0.000000e+00> : vector<32x256xf32>
    %293 = tpu.matmul %291, %292, %cst_117 {dimension_numbers = #tpu.dot_dimension_numbers<[1], [0], [0], [1], [0, 0, 1, 1], [], []>} : vector<32x96xbf16>, vector<96x256xbf16>, vector<32x256xf32> -> vector<32x256xf32>
    %294 = arith.addf %278, %293 : vector<32x256xf32>
    %c241_i32_118 = arith.constant 241 : i32
    %295 = tpu.dynamic_rotate %256 by %c241_i32_118 dim 1 : vector<32x256xf32>, i32 -> vector<32x256xf32>
    %296 = arith.andi %6, %8 : vector<1x256xi1>
    %cst_119 = arith.constant 0.000000e+00 : f32
    %297 = vector.shape_cast %296 : vector<1x256xi1> to vector<1x256xi1>
    %298 = vector.broadcast %297 : vector<1x256xi1> to vector<32x256xi1>
    %299 = vector.broadcast %cst_119 : f32 to vector<32x256xf32>
    %300 = arith.select %298, %295, %299 : vector<32x256xi1>, vector<32x256xf32>
    %c240_i32_120 = arith.constant 240 : i32
    %301 = tpu.dynamic_rotate %256 by %c240_i32_120 dim 1 : vector<32x256xf32>, i32 -> vector<32x256xf32>
    %cst_121 = arith.constant 0.000000e+00 : f32
    %302 = vector.shape_cast %6 : vector<1x256xi1> to vector<1x256xi1>
    %303 = vector.broadcast %302 : vector<1x256xi1> to vector<32x256xi1>
    %304 = vector.broadcast %cst_121 : f32 to vector<32x256xf32>
    %305 = arith.select %303, %301, %304 : vector<32x256xi1>, vector<32x256xf32>
    %c239_i32_122 = arith.constant 239 : i32
    %306 = tpu.dynamic_rotate %256 by %c239_i32_122 dim 1 : vector<32x256xf32>, i32 -> vector<32x256xf32>
    %307 = arith.andi %6, %10 : vector<1x256xi1>
    %cst_123 = arith.constant 0.000000e+00 : f32
    %308 = vector.shape_cast %307 : vector<1x256xi1> to vector<1x256xi1>
    %309 = vector.broadcast %308 : vector<1x256xi1> to vector<32x256xi1>
    %310 = vector.broadcast %cst_123 : f32 to vector<32x256xf32>
    %311 = arith.select %309, %306, %310 : vector<32x256xi1>, vector<32x256xf32>
    %312 = tpu.concatenate %300, %305, %311 in 0 : vector<32x256xf32>, vector<32x256xf32>, vector<32x256xf32> -> vector<96x256xf32>
    %c2_124 = arith.constant 2 : index
    %c0_125 = arith.constant 0 : index
    %c0_126 = arith.constant 0 : index
    %313 = vector.load %arg3[%c2_124, %c0_125, %c0_126] : memref<3x32x96xbf16, #tpu.memory_space<vmem>>, vector<1x32x96xbf16>
    %314 = vector.shape_cast %313 : vector<1x32x96xbf16> to vector<32x96xbf16>
    %315 = arith.truncf %312 : vector<96x256xf32> to vector<96x256xbf16>
    %cst_127 = arith.constant dense<0.000000e+00> : vector<32x256xf32>
    %316 = tpu.matmul %314, %315, %cst_127 {dimension_numbers = #tpu.dot_dimension_numbers<[1], [0], [0], [1], [0, 0, 1, 1], [], []>} : vector<32x96xbf16>, vector<96x256xbf16>, vector<32x256xf32> -> vector<32x256xf32>
    %317 = arith.addf %294, %316 : vector<32x256xf32>
    %cst_128 = arith.constant dense<0.000000e+00> : vector<32xf32>
    %318 = vector.multi_reduction <add>, %317, %cst_128 [1] : vector<32x256xf32> to vector<32xf32>
    %319 = vector.shape_cast %318 : vector<32xf32> to vector<32x1xf32>
    %cst_129 = arith.constant 2.560000e+02 : f32
    %320 = vector.broadcast %cst_129 : f32 to vector<32x1xf32>
    %321 = arith.divf %319, %320 : vector<32x1xf32>
    %322 = vector.broadcast %321 : vector<32x1xf32> to vector<32x256xf32>
    %323 = arith.subf %317, %322 : vector<32x256xf32>
    %324 = arith.mulf %323, %323 : vector<32x256xf32>
    %cst_130 = arith.constant dense<0.000000e+00> : vector<32xf32>
    %325 = vector.multi_reduction <add>, %324, %cst_130 [1] : vector<32x256xf32> to vector<32xf32>
    %326 = vector.shape_cast %325 : vector<32xf32> to vector<32x1xf32>
    %cst_131 = arith.constant 2.560000e+02 : f32
    %327 = vector.broadcast %cst_131 : f32 to vector<32x1xf32>
    %328 = arith.divf %326, %327 : vector<32x1xf32>
    %cst_132 = arith.constant 9.99999974E-6 : f32
    %329 = vector.broadcast %cst_132 : f32 to vector<32x1xf32>
    %330 = arith.addf %328, %329 : vector<32x1xf32>
    %331 = math.rsqrt %330 : vector<32x1xf32>
    %332 = vector.broadcast %331 : vector<32x1xf32> to vector<32x256xf32>
    %333 = arith.mulf %323, %332 : vector<32x256xf32>
    %334 = arith.addf %333, %177 : vector<32x256xf32>
    %335 = arith.index_cast %c1_i32_63 : i32 to index
    %c0_133 = arith.constant 0 : index
    %c0_134 = arith.constant 0 : index
    %336 = vector.load %arg4[%335, %c0_133, %c0_134] : memref<2x32x256xf32, #tpu.memory_space<vmem>>, vector<1x32x256xf32>
    %337 = vector.shape_cast %336 : vector<1x32x256xf32> to vector<32x256xf32>
    %338 = vector.shape_cast %334 : vector<32x256xf32> to vector<1x32x256xf32>
    tpu.vector_store %arg4[%335, %c0_133, %c0_134], %338 {strides = array<i32>} : memref<2x32x256xf32, #tpu.memory_space<vmem>>, vector<1x32x256xf32>,
    %c2_i32 = arith.constant 2 : i32
    return
  }
  func.func @transform_0(%arg0: i32) -> (i32, i32, i32) {
    %c0_i32 = arith.constant 0 : i32
    %c0_i32_0 = arith.constant 0 : i32
    %c0_i32_1 = arith.constant 0 : i32
    return %arg0, %c0_i32, %c0_i32_0 : i32, i32, i32
  }
  func.func @transform_1(%arg0: i32) -> (i32, i32, i32) {
    %c0_i32 = arith.constant 0 : i32
    %c0_i32_0 = arith.constant 0 : i32
    %c0_i32_1 = arith.constant 0 : i32
    %c0_i32_2 = arith.constant 0 : i32
    return %c0_i32, %c0_i32_0, %c0_i32_1 : i32, i32, i32
  }
  func.func @transform_2(%arg0: i32) -> (i32, i32, i32) {
    %c0_i32 = arith.constant 0 : i32
    %c0_i32_0 = arith.constant 0 : i32
    %c0_i32_1 = arith.constant 0 : i32
    %c0_i32_2 = arith.constant 0 : i32
    return %c0_i32, %c0_i32_0, %c0_i32_1 : i32, i32, i32
  }
  func.func @transform_3(%arg0: i32) -> (i32, i32, i32) {
    %c0_i32 = arith.constant 0 : i32
    %c0_i32_0 = arith.constant 0 : i32
    %c0_i32_1 = arith.constant 0 : i32
    return %arg0, %c0_i32, %c0_i32_0 : i32, i32, i32
  }
}

</mosaic_0001>

<bundles_post_ra>
// kernel: tpu_custom_call.1
= control target key start
LH: loop header
LB: loop body
LE: loop exit
PB: predicated region body
PF: predicated region fallthrough
CT: control target
= control target key end

     0   :  { %8 = vsyncpa [#allocation3], 0  ;;  %s5335_s0 = inlined_call_operand.hbm [shape: f32[2,32,256], index: 0, kind: input, shape index: {}]   ;;  %s5336_s1 = inlined_call_operand.hbm [shape: bf16[3,32,96], index: 1, kind: input, shape index: {}]   ;;  %s5337_s2 = inlined_call_operand.hbm [shape: bf16[3,32,96], index: 2, kind: input, shape index: {}]   ;;  %s5338_s3 = inlined_call_operand.hbm [shape: f32[2,32,256], index: 3, kind: output, shape index: {}]  }
   0x1   :  { %9 = vsyncpa [#allocation6], 0 }
   0x2   :  { %10 = vsyncpa [#allocation4], 0  ;;  %s3810_s12 = smov [#allocation5]   ;;  %s3716_s16 = scalar_lea.hbm %s5336_s1, 768 }
   0x3   :  { %s28_s13 = sshll.u32 %s3810_s12, 4  ;;  %p3717_p0 = scmp.ne.s32.totalorder %s5336_s1, %s3716_s16  ;;  %s29_s13 = int_to_ptr.vmem [resolvable:$true] %s28_s13 }
   0x4   :  { %p3720_p1 = scmp.lt.u32.totalorder %s3716_s16, %s5336_s1 }
   0x6   :  { %p3722_p2 = pnand %p3720_p1, %p3717_p0 }
   0x8   :  { %3725 = shalt.err (!%p3722_p2)
}
   0x9   :  { %s3726_s21 = scalar_lea.vmem %s29_s13, 768  ;;  %p3731_p4 = scmp.lt.s32.totalorder %s29_s13, %s29_s13 }
   0xa   :  { %p3727_p3 = scmp.ne.s32.totalorder %s29_s13, %s3726_s21  ;;  %p3732_p5 = scmp.lt.s32.totalorder %s3726_s21, %s3726_s21 }
   0xc   :  { %p3733_p6 = por %p3732_p5, %p3731_p4 }
   0xe   :  { %p3734_p7 = pnand %p3733_p6, %p3727_p3 }
  0x10   :  { %3737 = shalt.err (!%p3734_p7)
}
  0x11   :  { %s3811_s22 = smov 64   ;;  %s3812_s23 = smov 4  }
  0x12   :  { %34 = dma.hbm_to_vmem [thread:$0]  %s5336_s1, 768, %s29_s13, [#allocation6], %s3811_s22, %s3811_s22, %s3812_s23  }
  0x13   :  { %s3813_s26 = smov [#allocation2]   ;;  %s3738_s30 = scalar_lea.hbm %s5335_s0, 2048 }
  0x14   :  { %s16_s27 = sshll.u32 %s3813_s26, 4  ;;  %p3739_p8 = scmp.ne.s32.totalorder %s5335_s0, %s3738_s30  ;;  %s17_s27 = int_to_ptr.vmem [resolvable:$true] %s16_s27 }
  0x15   :  { %p3742_p9 = scmp.lt.u32.totalorder %s3738_s30, %s5335_s0 }
  0x17   :  { %p3744_p10 = pnand %p3742_p9, %p3739_p8 }
  0x19   :  { %3747 = shalt.err (!%p3744_p10)
}
  0x1a   :  { %s3748_s8 = scalar_lea.vmem %s17_s27, 2048  ;;  %p3753_p12 = scmp.lt.s32.totalorder %s17_s27, %s17_s27 }
  0x1b   :  { %p3749_p11 = scmp.ne.s32.totalorder %s17_s27, %s3748_s8  ;;  %p3754_p13 = scmp.lt.s32.totalorder %s3748_s8, %s3748_s8 }
  0x1d   :  { %p3755_p0 = por %p3754_p13, %p3753_p12 }
  0x1f   :  { %p3756_p1 = pnand %p3755_p0, %p3749_p11 }
  0x21   :  { %3759 = shalt.err (!%p3756_p1)
}
  0x22   :  { %s3814_s1 = smov 256   ;;  %s3815_s9 = smov 16  }
  0x23   :  { %22 = dma.hbm_to_vmem [thread:$0]  %s5335_s0, 2048, %s17_s27, [#allocation3], %s3814_s1, %s3814_s1, %s3815_s9  }
  0x24   :  { %s3816_s12 = smov [#allocation7]   ;;  %s3760_s16 = scalar_lea.hbm %s5337_s2, 768 }
  0x25   :  { %s40_s13 = sshll.u32 %s3816_s12, 4  ;;  %p3761_p2 = scmp.ne.s32.totalorder %s5337_s2, %s3760_s16  ;;  %s41_s13 = int_to_ptr.vmem [resolvable:$true] %s40_s13 }
  0x26   :  { %p3764_p3 = scmp.lt.u32.totalorder %s3760_s16, %s5337_s2 }
  0x28   :  { %p3766_p4 = pnand %p3764_p3, %p3761_p2 }
  0x2a   :  { %3769 = shalt.err (!%p3766_p4)
}
  0x2b   :  { %s3770_s21 = scalar_lea.vmem %s41_s13, 768  ;;  %p3775_p6 = scmp.lt.s32.totalorder %s41_s13, %s41_s13 }
  0x2c   :  { %p3771_p5 = scmp.ne.s32.totalorder %s41_s13, %s3770_s21  ;;  %p3776_p7 = scmp.lt.s32.totalorder %s3770_s21, %s3770_s21 }
  0x2e   :  { %p3777_p8 = por %p3776_p7, %p3775_p6 }
  0x30   :  { %p3778_p9 = pnand %p3777_p8, %p3771_p5 }
  0x32   :  { %3781 = shalt.err (!%p3778_p9)
}
  0x33   :  { %46 = dma.hbm_to_vmem [thread:$0]  %s5337_s2, 768, %s41_s13, [#allocation6], %s3811_s22, %s3811_s22, %s3812_s23  }
  0x34   :  { %3804 = dma.done.wait [#allocation3], 2048  }
  0x35   :  { %3805 = vsyncadd [#allocation3], 4294965248 }
  0x36   :  { %3806 = dma.done.wait [#allocation6], 1536  }
  0x37   :  { %3807 = vsyncadd [#allocation6], 4294965760  ;;  %v3891_v0 = vld [vmem:[#allocation2 + $0x20] sm:$0xff]  ;;  %v3893_v1 = vld [vmem:[#allocation2 + $0x30] sm:$0xff]  ;;  %s3817_s2 = smov 1   ;;  %s3818_s22 = smov 127   ;;  %v57_v25 = vlaneseq }
  0x38   :  { %v3895_v2 = vld [vmem:[#allocation2] sm:$0xff]  ;;  %v3014_v3 = vpack.i.bf16 %v3893_v1, %v3891_v0  ;;  %v3899_v4 = vld [vmem:[#allocation2 + $0x10] sm:$0xff]  ;;  %v3901_v5 = vld [vmem:[#allocation2 + $0x28] sm:$0xff]  ;;  %s3819_s23 = smov 17   ;;  %v3820_v12 = vmov 0   ;;  %s3821_s25 = smov 15  }
  0x39   :  { %v3903_v6 = vld [vmem:[#allocation2 + $0x38] sm:$0xff]  ;;  %v3004_v7 = vpack.i.bf16 %v3899_v4, %v3895_v2  ;;  %v3907_v8 = vld [vmem:[#allocation2 + $0x8] sm:$0xff]  ;;  %349 = vmatprep.mubr.bf16.mxu0 %v3820_v12  ;;  %962 = vmatprep.mubr.bf16.mxu1 %v3820_v12  ;;  %s3822_s26 = smov 113   ;;  %s3823_s27 = smov 112   ;;  %v3951_v15 = vld [vmem:[#allocation2 + $0x40] sm:$0xff]  ;;  %v4002_v26 = vand.u32 127, %v57_v25 }
  0x3a   :  { %v3909_v9 = vld [vmem:[#allocation2 + $0x18] sm:$0xff]  ;;  %3015 = vrot.lane.b32.xlu1 %v3014_v3, %s3817_s2  ;;  %v3019_v10 = vpack.i.bf16 %v3903_v6, %v3901_v5  ;;  %s3824_s28 = smov 111   ;;  %v3947_v13 = vld [vmem:[#allocation2 + $0x48] sm:$0xff]  ;;  %v3953_v16 = vld [vmem:[#allocation2 + $0x50] sm:$0xff]  ;;  %vm310_vm14 = vcmask 785408   ;;  %s3825_s29 = smov [#allocation8]  }
  0x3b   :  { %3005 = vrot.lane.b32.xlu0 %v3004_v7, %s3817_s2  ;;  %v3009_v11 = vpack.i.bf16 %v3909_v9, %v3907_v8  ;;  %v3949_v14 = vld [vmem:[#allocation2 + $0x58] sm:$0xff]  ;;  %v3164_v18 = vpack.i.bf16 %v3953_v16, %v3951_v15  ;;  %v3961_v19 = vld [vmem:[#allocation2 + $0x68] sm:$0xff]  ;;  %v3965_v21 = vld [vmem:[#allocation2 + $0x60] sm:$0xff]  ;;  %v4008_v27 = vadd.s32 128, %v4002_v26  ;;  %v60_v31 = vand.u32 15, %v4002_v26  ;;  %s2527_s30 = sshll.u32 %s3825_s29, 4  ;;  %s2528_s30 = int_to_ptr.vmem [resolvable:$true] %s2527_s30 }
  0x3c   :  { %v3169_v17 = vpack.i.bf16 %v3949_v14, %v3947_v13  ;;  %v3963_v20 = vld [vmem:[#allocation2 + $0x78] sm:$0xff]  ;;  %v3967_v22 = vld [vmem:[#allocation2 + $0x70] sm:$0xff]  ;;  %vm5342_vm0 = vcmp.lt.s32.totalorder %v4002_v26, 1  ;;  %v293_v59 = vpack.c.bf16 %v3909_v9, %v3907_v8  ;;  %vm5341_vm5 = vcmp.lt.s32.totalorder %v4002_v26, 127  ;;  %s3782_s4 = scalar_lea.vmem %s2528_s30, 2048  ;;  %p3787_p11 = scmp.lt.s32.totalorder %s2528_s30, %s2528_s30 }
  0x3d   :  { %v3179_v23 = vpack.i.bf16 %v3963_v20, %v3961_v19  ;;  %v3975_v24 = vpack.i.bf16 %v3967_v22, %v3965_v21  ;;  %v61_v29 = vand.u32 15, %v4008_v27  ;;  %vm4024_vm2 = vcmp.ge.s32.totalorder %v60_v31, 1  ;;  %p3783_p10 = scmp.ne.s32.totalorder %s2528_s30, %s3782_s4  ;;  %p3788_p12 = scmp.lt.s32.totalorder %s3782_s4, %s3782_s4 }
  0x3e   :  { %3020 = vrot.lane.b32.xlu1 %v3019_v10, %s3817_s2  ;;  %vm4052_vm4 = vmpackc.low %vm4024_vm2, %vm4024_vm2  ;;  %vm5340_vm7 = vcmp.lt.s32.totalorder %v4002_v26, 17  ;;  %vm4106_vm9 = vcmp.le.s32.totalorder %v60_v31, 14  ;;  %vm62_vm11 = vcmp.ge.s32.totalorder %v4002_v26, 16  ;;  %vm5339_vm12 = vcmp.lt.s32.totalorder %v4002_v26, 16 }
  0x3f   :  { %3010 = vrot.lane.b32.xlu0 %v3009_v11, %s3817_s2  ;;  %vm4018_vm1 = vcmp.ge.s32.totalorder %v61_v29, 1  ;;  %vm4082_vm6 = vcmp.le.s32.totalorder %v61_v29, 14  ;;  %vm4119_vm10 = vmpackc.low %vm4106_vm9, %vm4106_vm9  ;;  %p3789_p13 = por %p3788_p12, %p3787_p11 }
  0x40   :  { %vm4041_vm3 = vmpackc.low %vm4018_vm1, %vm4018_vm1 }
  0x41   :  { %vm4100_vm8 = vmpackc.low %vm4082_vm6, %vm4082_vm6  ;;  %p3790_p0 = pnand %p3789_p13, %p3783_p10 }
  0x42   :  { %3030 = vrot.lane.b32.xlu1 %v3009_v11, %s3818_s22  ;;  %vm103_vm13 = vmand %vm62_vm11, %vm4024_vm2  ;;  %vm5346_vm2 = vcmp.lt.s32.totalorder %v4002_v26, 15 }
  0x43   :  { %3025 = vrot.lane.b32.xlu0 %v3004_v7, %s3818_s22  ;;  %vm4153_vm15 = vmpackc.low %vm103_vm13, %vm103_vm13 }
  0x44   :  { %vm4185_vm13 = vmpackc.low %vm62_vm11, %vm62_vm11 }
  0x46   :  { %3040 = vrot.lane.b32.xlu1 %v3019_v10, %s3818_s22 }
  0x47   :  { %3035 = vrot.lane.b32.xlu0 %v3014_v3, %s3818_s22 }
  0x4a   :  { %3050 = vrot.lane.b32.xlu1 %v3009_v11, %s3819_s23 }
  0x4b   :  { %3045 = vrot.lane.b32.xlu0 %v3004_v7, %s3819_s23 }
  0x4e   :  { %3060 = vrot.lane.b32.xlu1 %v3019_v10, %s3819_s23 }
  0x4f   :  { %3055 = vrot.lane.b32.xlu0 %v3014_v3, %s3819_s23 }
  0x52   :  { %3070 = vrot.lane.b32.xlu1 %v3009_v11, %s3815_s9 }
  0x53   :  { %3065 = vrot.lane.b32.xlu0 %v3004_v7, %s3815_s9 }
  0x56   :  { %3080 = vrot.lane.b32.xlu1 %v3019_v10, %s3815_s9 }
  0x57   :  { %3075 = vrot.lane.b32.xlu0 %v3014_v3, %s3815_s9 }
  0x5a   :  { %3090 = vrot.lane.b32.xlu1 %v3009_v11, %s3821_s25 }
  0x5b   :  { %3085 = vrot.lane.b32.xlu0 %v3004_v7, %s3821_s25 }
  0x5e   :  { %3100 = vrot.lane.b32.xlu1 %v3019_v10, %s3821_s25 }
  0x5f   :  { %3095 = vrot.lane.b32.xlu0 %v3014_v3, %s3821_s25 }
  0x62   :  { %3110 = vrot.lane.b32.xlu1 %v3009_v11, %s3822_s26 }
  0x63   :  { %3105 = vrot.lane.b32.xlu0 %v3004_v7, %s3822_s26 }
  0x66   :  { %3120 = vrot.lane.b32.xlu1 %v3019_v10, %s3822_s26 }
  0x67   :  { %3115 = vrot.lane.b32.xlu0 %v3014_v3, %s3822_s26 }
  0x6a   :  { %3130 = vrot.lane.b32.xlu1 %v3009_v11, %s3823_s27 }
  0x6b   :  { %3125 = vrot.lane.b32.xlu0 %v3004_v7, %s3823_s27 }
  0x6e   :  { %3140 = vrot.lane.b32.xlu1 %v3019_v10, %s3823_s27 }
  0x6f   :  { %3135 = vrot.lane.b32.xlu0 %v3014_v3, %s3823_s27 }
  0x72   :  { %3150 = vrot.lane.b32.xlu1 %v3009_v11, %s3824_s28  ;;  %v292_v11 = vpack.c.bf16 %v3899_v4, %v3895_v2 }
  0x73   :  { %3145 = vrot.lane.b32.xlu0 %v3004_v7, %s3824_s28 }
  0x76   :  { %3160 = vrot.lane.b32.xlu1 %v3019_v10, %s3824_s28 }
  0x77   :  { %3155 = vrot.lane.b32.xlu0 %v3014_v3, %s3824_s28 }
  0x7a   :  { %3170 = vrot.lane.b32.xlu1 %v3169_v17, %s3817_s2 }
  0x7b   :  { %3165 = vrot.lane.b32.xlu0 %v3164_v18, %s3817_s2 }
  0x7e   :  { %3180 = vrot.lane.b32.xlu1 %v3179_v23, %s3817_s2 }
  0x7f   :  { %3175 = vrot.lane.b32.xlu0 %v3975_v24, %s3817_s2 }
  0x82   :  { %3190 = vrot.lane.b32.xlu1 %v3169_v17, %s3818_s22 }
  0x83   :  { %3185 = vrot.lane.b32.xlu0 %v3164_v18, %s3818_s22 }
  0x86   :  { %3200 = vrot.lane.b32.xlu1 %v3179_v23, %s3818_s22 }
  0x87   :  { %3195 = vrot.lane.b32.xlu0 %v3975_v24, %s3818_s22 }
  0x8a   :  { %3210 = vrot.lane.b32.xlu1 %v3169_v17, %s3819_s23 }
  0x8b   :  { %3205 = vrot.lane.b32.xlu0 %v3164_v18, %s3819_s23 }
  0x8e   :  { %3220 = vrot.lane.b32.xlu1 %v3179_v23, %s3819_s23 }
  0x8f   :  { %3215 = vrot.lane.b32.xlu0 %v3975_v24, %s3819_s23 }
  0x92   :  { %3230 = vrot.lane.b32.xlu1 %v3169_v17, %s3815_s9 }
  0x93   :  { %3225 = vrot.lane.b32.xlu0 %v3164_v18, %s3815_s9 }
  0x96   :  { %3240 = vrot.lane.b32.xlu1 %v3179_v23, %s3815_s9 }
  0x97   :  { %3235 = vrot.lane.b32.xlu0 %v3975_v24, %s3815_s9 }
  0x9a   :  { %3250 = vrot.lane.b32.xlu1 %v3169_v17, %s3821_s25 }
  0x9b   :  { %3245 = vrot.lane.b32.xlu0 %v3164_v18, %s3821_s25 }
  0x9e   :  { %3260 = vrot.lane.b32.xlu1 %v3179_v23, %s3821_s25 }
  0x9f   :  { %3255 = vrot.lane.b32.xlu0 %v3975_v24, %s3821_s25 }
  0xa2   :  { %3270 = vrot.lane.b32.xlu1 %v3169_v17, %s3822_s26 }
  0xa3   :  { %3265 = vrot.lane.b32.xlu0 %v3164_v18, %s3822_s26 }
  0xa6   :  { %3280 = vrot.lane.b32.xlu1 %v3179_v23, %s3822_s26 }
  0xa7   :  { %3275 = vrot.lane.b32.xlu0 %v3975_v24, %s3822_s26 }
  0xaa   :  { %3290 = vrot.lane.b32.xlu1 %v3169_v17, %s3823_s27 }
  0xab   :  { %3285 = vrot.lane.b32.xlu0 %v3164_v18, %s3823_s27 }
  0xac   :  { %v3016_v28 = vpop.permute.xlu1 %3015 }
  0xad   :  { %v3006_v30 = vpop.permute.xlu0 %3005  ;;  %v3018_v32 = vunpack.i.h.bf16 %v3016_v28  ;;  %v3017_v33 = vunpack.i.l.bf16 %v3016_v28 }
  0xae   :  { %3300 = vrot.lane.b32.xlu1 %v3179_v23, %s3823_s27  ;;  %v3008_v40 = vunpack.i.h.bf16 %v3006_v30  ;;  %v3007_v41 = vunpack.i.l.bf16 %v3006_v30 }
  0xaf   :  { %3295 = vrot.lane.b32.xlu0 %v3975_v24, %s3823_s27 }
  0xb0   :  { %v3021_v34 = vpop.permute.xlu1 %3020 }
  0xb1   :  { %v3023_v36 = vunpack.i.h.bf16 %v3021_v34  ;;  %v3022_v37 = vunpack.i.l.bf16 %v3021_v34  ;;  %v3011_v38 = vpop.permute.xlu0 %3010 }
  0xb2   :  { %v3013_v42 = vunpack.i.h.bf16 %v3011_v38  ;;  %v3012_v43 = vunpack.i.l.bf16 %v3011_v38  ;;  %3310 = vrot.lane.b32.xlu1 %v3169_v17, %s3824_s28 }
  0xb3   :  { %v228_v44 = vsel %vm5342_vm0, %v3017_v33, %v3022_v37  ;;  %v229_v45 = vsel %vm5342_vm0, %v3018_v32, %v3023_v36  ;;  %3305 = vrot.lane.b32.xlu0 %v3164_v18, %s3824_s28  ;;  %v232_v56 = vsel %vm5342_vm0, %v3022_v37, %v3017_v33  ;;  %v233_v57 = vsel %vm5342_vm0, %v3023_v36, %v3018_v32 }
  0xb4   :  { %v226_v46 = vsel %vm5342_vm0, %v3007_v41, %v3012_v43  ;;  %v227_v47 = vsel %vm5342_vm0, %v3008_v40, %v3013_v42  ;;  %v230_v49 = vsel %vm5342_vm0, %v3012_v43, %v3007_v41  ;;  %v231_v50 = vsel %vm5342_vm0, %v3013_v42, %v3008_v40  ;;  %v3031_v51 = vpop.permute.xlu1 %3030 }
  0xb5   :  { %v2543_v52 = vpack.c.bf16 %v227_v47, %v226_v46  ;;  %v2546_v54 = vpack.c.bf16 %v231_v50, %v230_v49  ;;  %v3026_v55 = vpop.permute.xlu0 %3025  ;;  %v2549_v58 = vpack.c.bf16 %v229_v45, %v228_v44  ;;  %v3033_v61 = vunpack.i.h.bf16 %v3031_v51 }
  0xb6   :  { %3320 = vrot.lane.b32.xlu1 %v3179_v23, %s3824_s28  ;;  %v3032_v62 = vunpack.i.l.bf16 %v3031_v51  ;;  %v3028_v63 = vunpack.i.h.bf16 %v3026_v55  ;;  %v3027_v3 = vunpack.i.l.bf16 %v3026_v55  ;;  %v2552_v10 = vpack.c.bf16 %v233_v57, %v232_v56 }
  0xb7   :  { %2544 = vmatprep.subr.msk.bf16.mxu0 %vm4041_vm3, %v2543_v52  ;;  %3315 = vrot.lane.b32.xlu0 %v3975_v24, %s3824_s28  ;;  %v295_v18 = vpack.c.bf16 %v3903_v6, %v3901_v5  ;;  %v294_v33 = vpack.c.bf16 %v3893_v1, %v3891_v0 }
  0xb8   :  { %2547 = vmatpush1.bf16.msk.msra.mxu0 %vm4052_vm4, %v2546_v54  ;;  %v3041_v60 = vpop.permute.xlu1 %3040  ;;  %v268_v8 = vsel %vm5341_vm5, %v3033_v61, %v3028_v63  ;;  %v267_v9 = vsel %vm5341_vm5, %v3032_v62, %v3027_v3  ;;  %v264_v2 = vsel %vm5341_vm5, %v3028_v63, %v3033_v61  ;;  %v263_v4 = vsel %vm5341_vm5, %v3027_v3, %v3032_v62 }
  0xb9   :  { %2550 = vmatprep.subr.msk.bf16.mxu0 %vm4041_vm3, %v2549_v58  ;;  %v3036_v7 = vpop.permute.xlu0 %3035  ;;  %v3043_v24 = vunpack.i.h.bf16 %v3041_v60  ;;  %v3042_v25 = vunpack.i.l.bf16 %v3041_v60  ;;  %v2555_v5 = vpack.c.bf16 %v268_v8, %v267_v9  ;;  %v2558_v43 = vpack.c.bf16 %v264_v2, %v263_v4 }
  0xba   :  { %v3038_v28 = vunpack.i.h.bf16 %v3036_v7  ;;  %v3037_v30 = vunpack.i.l.bf16 %v3036_v7 }
  0xbc   :  { %2553 = vmatpush1.bf16.msk.msra.mxu0 %vm4052_vm4, %v2552_v10  ;;  %v3051_v17 = vpop.permute.xlu1 %3050  ;;  %v270_v40 = vsel %vm5341_vm5, %v3043_v24, %v3038_v28  ;;  %v269_v41 = vsel %vm5341_vm5, %v3042_v25, %v3037_v30  ;;  %v266_v42 = vsel %vm5341_vm5, %v3038_v28, %v3043_v24  ;;  %v265_v45 = vsel %vm5341_vm5, %v3037_v30, %v3042_v25 }
  0xbd   :  { %321 = vmatprep.subr.bf16.mxu0 %v293_v59  ;;  %v3046_v23 = vpop.permute.xlu0 %3045  ;;  %v3053_v34 = vunpack.i.h.bf16 %v3051_v17  ;;  %v3052_v36 = vunpack.i.l.bf16 %v3051_v17  ;;  %v2561_v49 = vpack.c.bf16 %v270_v40, %v269_v41  ;;  %v2564_v58 = vpack.c.bf16 %v266_v42, %v265_v45  ;;  %v3644_v17 = vld [vmem:[#allocation5 + $0x10] sm:$0xff]  }
  0xbe   :  { %v3048_v37 = vunpack.i.h.bf16 %v3046_v23  ;;  %v3047_v29 = vunpack.i.l.bf16 %v3046_v23  ;;  %vm65_vm5 = vcmp.lt.s32.totalorder %v4008_v27, 240 }
  0xc0   :  { %322 = vmatpush1.bf16.msra.mxu0 %v292_v11  ;;  %v3061_v6 = vpop.permute.xlu1 %3060  ;;  %v96_v46 = vsel %vm5340_vm7, %v3048_v37, %v3053_v34  ;;  %v95_v47 = vsel %vm5340_vm7, %v3047_v29, %v3052_v36  ;;  %v100_v56 = vsel %vm5340_vm7, %v3053_v34, %v3048_v37  ;;  %v99_v57 = vsel %vm5340_vm7, %v3052_v36, %v3047_v29 }
  0xc1   :  { %323 = vmatprep.subr.bf16.mxu0 %v295_v18  ;;  %v3056_v38 = vpop.permute.xlu0 %3055  ;;  %v3063_v51 = vunpack.i.h.bf16 %v3061_v6  ;;  %v3062_v52 = vunpack.i.l.bf16 %v3061_v6  ;;  %v2571_v59 = vpack.c.bf16 %v96_v46, %v95_v47  ;;  %v2574_v8 = vpack.c.bf16 %v100_v56, %v99_v57  ;;  %v3645_v46 = vld [vmem:[#allocation5 + $0x18] sm:$0xff]  }
  0xc2   :  { %v3058_v54 = vunpack.i.h.bf16 %v3056_v38  ;;  %v3057_v55 = vunpack.i.l.bf16 %v3056_v38 }
  0xc4   :  { %324 = vmatpush1.bf16.msra.mxu0 %v294_v33  ;;  %v3071_v44 = vpop.permute.xlu1 %3070  ;;  %v98_v10 = vsel %vm5340_vm7, %v3058_v54, %v3063_v51  ;;  %v97_v11 = vsel %vm5340_vm7, %v3057_v55, %v3062_v52  ;;  %v102_v9 = vsel %vm5340_vm7, %v3063_v51, %v3058_v54  ;;  %v101_v23 = vsel %vm5340_vm7, %v3062_v52, %v3057_v55  ;;  %vm179_vm7 = vmand %vm62_vm11, %vm4106_vm9 }
  0xc5   :  { %2556 = vmatprep.subr.msk.bf16.mxu0 %vm4100_vm8, %v2555_v5  ;;  %v3066_v50 = vpop.permute.xlu0 %3065  ;;  %v3073_v61 = vunpack.i.h.bf16 %v3071_v44  ;;  %v3072_v62 = vunpack.i.l.bf16 %v3071_v44  ;;  %v2577_v24 = vpack.c.bf16 %v98_v10, %v97_v11  ;;  %v2580_v6 = vpack.c.bf16 %v102_v9, %v101_v23  ;;  %vm4219_vm0 = vmpackc.low %vm179_vm7, %vm179_vm7 }
  0xc6   :  { %v3068_v63 = vunpack.i.h.bf16 %v3066_v50  ;;  %v3067_v3 = vunpack.i.l.bf16 %v3066_v50  ;;  %vm4231_vm7 = vmand %vm65_vm5, %vm4018_vm1  ;;  %vm5343_vm1 = vcmp.lt.s32.totalorder %v4002_v26, 112  ;;  %vm5344_vm11 = vcmp.lt.s32.totalorder %v4002_v26, 111 }
  0xc7   :  { %vm4251_vm9 = vmpackc.low %vm4231_vm7, %vm4231_vm7 }
  0xc8   :  { %2559 = vmatpush1.bf16.msk.msra.mxu0 %vm4119_vm10, %v2558_v43  ;;  %v3081_v60 = vpop.permute.xlu1 %3080  ;;  %v134_v25 = vsel %vm5339_vm12, %v3067_v3, %v3072_v62  ;;  %v135_v28 = vsel %vm5339_vm12, %v3068_v63, %v3073_v61  ;;  %v139_v34 = vsel %vm5339_vm12, %v3073_v61, %v3068_v63  ;;  %v138_v36 = vsel %vm5339_vm12, %v3072_v62, %v3067_v3  ;;  %vm4285_vm7 = vmpackc.low %vm65_vm5, %vm65_vm5 }
  0xc9   :  { %2562 = vmatprep.subr.msk.bf16.mxu0 %vm4100_vm8, %v2561_v49  ;;  %v3076_v7 = vpop.permute.xlu0 %3075  ;;  %v3083_v2 = vunpack.i.h.bf16 %v3081_v60  ;;  %v3082_v4 = vunpack.i.l.bf16 %v3081_v60  ;;  %v202_v37 = vpack.c.bf16 %v135_v28, %v134_v25  ;;  %v2583_v47 = vpack.c.bf16 %v139_v34, %v138_v36 }
  0xca   :  { %v3078_v33 = vunpack.i.h.bf16 %v3076_v7  ;;  %v3077_v5 = vunpack.i.l.bf16 %v3076_v7 }
  0xcc   :  { %2565 = vmatpush1.bf16.msk.msra.mxu0 %vm4119_vm10, %v2564_v58  ;;  %v3091_v18 = vpop.permute.xlu1 %3090  ;;  %v136_v44 = vsel %vm5339_vm12, %v3077_v5, %v3082_v4  ;;  %v137_v45 = vsel %vm5339_vm12, %v3078_v33, %v3083_v2  ;;  %v141_v49 = vsel %vm5339_vm12, %v3083_v2, %v3078_v33  ;;  %v140_v51 = vsel %vm5339_vm12, %v3082_v4, %v3077_v5 }
  0xcd   :  { %2572 = vmatprep.subr.msk.bf16.mxu0 %vm4041_vm3, %v2571_v59  ;;  %v3086_v30 = vpop.permute.xlu0 %3085  ;;  %v3093_v38 = vunpack.i.h.bf16 %v3091_v18  ;;  %v3092_v40 = vunpack.i.l.bf16 %v3091_v18  ;;  %v204_v56 = vpack.c.bf16 %v137_v45, %v136_v44  ;;  %v2586_v62 = vpack.c.bf16 %v141_v49, %v140_v51 }
  0xce   :  { %v3088_v41 = vunpack.i.h.bf16 %v3086_v30  ;;  %v3087_v42 = vunpack.i.l.bf16 %v3086_v30  ;;  %vm5345_vm12 = vcmp.lt.s32.totalorder %v4002_v26, 113 }
  0xcf   :  { %2566 = vmatmul.mubr.msk.bf16.vlgmr.msra.gmra.mrb[0].mxu0 %vm310_vm14, %v3644_v17 }
  0xd0   :  { %2575 = vmatpush1.bf16.msk.msra.mxu0 %vm4153_vm15, %v2574_v8  ;;  %v3101_v29 = vpop.permute.xlu1 %3100  ;;  %359 = vmatprep.mubr.bf16.mxu0 %v3820_v12  ;;  %v172_v54 = vsel %vm5346_vm2, %v3088_v41, %v3093_v38  ;;  %v171_v55 = vsel %vm5346_vm2, %v3087_v42, %v3092_v40  ;;  %v176_v63 = vsel %vm5346_vm2, %v3093_v38, %v3088_v41 }
  0xd1   :  { %2578 = vmatprep.subr.msk.bf16.mxu0 %vm4041_vm3, %v2577_v24  ;;  %v3096_v43 = vpop.permute.xlu0 %3095  ;;  %v3103_v58 = vunpack.i.h.bf16 %v3101_v29  ;;  %v3102_v59 = vunpack.i.l.bf16 %v3101_v29  ;;  %v175_v3 = vsel %vm5346_vm2, %v3092_v40, %v3087_v42  ;;  %v2589_v7 = vpack.c.bf16 %v172_v54, %v171_v55  ;;  %v3646_v55 = vld [vmem:[#allocation5] sm:$0xff]  }
  0xd2   :  { %v3098_v60 = vunpack.i.h.bf16 %v3096_v43  ;;  %v3097_v61 = vunpack.i.l.bf16 %v3096_v43  ;;  %v2592_v25 = vpack.c.bf16 %v176_v63, %v175_v3 }
  0xd4   :  { %2581 = vmatpush1.bf16.msk.msra.mxu0 %vm4153_vm15, %v2580_v6  ;;  %v3111_v50 = vpop.permute.xlu1 %3110  ;;  %v174_v23 = vsel %vm5346_vm2, %v3098_v60, %v3103_v58  ;;  %v173_v24 = vsel %vm5346_vm2, %v3097_v61, %v3102_v59  ;;  %v178_v28 = vsel %vm5346_vm2, %v3103_v58, %v3098_v60  ;;  %v177_v2 = vsel %vm5346_vm2, %v3102_v59, %v3097_v61 }
  0xd5   :  { %390 = vmatprep.subr.bf16.mxu0 %v202_v37  ;;  %v3106_v57 = vpop.permute.xlu0 %3105  ;;  %v3113_v11 = vunpack.i.h.bf16 %v3111_v50  ;;  %v3112_v17 = vunpack.i.l.bf16 %v3111_v50  ;;  %v2595_v5 = vpack.c.bf16 %v174_v23, %v173_v24  ;;  %v2598_v40 = vpack.c.bf16 %v178_v28, %v177_v2 }
  0xd6   :  { %v3108_v8 = vunpack.i.h.bf16 %v3106_v57  ;;  %v3107_v9 = vunpack.i.l.bf16 %v3106_v57  ;;  %vm5393_vm2 = vcmp.lt.s32.totalorder %v4002_v26, 17 }
  0xd7   :  { %2567 = vmatmul.mubr.msk.bf16.gmra.mrb[4].mxu0 %vm310_vm14, %v3645_v46 }
  0xd8   :  { %2584 = vmatpush1.bf16.msk.msra.mxu0 %vm4185_vm13, %v2583_v47  ;;  %v3121_v10 = vpop.permute.xlu1 %3120  ;;  %418 = vmatprep.mubr.bf16.mxu0 %v3820_v12  ;;  %v461_v4 = vsel %vm5345_vm12, %v3113_v11, %v3108_v8  ;;  %v460_v33 = vsel %vm5345_vm12, %v3112_v17, %v3107_v9  ;;  %v457_v41 = vsel %vm5345_vm12, %v3108_v8, %v3113_v11 }
  0xd9   :  { %392 = vmatprep.subr.bf16.mxu0 %v204_v56  ;;  %v3116_v18 = vpop.permute.xlu0 %3115  ;;  %v3123_v34 = vunpack.i.h.bf16 %v3121_v10  ;;  %v3122_v36 = vunpack.i.l.bf16 %v3121_v10  ;;  %v456_v42 = vsel %vm5345_vm12, %v3107_v9, %v3112_v17  ;;  %v2605_v43 = vpack.c.bf16 %v461_v4, %v460_v33 }
  0xda   :  { %v3118_v37 = vunpack.i.h.bf16 %v3116_v18  ;;  %v3117_v29 = vunpack.i.l.bf16 %v3116_v18  ;;  %v2608_v56 = vpack.c.bf16 %v457_v41, %v456_v42 }
  0xdc   :  { %2587 = vmatpush1.bf16.msk.msra.mxu0 %vm4185_vm13, %v2586_v62  ;;  %v3131_v30 = vpop.permute.xlu1 %3130  ;;  %v463_v50 = vsel %vm5345_vm12, %v3123_v34, %v3118_v37  ;;  %v462_v51 = vsel %vm5345_vm12, %v3122_v36, %v3117_v29  ;;  %v459_v57 = vsel %vm5345_vm12, %v3118_v37, %v3123_v34  ;;  %v458_v59 = vsel %vm5345_vm12, %v3117_v29, %v3122_v36 }
  0xdd   :  { %2590 = vmatprep.subr.msk.bf16.mxu0 %vm4100_vm8, %v2589_v7  ;;  %v3126_v6 = vpop.permute.xlu0 %3125  ;;  %v3133_v35 = vunpack.i.h.bf16 %v3131_v30  ;;  %v3132_v45 = vunpack.i.l.bf16 %v3131_v30  ;;  %v2611_v62 = vpack.c.bf16 %v463_v50, %v462_v51  ;;  %v2614_v17 = vpack.c.bf16 %v459_v57, %v458_v59 }
  0xde   :  { %v3128_v46 = vunpack.i.h.bf16 %v3126_v6  ;;  %v3127_v47 = vunpack.i.l.bf16 %v3126_v6  ;;  %v3647_v6 = vld [vmem:[#allocation5 + $0x8] sm:$0xff]  }
  0xe0   :  { %2593 = vmatpush1.bf16.msk.msra.mxu0 %vm4219_vm0, %v2592_v25  ;;  %v3141_v44 = vpop.permute.xlu1 %3140  ;;  %v500_v60 = vsel %vm5343_vm1, %v3133_v35, %v3128_v46  ;;  %v499_v61 = vsel %vm5343_vm1, %v3132_v45, %v3127_v47  ;;  %v496_v8 = vsel %vm5343_vm1, %v3128_v46, %v3133_v35  ;;  %v495_v9 = vsel %vm5343_vm1, %v3127_v47, %v3132_v45 }
  0xe1   :  { %2596 = vmatprep.subr.msk.bf16.mxu0 %vm4100_vm8, %v2595_v5  ;;  %v3136_v49 = vpop.permute.xlu0 %3135  ;;  %v3143_v3 = vunpack.i.h.bf16 %v3141_v44  ;;  %v3142_v7 = vunpack.i.l.bf16 %v3141_v44  ;;  %v2617_v18 = vpack.c.bf16 %v500_v60, %v499_v61  ;;  %v563_v36 = vpack.c.bf16 %v496_v8, %v495_v9 }
  0xe2   :  { %v3138_v10 = vunpack.i.h.bf16 %v3136_v49  ;;  %v3137_v11 = vunpack.i.l.bf16 %v3136_v49 }
  0xe4   :  { %2599 = vmatpush1.bf16.msk.msra.mxu0 %vm4219_vm0, %v2598_v40  ;;  %v3151_v58 = vpop.permute.xlu1 %3150  ;;  %v502_v4 = vsel %vm5343_vm1, %v3143_v3, %v3138_v10  ;;  %v501_v33 = vsel %vm5343_vm1, %v3142_v7, %v3137_v11  ;;  %v498_v34 = vsel %vm5343_vm1, %v3138_v10, %v3143_v3  ;;  %v497_v29 = vsel %vm5343_vm1, %v3137_v11, %v3142_v7  ;;  %vm4306_vm1 = vmand %vm65_vm5, %vm4082_vm6 }
  0xe5   :  { %2606 = vmatprep.subr.msk.bf16.mxu0 %vm4251_vm9, %v2605_v43  ;;  %v3146_v63 = vpop.permute.xlu0 %3145  ;;  %v3153_v24 = vunpack.i.h.bf16 %v3151_v58  ;;  %v3152_v25 = vunpack.i.l.bf16 %v3151_v58  ;;  %v2620_v41 = vpack.c.bf16 %v502_v4, %v501_v33  ;;  %v565_v50 = vpack.c.bf16 %v498_v34, %v497_v29  ;;  %vm4324_vm5 = vmpackc.low %vm4306_vm1, %vm4306_vm1 }
  0xe6   :  { %v3148_v28 = vunpack.i.h.bf16 %v3146_v63  ;;  %v3147_v30 = vunpack.i.l.bf16 %v3146_v63  ;;  %vm5379_vm6 = vcmp.lt.s32.totalorder %v4002_v26, 1 }
  0xe7   :  { %2600 = vmatmul.mubr.msk.bf16.vlgmr.msra.gmra.mrb[0].mxu0 %vm310_vm14, %v3646_v55  ;;  %vm5380_vm1 = vmmov %vm5379_vm6 }
  0xe8   :  { %2609 = vmatpush1.bf16.msk.msra.mxu0 %vm4052_vm4, %v2608_v56  ;;  %v3161_v23 = vpop.permute.xlu1 %3160  ;;  %428 = vmatprep.mubr.bf16.mxu0 %v3820_v12  ;;  %v537_v38 = vsel %vm5344_vm11, %v3153_v24, %v3148_v28  ;;  %v536_v40 = vsel %vm5344_vm11, %v3152_v25, %v3147_v30  ;;  %v533_v47 = vsel %vm5344_vm11, %v3148_v28, %v3153_v24  ;;  %vm5383_vm12 = vmmov %vm5380_vm1 }
  0xe9   :  { %2612 = vmatprep.subr.msk.bf16.mxu0 %vm4251_vm9, %v2611_v62  ;;  %v3156_v2 = vpop.permute.xlu0 %3155  ;;  %v3163_v43 = vunpack.i.h.bf16 %v3161_v23  ;;  %v3162_v44 = vunpack.i.l.bf16 %v3161_v23  ;;  %v532_v49 = vsel %vm5344_vm11, %v3147_v30, %v3152_v25  ;;  %v2623_v51 = vpack.c.bf16 %v537_v38, %v536_v40 }
  0xea   :  { %v3158_v35 = vunpack.i.h.bf16 %v3156_v2  ;;  %v3157_v45 = vunpack.i.l.bf16 %v3156_v2  ;;  %v2626_v62 = vpack.c.bf16 %v533_v47, %v532_v49 }
  0xec   :  { %2615 = vmatpush1.bf16.msk.msra.mxu0 %vm4052_vm4, %v2614_v17  ;;  %v3171_v37 = vpop.permute.xlu1 %3170  ;;  %v539_v59 = vsel %vm5344_vm11, %v3163_v43, %v3158_v35  ;;  %v538_v60 = vsel %vm5344_vm11, %v3162_v44, %v3157_v45  ;;  %v535_v63 = vsel %vm5344_vm11, %v3158_v35, %v3163_v43  ;;  %v534_v7 = vsel %vm5344_vm11, %v3157_v45, %v3162_v44  ;;  %vm5381_vm11 = vmmov %vm5380_vm1 }
  0xed   :  { %2618 = vmatprep.subr.msk.bf16.mxu0 %vm4285_vm7, %v2617_v18  ;;  %v3166_v42 = vpop.permute.xlu0 %3165  ;;  %v3173_v32 = vunpack.i.h.bf16 %v3171_v37  ;;  %v3172_v56 = vunpack.i.l.bf16 %v3171_v37  ;;  %v2629_v17 = vpack.c.bf16 %v539_v59, %v538_v60  ;;  %v2632_v25 = vpack.c.bf16 %v535_v63, %v534_v7 }
  0xee   :  { %v3168_v27 = vunpack.i.h.bf16 %v3166_v42  ;;  %v3167_v57 = vunpack.i.l.bf16 %v3166_v42  ;;  %v1516_v44 = vpack.c.bf16 %v3949_v14, %v3947_v13 }
  0xef   :  { %2601 = vmatmul.mubr.msk.bf16.gmra.mrb[4].mxu0 %vm310_vm14, %v3647_v6 }
  0xf0   :  { %592 = vmatpush1.bf16.msra.mxu0 %v563_v36  ;;  %v3181_v55 = vpop.permute.xlu1 %3180  ;;  %619 = vmatprep.mubr.bf16.mxu0 %v3820_v12  ;;  %v1460_v10 = vsel %vm5379_vm6, %v3168_v27, %v3173_v32  ;;  %v1459_v11 = vsel %vm5380_vm1, %v3167_v57, %v3172_v56  ;;  %v1464_v30 = vsel %vm5381_vm11, %v3173_v32, %v3168_v27  ;;  %vm5382_vm6 = vmmov %vm5380_vm1  ;;  %v3648_v36 = vld [vmem:[#allocation5 + $0x20] sm:$0xff]  }
  0xf1   :  { %2621 = vmatprep.subr.msk.bf16.mxu0 %vm4285_vm7, %v2620_v41  ;;  %v3176_v58 = vpop.permute.xlu0 %3175  ;;  %v3183_v9 = vunpack.i.h.bf16 %v3181_v55  ;;  %v3182_v18 = vunpack.i.l.bf16 %v3181_v55  ;;  %v1463_v2 = vsel %vm5382_vm6, %v3172_v56, %v3167_v57  ;;  %v2735_v4 = vpack.c.bf16 %v1460_v10, %v1459_v11  ;;  %vm5384_vm11 = vmmov %vm5380_vm1 }
  0xf2   :  { %v3178_v23 = vunpack.i.h.bf16 %v3176_v58  ;;  %v3177_v24 = vunpack.i.l.bf16 %v3176_v58  ;;  %v2738_v37 = vpack.c.bf16 %v1464_v30, %v1463_v2  ;;  %vm5385_vm6 = vmmov %vm5380_vm1  ;;  %v1515_v55 = vpack.c.bf16 %v3953_v16, %v3951_v15 }
  0xf3   :  { %v1518_v56 = vpack.c.bf16 %v3963_v20, %v3961_v19  ;;  %v1517_v16 = vpack.c.bf16 %v3967_v22, %v3965_v21 }
  0xf4   :  { %594 = vmatpush1.bf16.msra.mxu0 %v565_v50  ;;  %v3191_v3 = vpop.permute.xlu1 %3190  ;;  %v1462_v6 = vsel %vm5380_vm1, %v3178_v23, %v3183_v9  ;;  %v1461_v34 = vsel %vm5383_vm12, %v3177_v24, %v3182_v18  ;;  %v1466_v38 = vsel %vm5384_vm11, %v3183_v9, %v3178_v23  ;;  %v1465_v40 = vsel %vm5385_vm6, %v3182_v18, %v3177_v24 }
  0xf5   :  { %2624 = vmatprep.subr.msk.bf16.mxu0 %vm4324_vm5, %v2623_v51  ;;  %v3186_v8 = vpop.permute.xlu0 %3185  ;;  %v2741_v41 = vpack.c.bf16 %v1462_v6, %v1461_v34  ;;  %v2744_v43 = vpack.c.bf16 %v1466_v38, %v1465_v40  ;;  %v3193_v45 = vunpack.i.h.bf16 %v3191_v3  ;;  %v3192_v46 = vunpack.i.l.bf16 %v3191_v3  ;;  %v3649_v51 = vld [vmem:[#allocation5 + $0x28] sm:$0xff]  }
  0xf6   :  { %v3188_v47 = vunpack.i.h.bf16 %v3186_v8  ;;  %v3187_v49 = vunpack.i.l.bf16 %v3186_v8  ;;  %vm5386_vm12 = vcmp.lt.s32.totalorder %v4002_v26, 127 }
  0xf7   :  { %vm5387_vm1 = vmmov %vm5386_vm12 }
  0xf8   :  { %2627 = vmatpush1.bf16.msk.msra.mxu0 %vm4119_vm10, %v2626_v62  ;;  %v4340_v28 = vpop.permute.xlu1 %3200  ;;  %v1496_v13 = vsel %vm5386_vm12, %v3193_v45, %v3188_v47  ;;  %v1495_v14 = vsel %vm5387_vm1, %v3192_v46, %v3187_v49  ;;  %vm5388_vm11 = vmmov %vm5387_vm1 }
  0xf9   :  { %2630 = vmatprep.subr.msk.bf16.mxu0 %vm4324_vm5, %v2629_v17  ;;  %v3196_v33 = vpop.permute.xlu0 %3195  ;;  %v3203_v57 = vunpack.i.h.bf16 %v4340_v28  ;;  %v3202_v58 = vunpack.i.l.bf16 %v4340_v28  ;;  %v1492_v60 = vsel %vm5388_vm11, %v3188_v47, %v3193_v45  ;;  %vm5389_vm6 = vmmov %vm5387_vm1  ;;  %v2747_v20 = vpack.c.bf16 %v1496_v13, %v1495_v14  ;;  %v3650_v45 = vld [vmem:[#allocation5 + $0x10] sm:$0xff]  }
  0xfa   :  { %v3198_v59 = vunpack.i.h.bf16 %v3196_v33  ;;  %v3197_v15 = vunpack.i.l.bf16 %v3196_v33  ;;  %v1491_v19 = vsel %vm5389_vm6, %v3187_v49, %v3192_v46  ;;  %vm5390_vm12 = vmmov %vm5387_vm1 }
  0xfb   :  { %v2750_v17 = vpack.c.bf16 %v1492_v60, %v1491_v19  ;;  %vm5391_vm11 = vmmov %vm5387_vm1 }
  0xfc   :  { %2633 = vmatpush1.bf16.msk.msra.mxu0 %vm4119_vm10, %v2632_v25  ;;  %v4354_v29 = vpop.permute.xlu1 %3210  ;;  %v1498_v22 = vsel %vm5390_vm12, %v3203_v57, %v3198_v59  ;;  %v1497_v11 = vsel %vm5387_vm1, %v3202_v58, %v3197_v15  ;;  %v1494_v8 = vsel %vm5391_vm11, %v3198_v59, %v3203_v57  ;;  %vm5392_vm6 = vmmov %vm5387_vm1 }
  0xfd   :  { %2736 = vmatprep.subr.msk.bf16.mxu0 %vm4041_vm3, %v2735_v4  ;;  %v3206_v42 = vpop.permute.xlu0 %3205  ;;  %v3213_v63 = vunpack.i.h.bf16 %v4354_v29  ;;  %v3212_v3 = vunpack.i.l.bf16 %v4354_v29  ;;  %v1493_v18 = vsel %vm5392_vm6, %v3197_v15, %v3202_v58  ;;  %vm5394_vm12 = vmmov %vm5393_vm2  ;;  %v2753_v25 = vpack.c.bf16 %v1498_v22, %v1497_v11 }
  0xfe   :  { %v3208_v7 = vunpack.i.h.bf16 %v3206_v42  ;;  %v3207_v10 = vunpack.i.l.bf16 %v3206_v42  ;;  %v2756_v6 = vpack.c.bf16 %v1494_v8, %v1493_v18  ;;  %vm5395_vm1 = vmmov %vm5393_vm2 }
  0xff   :  { %2634 = vmatmul.mubr.msk.bf16.vlgmr.msra.gmra.mrb[0].mxu0 %vm310_vm14, %v3648_v36  ;;  %vm5396_vm11 = vmmov %vm5395_vm1 }
 0x100   :  { %2739 = vmatpush1.bf16.msk.msra.mxu0 %vm4052_vm4, %v2738_v37  ;;  %629 = vmatprep.mubr.bf16.mxu0 %v3820_v12  ;;  %v4368_v35 = vpop.permute.xlu1 %3220  ;;  %v1348_v23 = vsel %vm5393_vm2, %v3208_v7, %v3213_v63  ;;  %v1347_v24 = vsel %vm5394_vm12, %v3207_v10, %v3212_v3  ;;  %v1352_v34 = vsel %vm5393_vm2, %v3213_v63, %v3208_v7  ;;  %vm5397_vm6 = vmmov %vm5395_vm1  ;;  %v3651_v7 = vld [vmem:[#allocation5 + $0x18] sm:$0xff]  }
 0x101   :  { %2742 = vmatprep.subr.msk.bf16.mxu0 %vm4041_vm3, %v2741_v41  ;;  %v4372_v50 = vpop.permute.xlu0 %3215  ;;  %v3223_v30 = vunpack.i.h.bf16 %v4368_v35  ;;  %v3222_v2 = vunpack.i.l.bf16 %v4368_v35  ;;  %v1351_v36 = vsel %vm5395_vm1, %v3212_v3, %v3207_v10  ;;  %v2763_v37 = vpack.c.bf16 %v1348_v23, %v1347_v24  ;;  %vm5398_vm12 = vmmov %vm5395_vm1 }
 0x102   :  { %v3218_v4 = vunpack.i.h.bf16 %v4372_v50  ;;  %v3217_v33 = vunpack.i.l.bf16 %v4372_v50  ;;  %v2766_v46 = vpack.c.bf16 %v1352_v34, %v1351_v36  ;;  %vm5399_vm2 = vmmov %vm5395_vm1  ;;  %vm5400_vm1 = vcmp.lt.s32.totalorder %v4002_v26, 16 }
 0x104   :  { %2745 = vmatpush1.bf16.msk.msra.mxu0 %vm4052_vm4, %v2744_v43  ;;  %v4378_v32 = vpop.permute.xlu1 %3230  ;;  %v1349_v35 = vsel %vm5397_vm6, %v3217_v33, %v3222_v2  ;;  %v1354_v47 = vsel %vm5398_vm12, %v3223_v30, %v3218_v4  ;;  %v1353_v49 = vsel %vm5399_vm2, %v3222_v2, %v3217_v33  ;;  %vm5402_vm6 = vmmov %vm5400_vm1 }
 0x105   :  { %1543 = vmatprep.subr.bf16.mxu0 %v1516_v44  ;;  %v4386_v27 = vpop.permute.xlu0 %3225  ;;  %v3233_v38 = vunpack.i.h.bf16 %v4378_v32  ;;  %v3232_v40 = vunpack.i.l.bf16 %v4378_v32  ;;  %v1350_v44 = vsel %vm5396_vm11, %v3218_v4, %v3223_v30  ;;  %vm5401_vm11 = vmmov %vm5400_vm1  ;;  %v2772_v58 = vpack.c.bf16 %v1354_v47, %v1353_v49 }
 0x106   :  { %v3228_v41 = vunpack.i.h.bf16 %v4386_v27  ;;  %v3227_v42 = vunpack.i.l.bf16 %v4386_v27  ;;  %v2769_v50 = vpack.c.bf16 %v1350_v44, %v1349_v35  ;;  %vm5403_vm12 = vmmov %vm5400_vm1 }
 0x107   :  { %2635 = vmatmul.mubr.msk.bf16.gmra.mrb[4].mxu0 %vm310_vm14, %v3649_v51  ;;  %vm5404_vm2 = vmmov %vm5400_vm1 }
 0x108   :  { %1544 = vmatpush1.bf16.msra.mxu0 %v1515_v55  ;;  %1571 = vmatprep.mubr.bf16.mxu0 %v3820_v12  ;;  %v4398_v62 = vpop.permute.xlu1 %3240  ;;  %v1379_v51 = vsel %vm5400_vm1, %v3227_v42, %v3232_v40  ;;  %v1380_v55 = vsel %vm5401_vm11, %v3228_v41, %v3233_v38  ;;  %v1384_v59 = vsel %vm5402_vm6, %v3233_v38, %v3228_v41  ;;  %vm5405_vm11 = vmmov %vm5400_vm1 }
 0x109   :  { %1545 = vmatprep.subr.bf16.mxu0 %v1518_v56  ;;  %v4402_v21 = vpop.permute.xlu0 %3235  ;;  %v3243_v14 = vunpack.i.h.bf16 %v4398_v62  ;;  %v3242_v56 = vunpack.i.l.bf16 %v4398_v62  ;;  %v1383_v15 = vsel %vm5403_vm12, %v3232_v40, %v3227_v42  ;;  %vm5406_vm6 = vmmov %vm5400_vm1  ;;  %vm5407_vm12 = vcmp.lt.s32.totalorder %v4002_v26, 15 }
 0x10a   :  { %v3238_v27 = vunpack.i.h.bf16 %v4402_v21  ;;  %v3237_v57 = vunpack.i.l.bf16 %v4402_v21  ;;  %v2775_v22 = vpack.c.bf16 %v1384_v59, %v1383_v15 }
 0x10c   :  { %1546 = vmatpush1.bf16.msra.mxu0 %v1517_v16  ;;  %v4410_v9 = vpop.permute.xlu1 %3250  ;;  %v1436_v16 = vpack.c.bf16 %v1380_v55, %v1379_v51  ;;  %v1381_v63 = vsel %vm5404_vm2, %v3237_v57, %v3242_v56  ;;  %v1382_v3 = vsel %vm5400_vm1, %v3238_v27, %v3243_v14  ;;  %v1386_v11 = vsel %vm5405_vm11, %v3243_v14, %v3238_v27  ;;  %vm5408_vm2 = vmmov %vm5407_vm12 }
 0x10d   :  { %2748 = vmatprep.subr.msk.bf16.mxu0 %vm4100_vm8, %v2747_v20  ;;  %v4420_v28 = vpop.permute.xlu0 %3245  ;;  %v3253_v60 = vunpack.i.h.bf16 %v4410_v9  ;;  %v3252_v19 = vunpack.i.l.bf16 %v4410_v9  ;;  %v1438_v18 = vpack.c.bf16 %v1382_v3, %v1381_v63  ;;  %vm5409_vm1 = vmmov %vm5408_vm2 }
 0x10e   :  { %v3248_v20 = vunpack.i.h.bf16 %v4420_v28  ;;  %v3247_v62 = vunpack.i.l.bf16 %v4420_v28  ;;  %vm5410_vm11 = vmmov %vm5409_vm1 }
 0x110   :  { %2751 = vmatpush1.bf16.msk.msra.mxu0 %vm4119_vm10, %v2750_v17  ;;  %v4432_v29 = vpop.permute.xlu1 %3260  ;;  %v1385_v17 = vsel %vm5406_vm6, %v3242_v56, %v3237_v57  ;;  %v1412_v8 = vsel %vm5407_vm12, %v3248_v20, %v3253_v60  ;;  %v1411_v9 = vsel %vm5408_vm2, %v3247_v62, %v3252_v19  ;;  %v1416_v2 = vsel %vm5409_vm1, %v3253_v60, %v3248_v20  ;;  %vm5411_vm6 = vmmov %vm5409_vm1 }
 0x111   :  { %2754 = vmatprep.subr.msk.bf16.mxu0 %vm4100_vm8, %v2753_v25  ;;  %v4440_v43 = vpop.permute.xlu0 %3255  ;;  %v3263_v23 = vunpack.i.h.bf16 %v4432_v29  ;;  %v3262_v24 = vunpack.i.l.bf16 %v4432_v29  ;;  %v2778_v30 = vpack.c.bf16 %v1386_v11, %v1385_v17  ;;  %v1415_v4 = vsel %vm5410_vm11, %v3252_v19, %v3247_v62  ;;  %vm5412_vm12 = vmmov %vm5409_vm1  ;;  %v3652_v19 = vld [vmem:[#allocation5] sm:$0xff]  }
 0x112   :  { %v3258_v25 = vunpack.i.h.bf16 %v4440_v43  ;;  %v3257_v28 = vunpack.i.l.bf16 %v4440_v43  ;;  %v2781_v33 = vpack.c.bf16 %v1412_v8, %v1411_v9  ;;  %v2784_v42 = vpack.c.bf16 %v1416_v2, %v1415_v4  ;;  %vm5413_vm2 = vmmov %vm5409_vm1 }
 0x113   :  { %vm5414_vm11 = vcmp.lt.s32.totalorder %v4002_v26, 113 }
 0x114   :  { %2757 = vmatpush1.bf16.msk.msra.mxu0 %vm4119_vm10, %v2756_v6  ;;  %v4458_v32 = vpop.permute.xlu1 %3270  ;;  %v1414_v40 = vsel %vm5411_vm6, %v3258_v25, %v3263_v23  ;;  %v1413_v41 = vsel %vm5412_vm12, %v3257_v28, %v3262_v24  ;;  %v1418_v43 = vsel %vm5413_vm2, %v3263_v23, %v3258_v25  ;;  %v1417_v44 = vsel %vm5409_vm1, %v3262_v24, %v3257_v28  ;;  %vm5415_vm6 = vmmov %vm5414_vm11 }
 0x115   :  { %2764 = vmatprep.subr.msk.bf16.mxu0 %vm4041_vm3, %v2763_v37  ;;  %v4460_v13 = vpop.permute.xlu0 %3265  ;;  %v3273_v6 = vunpack.i.h.bf16 %v4458_v32  ;;  %v3272_v34 = vunpack.i.l.bf16 %v4458_v32  ;;  %vm5416_vm12 = vmmov %vm5415_vm6 }
 0x116   :  { %v3268_v36 = vunpack.i.h.bf16 %v4460_v13  ;;  %v3267_v37 = vunpack.i.l.bf16 %v4460_v13  ;;  %v2790_v13 = vpack.c.bf16 %v1418_v43, %v1417_v44  ;;  %vm5417_vm2 = vmmov %vm5415_vm6 }
 0x117   :  { %2758 = vmatmul.mubr.msk.bf16.vlgmr.msra.gmra.mrb[8].mxu0 %vm310_vm14, %v3650_v45  ;;  %vm5418_vm1 = vmmov %vm5417_vm2 }
 0x118   :  { %2767 = vmatpush1.bf16.msk.msra.mxu0 %vm4153_vm15, %v2766_v46  ;;  %1581 = vmatprep.mubr.bf16.mxu0 %v3820_v12  ;;  %v3281_v10 = vpop.permute.xlu1 %3280  ;;  %v1682_v35 = vsel %vm5414_vm11, %v3273_v6, %v3268_v36  ;;  %v1681_v45 = vsel %vm5415_vm6, %v3272_v34, %v3267_v37  ;;  %v2787_v46 = vpack.c.bf16 %v1414_v40, %v1413_v41  ;;  %vm5419_vm11 = vmmov %vm5418_vm1 }
 0x119   :  { %2770 = vmatprep.subr.msk.bf16.mxu0 %vm4041_vm3, %v2769_v50  ;;  %v3276_v21 = vpop.permute.xlu0 %3275  ;;  %v3283_v47 = vunpack.i.h.bf16 %v3281_v10  ;;  %v3282_v49 = vunpack.i.l.bf16 %v3281_v10  ;;  %v1678_v14 = vsel %vm5416_vm12, %v3268_v36, %v3273_v6  ;;  %v1677_v56 = vsel %vm5417_vm2, %v3267_v37, %v3272_v34  ;;  %vm5420_vm6 = vmmov %vm5418_vm1  ;;  %v3653_v37 = vld [vmem:[#allocation5 + $0x8] sm:$0xff]  }
 0x11a   :  { %v3278_v50 = vunpack.i.h.bf16 %v3276_v21  ;;  %v3277_v51 = vunpack.i.l.bf16 %v3276_v21  ;;  %v2797_v27 = vpack.c.bf16 %v1682_v35, %v1681_v45  ;;  %v2800_v20 = vpack.c.bf16 %v1678_v14, %v1677_v56  ;;  %vm5421_vm12 = vmmov %vm5418_vm1 }
 0x11b   :  { %vm5422_vm2 = vcmp.lt.s32.totalorder %v4002_v26, 112 }
 0x11c   :  { %2773 = vmatpush1.bf16.msk.msra.mxu0 %vm4153_vm15, %v2772_v58  ;;  %v3291_v29 = vpop.permute.xlu1 %3290  ;;  %v1683_v60 = vsel %vm5419_vm11, %v3282_v49, %v3277_v51  ;;  %v1680_v62 = vsel %vm5420_vm6, %v3278_v50, %v3283_v47  ;;  %v1679_v63 = vsel %vm5421_vm12, %v3277_v51, %v3282_v49 }
 0x11d   :  { %1612 = vmatprep.subr.bf16.mxu0 %v1436_v16  ;;  %v3286_v38 = vpop.permute.xlu0 %3285  ;;  %v3293_v57 = vunpack.i.h.bf16 %v3291_v29  ;;  %v3292_v58 = vunpack.i.l.bf16 %v3291_v29  ;;  %v1684_v16 = vsel %vm5418_vm1, %v3283_v47, %v3278_v50  ;;  %vm5423_vm1 = vmmov %vm5422_vm2 }
 0x11e   :  { %v3288_v59 = vunpack.i.h.bf16 %v3286_v38  ;;  %v3287_v15 = vunpack.i.l.bf16 %v3286_v38  ;;  %v2803_v10 = vpack.c.bf16 %v1684_v16, %v1683_v60  ;;  %vm5424_vm11 = vmmov %vm5423_vm1 }
 0x11f   :  { %2759 = vmatmul.mubr.msk.bf16.gmra.mrb[12].mxu0 %vm310_vm14, %v3651_v7  ;;  %vm5425_vm6 = vmmov %vm5423_vm1 }
 0x120   :  { %2776 = vmatpush1.bf16.msk.msra.mxu0 %vm4185_vm13, %v2775_v22  ;;  %1640 = vmatprep.mubr.bf16.mxu0 %v3820_v12  ;;  %v3301_v55 = vpop.permute.xlu1 %3300  ;;  %v1714_v3 = vsel %vm5422_vm2, %v3293_v57, %v3288_v59  ;;  %v1713_v7 = vsel %vm5423_vm1, %v3292_v58, %v3287_v15  ;;  %v1710_v23 = vsel %vm5424_vm11, %v3288_v59, %v3293_v57  ;;  %vm5426_vm12 = vmmov %vm5423_vm1  ;;  %v3655_v59 = vld [vmem:[#allocation5 + $0x28] sm:$0xff]  }
 0x121   :  { %1614 = vmatprep.subr.bf16.mxu0 %v1438_v18  ;;  %v3296_v32 = vpop.permute.xlu0 %3295  ;;  %v3303_v11 = vunpack.i.h.bf16 %v3301_v55  ;;  %v3302_v17 = vunpack.i.l.bf16 %v3301_v55  ;;  %v2806_v18 = vpack.c.bf16 %v1680_v62, %v1679_v63  ;;  %v1709_v24 = vsel %vm5425_vm6, %v3287_v15, %v3292_v58  ;;  %vm5427_vm2 = vmmov %vm5423_vm1  ;;  %v3654_v58 = vld [vmem:[#allocation5 + $0x20] sm:$0xff]  }
 0x122   :  { %v3298_v8 = vunpack.i.h.bf16 %v3296_v32  ;;  %v3297_v9 = vunpack.i.l.bf16 %v3296_v32  ;;  %v2809_v25 = vpack.c.bf16 %v1714_v3, %v1713_v7  ;;  %v1765_v38 = vpack.c.bf16 %v1710_v23, %v1709_v24  ;;  %vm5428_vm11 = vmmov %vm5423_vm1 }
 0x123   :  { %vm5429_vm6 = vcmp.lt.s32.totalorder %v4002_v26, 111 }
 0x124   :  { %2779 = vmatpush1.bf16.msk.msra.mxu0 %vm4185_vm13, %v2778_v30  ;;  %v3311_v21 = vpop.permute.xlu1 %3310  ;;  %v1715_v6 = vsel %vm5427_vm2, %v3302_v17, %v3297_v9  ;;  %v1712_v29 = vsel %vm5423_vm1, %v3298_v8, %v3303_v11  ;;  %v1711_v40 = vsel %vm5428_vm11, %v3297_v9, %v3302_v17  ;;  %vm5431_vm2 = vmmov %vm5429_vm6 }
 0x125   :  { %2782 = vmatprep.subr.msk.bf16.mxu0 %vm4100_vm8, %v2781_v33  ;;  %v3306_v22 = vpop.permute.xlu0 %3305  ;;  %v3313_v28 = vunpack.i.h.bf16 %v3311_v21  ;;  %v3312_v30 = vunpack.i.l.bf16 %v3311_v21  ;;  %v1716_v33 = vsel %vm5426_vm12, %v3303_v11, %v3298_v8  ;;  %vm5430_vm12 = vmmov %vm5429_vm6  ;;  %v1767_v47 = vpack.c.bf16 %v1712_v29, %v1711_v40 }
 0x126   :  { %v3308_v2 = vunpack.i.h.bf16 %v3306_v22  ;;  %v3307_v4 = vunpack.i.l.bf16 %v3306_v22  ;;  %v2812_v43 = vpack.c.bf16 %v1716_v33, %v1715_v6  ;;  %vm5432_vm1 = vmmov %vm5431_vm2 }
 0x127   :  { %vm5433_vm11 = vmmov %vm5432_vm1 }
 0x128   :  { %2785 = vmatpush1.bf16.msk.msra.mxu0 %vm4219_vm0, %v2784_v42  ;;  %v3321_v34 = vpop.permute.xlu1 %3320  ;;  %v1746_v41 = vsel %vm5429_vm6, %v3313_v28, %v3308_v2  ;;  %v1745_v42 = vsel %vm5430_vm12, %v3312_v30, %v3307_v4  ;;  %v1742_v49 = vsel %vm5431_vm2, %v3308_v2, %v3313_v28  ;;  %v1741_v50 = vsel %vm5432_vm1, %v3307_v4, %v3312_v30  ;;  %vm5434_vm6 = vmmov %vm5432_vm1 }
 0x129   :  { %2788 = vmatprep.subr.msk.bf16.mxu0 %vm4100_vm8, %v2787_v46  ;;  %v3316_v36 = vpop.permute.xlu0 %3315  ;;  %v3323_v44 = vunpack.i.h.bf16 %v3321_v34  ;;  %v3322_v35 = vunpack.i.l.bf16 %v3321_v34  ;;  %v2815_v51 = vpack.c.bf16 %v1746_v41, %v1745_v42  ;;  %vm5435_vm12 = vmmov %vm5432_vm1 }
 0x12a   :  { %v3318_v45 = vunpack.i.h.bf16 %v3316_v36  ;;  %v3317_v46 = vunpack.i.l.bf16 %v3316_v36  ;;  %vm5436_vm2 = vmmov %vm5432_vm1  ;;  %vm5437_vm1 = vcmp.lt.s32.totalorder %v4002_v26, 1 }
 0x12c   :  { %2791 = vmatpush1.bf16.msk.msra.mxu0 %vm4219_vm0, %v2790_v13  ;;  %v1748_v55 = vsel %vm5433_vm11, %v3323_v44, %v3318_v45  ;;  %v1747_v32 = vsel %vm5434_vm6, %v3322_v35, %v3317_v46  ;;  %v2818_v13 = vpack.c.bf16 %v1742_v49, %v1741_v50  ;;  %v1744_v14 = vsel %vm5435_vm12, %v3318_v45, %v3323_v44  ;;  %vm5438_vm11 = vmmov %vm5437_vm1 }
 0x12d   :  { %2798 = vmatprep.subr.msk.bf16.mxu0 %vm4251_vm9, %v2797_v27  ;;  %v1743_v56 = vsel %vm5436_vm2, %v3317_v46, %v3322_v35  ;;  %v2821_v27 = vpack.c.bf16 %v1748_v55, %v1747_v32  ;;  %vm5439_vm6 = vmmov %vm5437_vm1 }
 0x12e   :  { %v2824_v57 = vpack.c.bf16 %v1744_v14, %v1743_v56  ;;  %vm5440_vm12 = vmmov %vm5437_vm1 }
 0x12f   :  { %2792 = vmatmul.mubr.msk.bf16.vlgmr.msra.gmra.mrb[8].mxu0 %vm310_vm14, %v3652_v19  ;;  %vm5441_vm2 = vmmov %vm5437_vm1 }
 0x130   :  { %2801 = vmatpush1.bf16.msk.msra.mxu0 %vm4052_vm4, %v2800_v20  ;;  %1650 = vmatprep.mubr.bf16.mxu0 %v3820_v12 }
 0x131   :  { %2804 = vmatprep.subr.msk.bf16.mxu0 %vm4251_vm9, %v2803_v10 }
 0x134   :  { %2807 = vmatpush1.bf16.msk.msra.mxu0 %vm4052_vm4, %v2806_v18 }
 0x135   :  { %2810 = vmatprep.subr.msk.bf16.mxu0 %vm4285_vm7, %v2809_v25 }
 0x137   :  { %2793 = vmatmul.mubr.msk.bf16.gmra.mrb[12].mxu0 %vm310_vm14, %v3653_v37 }
 0x138   :  { %1794 = vmatpush1.bf16.msra.mxu0 %v1765_v38  ;;  %1821 = vmatprep.mubr.bf16.mxu0 %v3820_v12 }
 0x139   :  { %2813 = vmatprep.subr.msk.bf16.mxu0 %vm4285_vm7, %v2812_v43 }
 0x13c   :  { %1796 = vmatpush1.bf16.msra.mxu0 %v1767_v47 }
 0x13d   :  { %2816 = vmatprep.subr.msk.bf16.mxu0 %vm4324_vm5, %v2815_v51 }
 0x140   :  { %2819 = vmatpush1.bf16.msk.msra.mxu0 %vm4119_vm10, %v2818_v13 }
 0x141   :  { %2822 = vmatprep.subr.msk.bf16.mxu0 %vm4324_vm5, %v2821_v27 }
 0x144   :  { %2825 = vmatpush1.bf16.msk.msra.mxu0 %vm4119_vm10, %v2824_v57 }
 0x147   :  { %2826 = vmatmul.mubr.msk.bf16.vlgmr.msra.gmra.mrb[8].mxu0 %vm310_vm14, %v3654_v58 }
 0x148   :  { %1831 = vmatprep.mubr.bf16.mxu0 %v3820_v12 }
 0x14f   :  { %2827 = vmatmul.mubr.msk.bf16.gmra.mrb[12].mxu0 %vm310_vm14, %v3655_v59 }
 0x1d2   :  { %v621_v15 = vpop.f32.mrb[0].mxu0 }
 0x1d3   :  { %v623_v16 = vpop.f32.mrb[1].mxu0 }
 0x1d4   :  { %v625_v60 = vpop.f32.mrb[2].mxu0  ;;  %v648_v19 = vadd.f32 %v623_v16, %v621_v15 }
 0x1d5   :  { %v627_v20 = vpop.f32.mrb[3].mxu0 }
 0x1d6   :  { %649 = vadd.xlane.f32.xlu0 %v648_v19  ;;  %v651_v62 = vadd.f32 %v627_v20, %v625_v60 }
 0x1d8   :  { %652 = vadd.xlane.f32.xlu1 %v651_v62 }
 0x1da   :  { %v631_v63 = vpop.f32.mrb[4].mxu0 }
 0x1db   :  { %v633_v3 = vpop.f32.mrb[5].mxu0 }
 0x1dc   :  { %v635_v7 = vpop.f32.mrb[6].mxu0  ;;  %v654_v10 = vadd.f32 %v633_v3, %v631_v63 }
 0x1dd   :  { %v637_v21 = vpop.f32.mrb[7].mxu0 }
 0x1de   :  { %655 = vadd.xlane.f32.xlu0 %v654_v10  ;;  %v657_v22 = vadd.f32 %v637_v21, %v635_v7 }
 0x1e2   :  { %658 = vadd.xlane.f32.xlu0 %v657_v22 }
 0x21a   :  { %v1823_v11 = vpop.f32.mrb[8].mxu0 }
 0x21b   :  { %v1825_v17 = vpop.f32.mrb[9].mxu0 }
 0x21c   :  { %v1827_v8 = vpop.f32.mrb[10].mxu0  ;;  %v1850_v9 = vadd.f32 %v1825_v17, %v1823_v11 }
 0x21d   :  { %v1829_v18 = vpop.f32.mrb[11].mxu0 }
 0x21e   :  { %1851 = vadd.xlane.f32.xlu1 %v1850_v9  ;;  %v1853_v23 = vadd.f32 %v1829_v18, %v1827_v8 }
 0x220   :  { %1854 = vadd.xlane.f32.xlu0 %v1853_v23 }
 0x222   :  { %v1833_v24 = vpop.f32.mrb[12].mxu0 }
 0x223   :  { %v1835_v25 = vpop.f32.mrb[13].mxu0 }
 0x224   :  { %v1837_v28 = vpop.f32.mrb[14].mxu0  ;;  %v1856_v30 = vadd.f32 %v1835_v25, %v1833_v24 }
 0x225   :  { %v1839_v2 = vpop.f32.mrb[15].mxu0 }
 0x226   :  { %v1859_v4 = vadd.f32 %v1839_v2, %v1837_v28  ;;  %1857 = vadd.xlane.f32.xlu1 %v1856_v30 }
 0x228   :  { %1860 = vadd.xlane.f32.xlu0 %v1859_v4 }
 0x263   :  { %v650_v33 = vpop.xlane.xlu0 %649 }
 0x264   :  { %v661_v6 = vmul.f32 0.00390625, %v650_v33 }
 0x265   :  { %v653_v34 = vpop.xlane.xlu1 %652 }
 0x266   :  { %v4603_v36 = vsub.f32 %v621_v15, %v661_v6  ;;  %v4605_v37 = vsub.f32 %v623_v16, %v661_v6  ;;  %v662_v29 = vmul.f32 0.00390625, %v653_v34 }
 0x268   :  { %v4607_v38 = vsub.f32 %v625_v60, %v662_v29  ;;  %v4609_v40 = vsub.f32 %v627_v20, %v662_v29  ;;  %v673_v41 = vmul.f32 %v4603_v36, %v4603_v36  ;;  %v674_v42 = vmul.f32 %v4605_v37, %v4605_v37 }
 0x26a   :  { %v681_v43 = vadd.f32 %v674_v42, %v673_v41  ;;  %v675_v44 = vmul.f32 %v4607_v38, %v4607_v38  ;;  %v676_v35 = vmul.f32 %v4609_v40, %v4609_v40 }
 0x26b   :  { %v656_v45 = vpop.xlane.xlu0 %655 }
 0x26c   :  { %v663_v46 = vmul.f32 0.00390625, %v656_v45  ;;  %682 = vadd.xlane.f32.xlu1 %v681_v43  ;;  %v684_v47 = vadd.f32 %v676_v35, %v675_v44 }
 0x26e   :  { %v4619_v49 = vsub.f32 %v631_v63, %v663_v46  ;;  %v4621_v50 = vsub.f32 %v633_v3, %v663_v46  ;;  %685 = vadd.xlane.f32.xlu0 %v684_v47 }
 0x26f   :  { %v659_v51 = vpop.xlane.xlu0 %658 }
 0x270   :  { %v664_v55 = vmul.f32 0.00390625, %v659_v51  ;;  %v677_v32 = vmul.f32 %v4619_v49, %v4619_v49  ;;  %v678_v13 = vmul.f32 %v4621_v50, %v4621_v50 }
 0x272   :  { %v4627_v14 = vsub.f32 %v635_v7, %v664_v55  ;;  %v4629_v56 = vsub.f32 %v637_v21, %v664_v55  ;;  %v687_v27 = vadd.f32 %v678_v13, %v677_v32 }
 0x274   :  { %688 = vadd.xlane.f32.xlu1 %v687_v27  ;;  %v679_v57 = vmul.f32 %v4627_v14, %v4627_v14  ;;  %v680_v58 = vmul.f32 %v4629_v56, %v4629_v56 }
 0x276   :  { %v690_v59 = vadd.f32 %v680_v58, %v679_v57 }
 0x278   :  { %691 = vadd.xlane.f32.xlu0 %v690_v59 }
 0x2ab   :  { %v1852_v15 = vpop.xlane.xlu1 %1851 }
 0x2ac   :  { %v1862_v16 = vmul.f32 0.00390625, %v1852_v15 }
 0x2ad   :  { %v1855_v60 = vpop.xlane.xlu0 %1854 }
 0x2ae   :  { %v4635_v19 = vsub.f32 %v1823_v11, %v1862_v16  ;;  %v4637_v20 = vsub.f32 %v1825_v17, %v1862_v16  ;;  %v1863_v62 = vmul.f32 0.00390625, %v1855_v60 }
 0x2b0   :  { %v4639_v63 = vsub.f32 %v1827_v8, %v1863_v62  ;;  %v4641_v3 = vsub.f32 %v1829_v18, %v1863_v62  ;;  %v1874_v7 = vmul.f32 %v4635_v19, %v4635_v19  ;;  %v1875_v10 = vmul.f32 %v4637_v20, %v4637_v20 }
 0x2b2   :  { %v1882_v21 = vadd.f32 %v1875_v10, %v1874_v7  ;;  %v1876_v22 = vmul.f32 %v4639_v63, %v4639_v63  ;;  %v1877_v11 = vmul.f32 %v4641_v3, %v4641_v3 }
 0x2b3   :  { %v1858_v17 = vpop.xlane.xlu1 %1857 }
 0x2b4   :  { %v1864_v9 = vmul.f32 0.00390625, %v1858_v17  ;;  %1883 = vadd.xlane.f32.xlu1 %v1882_v21  ;;  %v1885_v8 = vadd.f32 %v1877_v11, %v1876_v22 }
 0x2b5   :  { %v1861_v23 = vpop.xlane.xlu0 %1860 }
 0x2b6   :  { %v4651_v18 = vsub.f32 %v1833_v24, %v1864_v9  ;;  %v4653_v30 = vsub.f32 %v1835_v25, %v1864_v9  ;;  %v1865_v4 = vmul.f32 0.00390625, %v1861_v23  ;;  %1886 = vadd.xlane.f32.xlu0 %v1885_v8 }
 0x2b8   :  { %v4655_v33 = vsub.f32 %v1837_v28, %v1865_v4  ;;  %v4657_v6 = vsub.f32 %v1839_v2, %v1865_v4  ;;  %v1878_v34 = vmul.f32 %v4651_v18, %v4651_v18  ;;  %v1879_v29 = vmul.f32 %v4653_v30, %v4653_v30 }
 0x2ba   :  { %v1888_v41 = vadd.f32 %v1879_v29, %v1878_v34  ;;  %v1880_v42 = vmul.f32 %v4655_v33, %v4655_v33  ;;  %v1881_v24 = vmul.f32 %v4657_v6, %v4657_v6 }
 0x2bc   :  { %1889 = vadd.xlane.f32.xlu1 %v1888_v41  ;;  %v1891_v25 = vadd.f32 %v1881_v24, %v1880_v42 }
 0x2be   :  { %1892 = vadd.xlane.f32.xlu0 %v1891_v25 }
 0x2f9   :  { %v683_v28 = vpop.xlane.xlu1 %682 }
 0x2fa   :  { %v693_v43 = vmul.f32 0.00390625, %v683_v28 }
 0x2fb   :  { %v686_v2 = vpop.xlane.xlu0 %685 }
 0x2fc   :  { %v697_v44 = vadd.f32 1e-05, %v693_v43  ;;  %v694_v35 = vmul.f32 0.00390625, %v686_v2 }
 0x2fe   :  { %3668 = vrsqrt.f32 %v697_v44  ;;  %v698_v45 = vadd.f32 1e-05, %v694_v35 }
 0x300   :  { %3670 = vrsqrt.f32 %v698_v45 }
 0x301   :  { %v689_v46 = vpop.xlane.xlu1 %688 }
 0x302   :  { %v695_v47 = vmul.f32 0.00390625, %v689_v46 }
 0x304   :  { %v699_v51 = vadd.f32 1e-05, %v695_v47 }
 0x305   :  { %v692_v55 = vpop.xlane.xlu0 %691 }
 0x306   :  { %3672 = vrsqrt.f32 %v699_v51  ;;  %v696_v32 = vmul.f32 0.00390625, %v692_v55 }
 0x308   :  { %v3669_v13 = vpop.eup %3668  ;;  %v700_v27 = vadd.f32 1e-05, %v696_v32 }
 0x309   :  { %v705_v57 = vmul.f32 %v3669_v13, %v4603_v36  ;;  %v706_v58 = vmul.f32 %v3669_v13, %v4605_v37 }
 0x30a   :  { %v3671_v59 = vpop.eup %3670  ;;  %3674 = vrsqrt.f32 %v700_v27 }
 0x30b   :  { %v707_v15 = vmul.f32 %v3671_v59, %v4607_v38  ;;  %v708_v16 = vmul.f32 %v3671_v59, %v4609_v40  ;;  %v713_v60 = vmax.f32 %v705_v57, 0.0  ;;  %v714_v62 = vmax.f32 %v706_v58, 0.0 }
 0x30d   :  { %v715_v7 = vmax.f32 %v707_v15, 0.0  ;;  %v716_v10 = vmax.f32 %v708_v16, 0.0 }
 0x30f   :  { %v4671_v21 = vpack.i.bf16 %v716_v10, %v714_v62  ;;  %v3324_v22 = vpack.i.bf16 %v715_v7, %v713_v60  ;;  %v4677_v17 = vpack.c.bf16 %v716_v10, %v714_v62  ;;  %v4679_v38 = vpack.c.bf16 %v715_v7, %v713_v60 }
 0x310   :  { %v3673_v11 = vpop.eup %3672 }
 0x311   :  { %3330 = vrot.lane.b32.xlu0 %v4671_v21, %s3817_s2  ;;  %3325 = vrot.lane.b32.xlu1 %v3324_v22, %s3817_s2  ;;  %v709_v36 = vmul.f32 %v3673_v11, %v4619_v49  ;;  %v710_v8 = vmul.f32 %v3673_v11, %v4621_v50 }
 0x313   :  { %v717_v23 = vmax.f32 %v709_v36, 0.0  ;;  %v718_v41 = vmax.f32 %v710_v8, 0.0 }
 0x314   :  { %v3675_v37 = vpop.eup %3674 }
 0x315   :  { %v711_v40 = vmul.f32 %v3675_v37, %v4627_v14  ;;  %v712_v9 = vmul.f32 %v3675_v37, %v4629_v56  ;;  %3345 = vrot.lane.b32.xlu0 %v3324_v22, %s3818_s22 }
 0x317   :  { %v719_v4 = vmax.f32 %v711_v40, 0.0  ;;  %v720_v34 = vmax.f32 %v712_v9, 0.0 }
 0x319   :  { %v3354_v29 = vpack.i.bf16 %v719_v4, %v717_v23  ;;  %v3339_v49 = vpack.i.bf16 %v720_v34, %v718_v41  ;;  %v4687_v42 = vpack.c.bf16 %v720_v34, %v718_v41  ;;  %v4689_v24 = vpack.c.bf16 %v719_v4, %v717_v23 }
 0x31b   :  { %3355 = vrot.lane.b32.xlu0 %v3354_v29, %s3818_s22  ;;  %3335 = vrot.lane.b32.xlu1 %v3354_v29, %s3817_s2 }
 0x31f   :  { %3360 = vrot.lane.b32.xlu0 %v3324_v22, %s3819_s23  ;;  %3340 = vrot.lane.b32.xlu1 %v3339_v49, %s3817_s2 }
 0x323   :  { %3375 = vrot.lane.b32.xlu0 %v3354_v29, %s3819_s23  ;;  %3350 = vrot.lane.b32.xlu1 %v4671_v21, %s3818_s22 }
 0x327   :  { %3380 = vrot.lane.b32.xlu0 %v3324_v22, %s3815_s9  ;;  %3365 = vrot.lane.b32.xlu1 %v3339_v49, %s3818_s22 }
 0x32b   :  { %3395 = vrot.lane.b32.xlu0 %v3354_v29, %s3815_s9  ;;  %3370 = vrot.lane.b32.xlu1 %v4671_v21, %s3819_s23 }
 0x32f   :  { %3400 = vrot.lane.b32.xlu0 %v3324_v22, %s3821_s25  ;;  %3385 = vrot.lane.b32.xlu1 %v3339_v49, %s3819_s23 }
 0x333   :  { %3415 = vrot.lane.b32.xlu0 %v3354_v29, %s3821_s25  ;;  %3390 = vrot.lane.b32.xlu1 %v4671_v21, %s3815_s9 }
 0x337   :  { %3420 = vrot.lane.b32.xlu0 %v3324_v22, %s3822_s26  ;;  %3405 = vrot.lane.b32.xlu1 %v3339_v49, %s3815_s9 }
 0x33b   :  { %3435 = vrot.lane.b32.xlu0 %v3354_v29, %s3822_s26  ;;  %3410 = vrot.lane.b32.xlu1 %v4671_v21, %s3821_s25 }
 0x33f   :  { %3440 = vrot.lane.b32.xlu0 %v3324_v22, %s3823_s27  ;;  %3425 = vrot.lane.b32.xlu1 %v3339_v49, %s3821_s25 }
 0x341   :  { %v1884_v50 = vpop.xlane.xlu1 %1883 }
 0x342   :  { %v1894_v14 = vmul.f32 0.00390625, %v1884_v50 }
 0x343   :  { %3455 = vrot.lane.b32.xlu0 %v3354_v29, %s3823_s27  ;;  %3430 = vrot.lane.b32.xlu1 %v4671_v21, %s3822_s26  ;;  %v1887_v56 = vpop.xlane.xlu0 %1886 }
 0x344   :  { %v1898_v25 = vadd.f32 1e-05, %v1894_v14  ;;  %v1895_v28 = vmul.f32 0.00390625, %v1887_v56 }
 0x346   :  { %3676 = vrsqrt.f32 %v1898_v25  ;;  %v1899_v43 = vadd.f32 1e-05, %v1895_v28 }
 0x347   :  { %3460 = vrot.lane.b32.xlu0 %v3324_v22, %s3824_s28  ;;  %3445 = vrot.lane.b32.xlu1 %v3339_v49, %s3822_s26 }
 0x348   :  { %3678 = vrsqrt.f32 %v1899_v43 }
 0x349   :  { %v1890_v2 = vpop.xlane.xlu1 %1889 }
 0x34a   :  { %v1896_v44 = vmul.f32 0.00390625, %v1890_v2 }
 0x34b   :  { %3475 = vrot.lane.b32.xlu0 %v3354_v29, %s3824_s28  ;;  %3450 = vrot.lane.b32.xlu1 %v4671_v21, %s3823_s27  ;;  %v1893_v35 = vpop.xlane.xlu0 %1892 }
 0x34c   :  { %v1900_v45 = vadd.f32 1e-05, %v1896_v44  ;;  %v1897_v46 = vmul.f32 0.00390625, %v1893_v35 }
 0x34e   :  { %3680 = vrsqrt.f32 %v1900_v45  ;;  %v1901_v47 = vadd.f32 1e-05, %v1897_v46 }
 0x34f   :  { %3465 = vrot.lane.b32.xlu1 %v3339_v49, %s3823_s27 }
 0x350   :  { %v3677_v51 = vpop.eup %3676  ;;  %3682 = vrsqrt.f32 %v1901_v47 }
 0x351   :  { %v1906_v55 = vmul.f32 %v3677_v51, %v4635_v19  ;;  %v1907_v13 = vmul.f32 %v3677_v51, %v4637_v20 }
 0x352   :  { %v3679_v32 = vpop.eup %3678 }
 0x353   :  { %v1908_v27 = vmul.f32 %v3679_v32, %v4639_v63  ;;  %v1909_v57 = vmul.f32 %v3679_v32, %v4641_v3  ;;  %3470 = vrot.lane.b32.xlu1 %v4671_v21, %s3824_s28  ;;  %v1914_v58 = vmax.f32 %v1906_v55, 0.0  ;;  %v1915_v16 = vmax.f32 %v1907_v13, 0.0 }
 0x355   :  { %v1916_v59 = vmax.f32 %v1908_v27, 0.0  ;;  %v1917_v15 = vmax.f32 %v1909_v57, 0.0 }
 0x357   :  { %3480 = vrot.lane.b32.xlu1 %v3339_v49, %s3824_s28  ;;  %v4729_v60 = vpack.i.bf16 %v1916_v59, %v1914_v58  ;;  %v4735_v63 = vpack.i.bf16 %v1917_v15, %v1915_v16  ;;  %v4741_v21 = vpack.c.bf16 %v1917_v15, %v1915_v16  ;;  %v4743_v22 = vpack.c.bf16 %v1916_v59, %v1914_v58 }
 0x358   :  { %v3681_v62 = vpop.eup %3680 }
 0x359   :  { %v1910_v19 = vmul.f32 %v3681_v62, %v4651_v18  ;;  %v1911_v20 = vmul.f32 %v3681_v62, %v4653_v30  ;;  %3485 = vrot.lane.b32.xlu0 %v4729_v60, %s3817_s2 }
 0x35a   :  { %v3683_v3 = vpop.eup %3682 }
 0x35b   :  { %v1912_v7 = vmul.f32 %v3683_v3, %v4655_v33  ;;  %v1913_v10 = vmul.f32 %v3683_v3, %v4657_v6  ;;  %3490 = vrot.lane.b32.xlu1 %v4735_v63, %s3817_s2  ;;  %v1918_v18 = vmax.f32 %v1910_v19, 0.0  ;;  %v1919_v11 = vmax.f32 %v1911_v20, 0.0 }
 0x35d   :  { %v1920_v30 = vmax.f32 %v1912_v7, 0.0  ;;  %v1921_v36 = vmax.f32 %v1913_v10, 0.0 }
 0x35f   :  { %v4745_v37 = vpack.i.bf16 %v1921_v36, %v1919_v11  ;;  %v4747_v40 = vpack.i.bf16 %v1920_v30, %v1918_v18  ;;  %v4753_v33 = vpack.c.bf16 %v1921_v36, %v1919_v11  ;;  %v4755_v6 = vpack.c.bf16 %v1920_v30, %v1918_v18 }
 0x361   :  { %3500 = vrot.lane.b32.xlu1 %v4745_v37, %s3817_s2  ;;  %3495 = vrot.lane.b32.xlu0 %v4747_v40, %s3817_s2 }
 0x365   :  { %3510 = vrot.lane.b32.xlu1 %v4735_v63, %s3818_s22  ;;  %3505 = vrot.lane.b32.xlu0 %v4729_v60, %s3818_s22 }
 0x369   :  { %3525 = vrot.lane.b32.xlu1 %v4745_v37, %s3818_s22  ;;  %3515 = vrot.lane.b32.xlu0 %v4747_v40, %s3818_s22 }
 0x36d   :  { %3530 = vrot.lane.b32.xlu1 %v4735_v63, %s3819_s23  ;;  %3520 = vrot.lane.b32.xlu0 %v4729_v60, %s3819_s23 }
 0x371   :  { %3545 = vrot.lane.b32.xlu1 %v4745_v37, %s3819_s23  ;;  %3535 = vrot.lane.b32.xlu0 %v4747_v40, %s3819_s23 }
 0x375   :  { %3550 = vrot.lane.b32.xlu1 %v4735_v63, %s3815_s9  ;;  %3540 = vrot.lane.b32.xlu0 %v4729_v60, %s3815_s9 }
 0x379   :  { %3565 = vrot.lane.b32.xlu1 %v4745_v37, %s3815_s9  ;;  %3555 = vrot.lane.b32.xlu0 %v4747_v40, %s3815_s9 }
 0x37d   :  { %3570 = vrot.lane.b32.xlu1 %v4735_v63, %s3821_s25  ;;  %3560 = vrot.lane.b32.xlu0 %v4729_v60, %s3821_s25 }
 0x381   :  { %3585 = vrot.lane.b32.xlu1 %v4745_v37, %s3821_s25  ;;  %3575 = vrot.lane.b32.xlu0 %v4747_v40, %s3821_s25 }
 0x383   :  { %v3326_v9 = vpop.permute.xlu1 %3325  ;;  %v3331_v8 = vpop.permute.xlu0 %3330 }
 0x384   :  { %v3328_v23 = vunpack.i.h.bf16 %v3326_v9  ;;  %v3327_v4 = vunpack.i.l.bf16 %v3326_v9  ;;  %v3333_v34 = vunpack.i.h.bf16 %v3331_v8  ;;  %v3332_v29 = vunpack.i.l.bf16 %v3331_v8 }
 0x385   :  { %3590 = vrot.lane.b32.xlu1 %v4735_v63, %s3822_s26  ;;  %3580 = vrot.lane.b32.xlu0 %v4729_v60, %s3822_s26 }
 0x386   :  { %v849_v41 = vsel %vm5437_vm1, %v3327_v4, %v3332_v29  ;;  %v850_v49 = vsel %vm5438_vm11, %v3328_v23, %v3333_v34  ;;  %v853_v50 = vsel %vm5439_vm6, %v3332_v29, %v3327_v4  ;;  %v854_v14 = vsel %vm5440_vm12, %v3333_v34, %v3328_v23  ;;  %vm5442_vm11 = vmmov %vm5437_vm1 }
 0x387   :  { %v2639_v56 = vpack.c.bf16 %v850_v49, %v849_v41  ;;  %v2642_v25 = vpack.c.bf16 %v854_v14, %v853_v50  ;;  %v3346_v28 = vpop.permute.xlu0 %3345  ;;  %vm5443_vm6 = vmmov %vm5437_vm1  ;;  %vm5444_vm12 = vcmp.lt.s32.totalorder %v4002_v26, 127 }
 0x389   :  { %3605 = vrot.lane.b32.xlu1 %v4745_v37, %s3822_s26  ;;  %3595 = vrot.lane.b32.xlu0 %v4747_v40, %s3822_s26 }
 0x38a   :  { %2640 = vmatprep.subr.msk.bf16.mxu1 %vm4041_vm3, %v2639_v56 }
 0x38b   :  { %2643 = vmatpush1.bf16.msk.msra.mxu1 %vm4052_vm4, %v2642_v25 }
 0x38d   :  { %v3336_v43 = vpop.permute.xlu1 %3335  ;;  %3610 = vrot.lane.b32.xlu1 %v4735_v63, %s3823_s27  ;;  %3600 = vrot.lane.b32.xlu0 %v4729_v60, %s3823_s27  ;;  %v3356_v2 = vpop.permute.xlu0 %3355 }
 0x38e   :  { %v3338_v45 = vunpack.i.h.bf16 %v3336_v43  ;;  %v3337_v46 = vunpack.i.l.bf16 %v3336_v43  ;;  %v3358_v36 = vunpack.i.h.bf16 %v3356_v2 }
 0x391   :  { %v3341_v44 = vpop.permute.xlu1 %3340  ;;  %3625 = vrot.lane.b32.xlu1 %v4745_v37, %s3823_s27  ;;  %3615 = vrot.lane.b32.xlu0 %v4747_v40, %s3823_s27  ;;  %v4817_v35 = vpop.permute.xlu0 %3360 }
 0x392   :  { %v3343_v47 = vunpack.i.h.bf16 %v3341_v44  ;;  %v3342_v51 = vunpack.i.l.bf16 %v3341_v44  ;;  %v3363_v29 = vunpack.i.h.bf16 %v4817_v35  ;;  %v3362_v41 = vunpack.i.l.bf16 %v4817_v35 }
 0x394   :  { %v851_v55 = vsel %vm5441_vm2, %v3337_v46, %v3342_v51  ;;  %v852_v32 = vsel %vm5437_vm1, %v3338_v45, %v3343_v47  ;;  %v855_v13 = vsel %vm5442_vm11, %v3342_v51, %v3337_v46  ;;  %v856_v27 = vsel %vm5443_vm6, %v3343_v47, %v3338_v45  ;;  %vm5445_vm2 = vmmov %vm5444_vm12 }
 0x395   :  { %v2645_v57 = vpack.c.bf16 %v852_v32, %v851_v55  ;;  %v2648_v58 = vpack.c.bf16 %v856_v27, %v855_v13  ;;  %v3351_v59 = vpop.permute.xlu1 %3350  ;;  %3630 = vrot.lane.b32.xlu1 %v4735_v63, %s3824_s28  ;;  %3620 = vrot.lane.b32.xlu0 %v4729_v60, %s3824_s28  ;;  %v4831_v15 = vpop.permute.xlu0 %3375  ;;  %v3348_v60 = vunpack.i.h.bf16 %v3346_v28  ;;  %v3347_v63 = vunpack.i.l.bf16 %v3346_v28  ;;  %vm5446_vm1 = vmmov %vm5445_vm2  ;;  %v3656_v32 = vld [vmem:[#allocation7 + $0x10] sm:$0xff]  }
 0x396   :  { %v3353_v16 = vunpack.i.h.bf16 %v3351_v59  ;;  %v3352_v62 = vunpack.i.l.bf16 %v3351_v59  ;;  %vm5447_vm11 = vmmov %vm5446_vm1  ;;  %v3378_v44 = vunpack.i.h.bf16 %v4831_v15  ;;  %v3377_v35 = vunpack.i.l.bf16 %v4831_v15 }
 0x397   :  { %2646 = vmatprep.subr.msk.bf16.mxu1 %vm4041_vm3, %v2645_v57  ;;  %vm5448_vm6 = vmmov %vm5446_vm1 }
 0x398   :  { %2649 = vmatpush1.bf16.msk.msra.mxu1 %vm4052_vm4, %v2648_v58  ;;  %v885_v3 = vsel %vm5444_vm12, %v3352_v62, %v3347_v63  ;;  %v886_v7 = vsel %vm5445_vm2, %v3353_v16, %v3348_v60  ;;  %vm5449_vm12 = vmmov %vm5446_vm1 }
 0x399   :  { %v3366_v19 = vpop.permute.xlu1 %3365  ;;  %3640 = vrot.lane.b32.xlu1 %v4745_v37, %s3824_s28  ;;  %3635 = vrot.lane.b32.xlu0 %v4747_v40, %s3824_s28  ;;  %v4841_v20 = vpop.permute.xlu0 %3380  ;;  %v3357_v37 = vunpack.i.l.bf16 %v3356_v2  ;;  %v882_v40 = vsel %vm5447_vm11, %v3348_v60, %v3353_v16  ;;  %v2651_v9 = vpack.c.bf16 %v886_v7, %v885_v3  ;;  %vm5450_vm2 = vmmov %vm5446_vm1  ;;  %vm5451_vm11 = vcmp.lt.s32.totalorder %v4002_v26, 17 }
 0x39a   :  { %934 = vmatprep.subr.bf16.mxu1 %v4677_v17  ;;  %v3368_v10 = vunpack.i.h.bf16 %v3366_v19  ;;  %v3367_v18 = vunpack.i.l.bf16 %v3366_v19  ;;  %v881_v17 = vsel %vm5446_vm1, %v3347_v63, %v3352_v62  ;;  %v3383_v15 = vunpack.i.h.bf16 %v4841_v20 }
 0x39b   :  { %v2654_v49 = vpack.c.bf16 %v882_v40, %v881_v17  ;;  %v3382_v16 = vunpack.i.l.bf16 %v4841_v20 }
 0x39c   :  { %935 = vmatpush1.bf16.msra.mxu1 %v4679_v38  ;;  %v887_v8 = vsel %vm5448_vm6, %v3367_v18, %v3357_v37  ;;  %v888_v38 = vsel %vm5449_vm12, %v3368_v10, %v3358_v36  ;;  %v883_v50 = vsel %vm5450_vm2, %v3357_v37, %v3367_v18  ;;  %v884_v14 = vsel %vm5446_vm1, %v3358_v36, %v3368_v10  ;;  %vm5452_vm6 = vmmov %vm5451_vm11 }
 0x39d   :  { %v3371_v11 = vpop.permute.xlu1 %3370  ;;  %v4849_v30 = vpop.permute.xlu0 %3395  ;;  %936 = vmatprep.subr.bf16.mxu1 %v4687_v42  ;;  %v2657_v56 = vpack.c.bf16 %v888_v38, %v887_v8  ;;  %v2660_v45 = vpack.c.bf16 %v884_v14, %v883_v50  ;;  %vm5453_vm12 = vmmov %vm5452_vm6  ;;  %v3657_v38 = vld [vmem:[#allocation7 + $0x18] sm:$0xff]  }
 0x39e   :  { %v3373_v23 = vunpack.i.h.bf16 %v3371_v11  ;;  %v3372_v4 = vunpack.i.l.bf16 %v3371_v11  ;;  %vm5454_vm2 = vmmov %vm5452_vm6  ;;  %v3398_v36 = vunpack.i.h.bf16 %v4849_v30  ;;  %v3397_v37 = vunpack.i.l.bf16 %v4849_v30 }
 0x39f   :  { %vm5455_vm1 = vmmov %vm5454_vm2 }
 0x3a0   :  { %937 = vmatpush1.bf16.msra.mxu1 %v4689_v24  ;;  %v737_v24 = vsel %vm5451_vm11, %v3362_v41, %v3372_v4  ;;  %v738_v25 = vsel %vm5452_vm6, %v3363_v29, %v3373_v23  ;;  %v741_v47 = vsel %vm5453_vm12, %v3372_v4, %v3362_v41  ;;  %v742_v51 = vsel %vm5454_vm2, %v3373_v23, %v3363_v29  ;;  %vm5456_vm11 = vmmov %vm5455_vm1 }
 0x3a1   :  { %v3386_v42 = vpop.permute.xlu1 %3385  ;;  %v4861_v34 = vpop.permute.xlu0 %3400  ;;  %2652 = vmatprep.subr.msk.bf16.mxu1 %vm4100_vm8, %v2651_v9  ;;  %v2667_v55 = vpack.c.bf16 %v738_v25, %v737_v24  ;;  %v2670_v62 = vpack.c.bf16 %v742_v51, %v741_v47  ;;  %vm5457_vm6 = vmmov %vm5455_vm1  ;;  %vm5459_vm2 = vcmp.lt.s32.totalorder %v4002_v26, 16 }
 0x3a2   :  { %v3388_v28 = vunpack.i.h.bf16 %v3386_v42  ;;  %v3387_v43 = vunpack.i.l.bf16 %v3386_v42  ;;  %vm5458_vm12 = vmmov %vm5455_vm1  ;;  %v3403_v41 = vunpack.i.h.bf16 %v4861_v34 }
 0x3a4   :  { %2655 = vmatpush1.bf16.msk.msra.mxu1 %vm4119_vm10, %v2654_v49  ;;  %v739_v13 = vsel %vm5455_vm1, %v3377_v35, %v3387_v43  ;;  %v740_v27 = vsel %vm5456_vm11, %v3378_v44, %v3388_v28  ;;  %v743_v19 = vsel %vm5457_vm6, %v3387_v43, %v3377_v35  ;;  %v744_v60 = vsel %vm5458_vm12, %v3388_v28, %v3378_v44  ;;  %vm5460_vm1 = vmmov %vm5459_vm2 }
 0x3a5   :  { %v3391_v2 = vpop.permute.xlu1 %3390  ;;  %2658 = vmatprep.subr.msk.bf16.mxu1 %vm4100_vm8, %v2657_v56  ;;  %v4881_v46 = vpop.permute.xlu0 %3415  ;;  %v2673_v63 = vpack.c.bf16 %v740_v27, %v739_v13  ;;  %v2676_v17 = vpack.c.bf16 %v744_v60, %v743_v19  ;;  %vm5461_vm11 = vmmov %vm5460_vm1  ;;  %v3402_v49 = vunpack.i.l.bf16 %v4861_v34 }
 0x3a6   :  { %v3393_v57 = vunpack.i.h.bf16 %v3391_v2  ;;  %v3392_v58 = vunpack.i.l.bf16 %v3391_v2  ;;  %vm5462_vm6 = vmmov %vm5460_vm1  ;;  %v3418_v35 = vunpack.i.h.bf16 %v4881_v46 }
 0x3a7   :  { %vm5463_vm12 = vmmov %vm5460_vm1 }
 0x3a8   :  { %2661 = vmatpush1.bf16.msk.msra.mxu1 %vm4119_vm10, %v2660_v45  ;;  %v769_v20 = vsel %vm5459_vm2, %v3382_v16, %v3392_v58  ;;  %v770_v18 = vsel %vm5460_vm1, %v3383_v15, %v3393_v57  ;;  %v773_v40 = vsel %vm5461_vm11, %v3392_v58, %v3382_v16  ;;  %v774_v9 = vsel %vm5462_vm6, %v3393_v57, %v3383_v15  ;;  %vm5464_vm2 = vmmov %vm5460_vm1 }
 0x3a9   :  { %v3406_v59 = vpop.permute.xlu1 %3405  ;;  %2668 = vmatprep.subr.msk.bf16.mxu1 %vm4041_vm3, %v2667_v55  ;;  %v4902_v10 = vpop.permute.xlu0 %3420  ;;  %v826_v8 = vpack.c.bf16 %v770_v18, %v769_v20  ;;  %v2679_v50 = vpack.c.bf16 %v774_v9, %v773_v40  ;;  %vm5465_vm11 = vmmov %vm5460_vm1  ;;  %vm5466_vm6 = vcmp.lt.s32.totalorder %v4002_v26, 15  ;;  %v3417_v45 = vunpack.i.l.bf16 %v4881_v46 }
 0x3aa   :  { %v3408_v3 = vunpack.i.h.bf16 %v3406_v59  ;;  %v3407_v7 = vunpack.i.l.bf16 %v3406_v59  ;;  %v3423_v15 = vunpack.i.h.bf16 %v4902_v10  ;;  %v3422_v16 = vunpack.i.l.bf16 %v4902_v10 }
 0x3ab   :  { %2662 = vmatmul.mubr.msk.bf16.vlgmr.msra.gmra.mrb[0].mxu1 %vm310_vm14, %v3656_v32 }
 0x3ac   :  { %2671 = vmatpush1.bf16.msk.msra.mxu1 %vm4153_vm15, %v2670_v62  ;;  %972 = vmatprep.mubr.bf16.mxu1 %v3820_v12  ;;  %v771_v42 = vsel %vm5463_vm12, %v3397_v37, %v3407_v7  ;;  %v772_v30 = vsel %vm5464_vm2, %v3398_v36, %v3408_v3  ;;  %v775_v56 = vsel %vm5460_vm1, %v3407_v7, %v3397_v37  ;;  %vm5467_vm12 = vmmov %vm5466_vm6 }
 0x3ad   :  { %v3411_v11 = vpop.permute.xlu1 %3410  ;;  %2674 = vmatprep.subr.msk.bf16.mxu1 %vm4041_vm3, %v2673_v63  ;;  %v3436_v14 = vpop.permute.xlu0 %3435  ;;  %v776_v24 = vsel %vm5465_vm11, %v3408_v3, %v3398_v36  ;;  %v828_v25 = vpack.c.bf16 %v772_v30, %v771_v42  ;;  %vm5468_vm2 = vmmov %vm5466_vm6 }
 0x3ae   :  { %v3413_v23 = vunpack.i.h.bf16 %v3411_v11  ;;  %v3412_v4 = vunpack.i.l.bf16 %v3411_v11  ;;  %v2682_v47 = vpack.c.bf16 %v776_v24, %v775_v56  ;;  %vm5469_vm1 = vmmov %vm5468_vm2  ;;  %v3438_v11 = vunpack.i.h.bf16 %v3436_v14 }
 0x3af   :  { %vm5470_vm11 = vmmov %vm5469_vm1  ;;  %v3437_v36 = vunpack.i.l.bf16 %v3436_v14 }
 0x3b0   :  { %2677 = vmatpush1.bf16.msk.msra.mxu1 %vm4153_vm15, %v2676_v17  ;;  %v801_v28 = vsel %vm5466_vm6, %v3402_v49, %v3412_v4  ;;  %v802_v43 = vsel %vm5467_vm12, %v3403_v41, %v3413_v23  ;;  %v805_v51 = vsel %vm5468_vm2, %v3412_v4, %v3402_v49  ;;  %v806_v55 = vsel %vm5469_vm1, %v3413_v23, %v3403_v41  ;;  %vm5471_vm6 = vmmov %vm5469_vm1 }
 0x3b1   :  { %v3426_v29 = vpop.permute.xlu1 %3425  ;;  %1003 = vmatprep.subr.bf16.mxu1 %v826_v8  ;;  %v2685_v32 = vpack.c.bf16 %v802_v43, %v801_v28  ;;  %v3441_v57 = vpop.permute.xlu0 %3440  ;;  %v2688_v62 = vpack.c.bf16 %v806_v55, %v805_v51  ;;  %vm5472_vm12 = vmmov %vm5469_vm1 }
 0x3b2   :  { %v3428_v2 = vunpack.i.h.bf16 %v3426_v29  ;;  %v3427_v44 = vunpack.i.l.bf16 %v3426_v29  ;;  %vm5473_vm2 = vmmov %vm5469_vm1  ;;  %vm5474_vm1 = vcmp.lt.s32.totalorder %v4002_v26, 113  ;;  %v3443_v41 = vunpack.i.h.bf16 %v3441_v57 }
 0x3b3   :  { %2663 = vmatmul.mubr.msk.bf16.gmra.mrb[4].mxu1 %vm310_vm14, %v3657_v38  ;;  %v3658_v38 = vld [vmem:[#allocation7] sm:$0xff]   ;;  %v3442_v49 = vunpack.i.l.bf16 %v3441_v57 }
 0x3b4   :  { %2680 = vmatpush1.bf16.msk.msra.mxu1 %vm4185_vm13, %v2679_v50  ;;  %1031 = vmatprep.mubr.bf16.mxu1 %v3820_v12  ;;  %v803_v13 = vsel %vm5470_vm11, %v3417_v45, %v3427_v44  ;;  %v804_v27 = vsel %vm5471_vm6, %v3418_v35, %v3428_v2  ;;  %v807_v19 = vsel %vm5472_vm12, %v3427_v44, %v3417_v45  ;;  %vm5475_vm11 = vmmov %vm5474_vm1 }
 0x3b5   :  { %v3431_v34 = vpop.permute.xlu1 %3430  ;;  %1005 = vmatprep.subr.bf16.mxu1 %v828_v25  ;;  %v808_v60 = vsel %vm5473_vm2, %v3428_v2, %v3418_v35  ;;  %v2691_v63 = vpack.c.bf16 %v804_v27, %v803_v13  ;;  %v3456_v17 = vpop.permute.xlu0 %3455  ;;  %vm5476_vm6 = vmmov %vm5474_vm1  ;;  %v3659_v13 = vld [vmem:[#allocation7 + $0x8] sm:$0xff]  }
 0x3b6   :  { %v3433_v58 = vunpack.i.h.bf16 %v3431_v34  ;;  %v3432_v59 = vunpack.i.l.bf16 %v3431_v34  ;;  %v2694_v37 = vpack.c.bf16 %v808_v60, %v807_v19  ;;  %vm5477_vm12 = vmmov %vm5474_vm1  ;;  %v3458_v35 = vunpack.i.h.bf16 %v3456_v17 }
 0x3b7   :  { %vm5478_vm2 = vmmov %vm5474_vm1  ;;  %v3457_v45 = vunpack.i.l.bf16 %v3456_v17 }
 0x3b8   :  { %2683 = vmatpush1.bf16.msk.msra.mxu1 %vm4185_vm13, %v2682_v47  ;;  %v1072_v3 = vsel %vm5474_vm1, %v3432_v59, %v3422_v16  ;;  %v1073_v7 = vsel %vm5475_vm11, %v3433_v58, %v3423_v15  ;;  %v1068_v40 = vsel %vm5476_vm6, %v3422_v16, %v3432_v59  ;;  %v1069_v9 = vsel %vm5477_vm12, %v3423_v15, %v3433_v58  ;;  %vm5479_vm11 = vmmov %vm5474_vm1 }
 0x3b9   :  { %v3446_v46 = vpop.permute.xlu1 %3445  ;;  %2686 = vmatprep.subr.msk.bf16.mxu1 %vm4100_vm8, %v2685_v32  ;;  %v2701_v8 = vpack.c.bf16 %v1073_v7, %v1072_v3  ;;  %v2704_v50 = vpack.c.bf16 %v1069_v9, %v1068_v40  ;;  %vm5480_vm6 = vmmov %vm5474_vm1  ;;  %v3461_v25 = vpop.permute.xlu0 %3460  ;;  %vm5481_vm12 = vcmp.lt.s32.totalorder %v4002_v26, 112 }
 0x3ba   :  { %v3448_v20 = vunpack.i.h.bf16 %v3446_v46  ;;  %v3447_v18 = vunpack.i.l.bf16 %v3446_v46  ;;  %v3463_v15 = vunpack.i.h.bf16 %v3461_v25  ;;  %v3462_v16 = vunpack.i.l.bf16 %v3461_v25 }
 0x3bc   :  { %2689 = vmatpush1.bf16.msk.msra.mxu1 %vm4219_vm0, %v2688_v62  ;;  %v1074_v23 = vsel %vm5478_vm2, %v3447_v18, %v3437_v36  ;;  %v1075_v4 = vsel %vm5474_vm1, %v3448_v20, %v3438_v11  ;;  %v1070_v14 = vsel %vm5479_vm11, %v3437_v36, %v3447_v18  ;;  %v1071_v56 = vsel %vm5480_vm6, %v3438_v11, %v3448_v20  ;;  %vm5482_vm2 = vmmov %vm5481_vm12 }
 0x3bd   :  { %v3451_v10 = vpop.permute.xlu1 %3450  ;;  %2692 = vmatprep.subr.msk.bf16.mxu1 %vm4100_vm8, %v2691_v63  ;;  %v2707_v24 = vpack.c.bf16 %v1075_v4, %v1074_v23  ;;  %v2710_v47 = vpack.c.bf16 %v1071_v56, %v1070_v14  ;;  %vm5483_vm1 = vmmov %vm5482_vm2  ;;  %v3476_v19 = vpop.permute.xlu0 %3475 }
 0x3be   :  { %v3453_v42 = vunpack.i.h.bf16 %v3451_v10  ;;  %v3452_v30 = vunpack.i.l.bf16 %v3451_v10  ;;  %vm5484_vm11 = vmmov %vm5483_vm1  ;;  %v3478_v36 = vunpack.i.h.bf16 %v3476_v19 }
 0x3bf   :  { %vm5485_vm6 = vmmov %vm5483_vm1 }
 0x3c0   :  { %2695 = vmatpush1.bf16.msk.msra.mxu1 %vm4219_vm0, %v2694_v37  ;;  %v1104_v28 = vsel %vm5481_vm12, %v3452_v30, %v3442_v49  ;;  %v1105_v43 = vsel %vm5482_vm2, %v3453_v42, %v3443_v41  ;;  %v1100_v51 = vsel %vm5483_vm1, %v3442_v49, %v3452_v30  ;;  %v1101_v55 = vsel %vm5484_vm11, %v3443_v41, %v3453_v42  ;;  %vm5486_vm12 = vmmov %vm5483_vm1 }
 0x3c1   :  { %v3466_v29 = vpop.permute.xlu1 %3465  ;;  %2702 = vmatprep.subr.msk.bf16.mxu1 %vm4251_vm9, %v2701_v8  ;;  %v2713_v32 = vpack.c.bf16 %v1105_v43, %v1104_v28  ;;  %v1157_v62 = vpack.c.bf16 %v1101_v55, %v1100_v51  ;;  %vm5487_vm2 = vmmov %vm5483_vm1  ;;  %vm5488_vm11 = vcmp.lt.s32.totalorder %v4002_v26, 111  ;;  %v3477_v37 = vunpack.i.l.bf16 %v3476_v19 }
 0x3c2   :  { %v3468_v2 = vunpack.i.h.bf16 %v3466_v29  ;;  %v3467_v44 = vunpack.i.l.bf16 %v3466_v29 }
 0x3c3   :  { %2696 = vmatmul.mubr.msk.bf16.vlgmr.msra.gmra.mrb[0].mxu1 %vm310_vm14, %v3658_v38 }
 0x3c4   :  { %2705 = vmatpush1.bf16.msk.msra.mxu1 %vm4052_vm4, %v2704_v50  ;;  %1041 = vmatprep.mubr.bf16.mxu1 %v3820_v12  ;;  %v1106_v27 = vsel %vm5485_vm6, %v3467_v44, %v3457_v45  ;;  %v1107_v57 = vsel %vm5486_vm12, %v3468_v2, %v3458_v35  ;;  %v1102_v60 = vsel %vm5487_vm2, %v3457_v45, %v3467_v44  ;;  %vm5489_vm6 = vmmov %vm5488_vm11 }
 0x3c5   :  { %v3471_v34 = vpop.permute.xlu1 %3470  ;;  %2708 = vmatprep.subr.msk.bf16.mxu1 %vm4251_vm9, %v2707_v24  ;;  %v1103_v63 = vsel %vm5483_vm1, %v3458_v35, %v3468_v2  ;;  %v2716_v3 = vpack.c.bf16 %v1107_v57, %v1106_v27  ;;  %vm5490_vm12 = vmmov %vm5489_vm6  ;;  %v3660_v27 = vld [vmem:[#allocation7 + $0x20] sm:$0xff]  }
 0x3c6   :  { %v3473_v58 = vunpack.i.h.bf16 %v3471_v34  ;;  %v3472_v59 = vunpack.i.l.bf16 %v3471_v34  ;;  %v1159_v17 = vpack.c.bf16 %v1103_v63, %v1102_v60  ;;  %vm5491_vm2 = vmmov %vm5489_vm6 }
 0x3c7   :  { %vm5492_vm1 = vmmov %vm5491_vm2 }
 0x3c8   :  { %2711 = vmatpush1.bf16.msk.msra.mxu1 %vm4052_vm4, %v2710_v47  ;;  %v1136_v7 = vsel %vm5488_vm11, %v3472_v59, %v3462_v16  ;;  %v1137_v20 = vsel %vm5489_vm6, %v3473_v58, %v3463_v15  ;;  %v1132_v40 = vsel %vm5490_vm12, %v3462_v16, %v3472_v59  ;;  %v1133_v8 = vsel %vm5491_vm2, %v3463_v15, %v3473_v58  ;;  %vm5493_vm11 = vmmov %vm5492_vm1 }
 0x3c9   :  { %v3481_v46 = vpop.permute.xlu1 %3480  ;;  %2714 = vmatprep.subr.msk.bf16.mxu1 %vm4285_vm7, %v2713_v32  ;;  %v2719_v38 = vpack.c.bf16 %v1137_v20, %v1136_v7  ;;  %v2722_v49 = vpack.c.bf16 %v1133_v8, %v1132_v40  ;;  %vm5494_vm6 = vmmov %vm5492_vm1  ;;  %vm5496_vm2 = vcmp.lt.s32.totalorder %v4002_v26, 1 }
 0x3ca   :  { %v3483_v18 = vunpack.i.h.bf16 %v3481_v46  ;;  %v3482_v10 = vunpack.i.l.bf16 %v3481_v46  ;;  %vm5495_vm12 = vmmov %vm5492_vm1 }
 0x3cb   :  { %2697 = vmatmul.mubr.msk.bf16.gmra.mrb[4].mxu1 %vm310_vm14, %v3659_v13  ;;  %v3486_v9 = vpop.permute.xlu0 %3485 }
 0x3cc   :  { %1186 = vmatpush1.bf16.msra.mxu1 %v1157_v62  ;;  %1213 = vmatprep.mubr.bf16.mxu1 %v3820_v12  ;;  %v1138_v42 = vsel %vm5492_vm1, %v3482_v10, %v3477_v37  ;;  %v1139_v30 = vsel %vm5493_vm11, %v3483_v18, %v3478_v36  ;;  %v3488_v29 = vunpack.i.h.bf16 %v3486_v9  ;;  %v3487_v41 = vunpack.i.l.bf16 %v3486_v9  ;;  %vm5497_vm1 = vmmov %vm5496_vm2 }
 0x3cd   :  { %v3491_v11 = vpop.permute.xlu1 %3490  ;;  %2717 = vmatprep.subr.msk.bf16.mxu1 %vm4285_vm7, %v2716_v3  ;;  %v1134_v50 = vsel %vm5494_vm6, %v3477_v37, %v3482_v10  ;;  %v1135_v14 = vsel %vm5495_vm12, %v3478_v36, %v3483_v18  ;;  %v2725_v56 = vpack.c.bf16 %v1139_v30, %v1138_v42  ;;  %vm5498_vm11 = vmmov %vm5497_vm1 }
 0x3ce   :  { %v3493_v23 = vunpack.i.h.bf16 %v3491_v11  ;;  %v3492_v4 = vunpack.i.l.bf16 %v3491_v11  ;;  %v2728_v45 = vpack.c.bf16 %v1135_v14, %v1134_v50  ;;  %vm5499_vm6 = vmmov %vm5497_vm1  ;;  %v3661_v11 = vld [vmem:[#allocation7 + $0x28] sm:$0xff]  }
 0x3cf   :  { %vm5500_vm12 = vmmov %vm5497_vm1 }
 0x3d0   :  { %1188 = vmatpush1.bf16.msra.mxu1 %v1159_v17  ;;  %v2050_v24 = vsel %vm5496_vm2, %v3487_v41, %v3492_v4  ;;  %v2051_v25 = vsel %vm5497_vm1, %v3488_v29, %v3493_v23  ;;  %v2054_v47 = vsel %vm5498_vm11, %v3492_v4, %v3487_v41  ;;  %v2055_v51 = vsel %vm5499_vm6, %v3493_v23, %v3488_v29  ;;  %vm5501_vm2 = vmmov %vm5497_vm1 }
 0x3d1   :  { %2720 = vmatprep.subr.msk.bf16.mxu1 %vm4324_vm5, %v2719_v38  ;;  %v2831_v55 = vpack.c.bf16 %v2051_v25, %v2050_v24  ;;  %v2834_v59 = vpack.c.bf16 %v2055_v51, %v2054_v47  ;;  %vm5502_vm11 = vmmov %vm5497_vm1  ;;  %vm5503_vm6 = vcmp.lt.s32.totalorder %v4002_v26, 127 }
 0x3d3   :  { %v3501_v28 = vpop.permute.xlu1 %3500  ;;  %v3496_v43 = vpop.permute.xlu0 %3495 }
 0x3d4   :  { %v3503_v2 = vunpack.i.h.bf16 %v3501_v28  ;;  %v3502_v44 = vunpack.i.l.bf16 %v3501_v28  ;;  %v3498_v34 = vunpack.i.h.bf16 %v3496_v43  ;;  %v3497_v35 = vunpack.i.l.bf16 %v3496_v43  ;;  %2723 = vmatpush1.bf16.msk.msra.mxu1 %vm4119_vm10, %v2722_v49 }
 0x3d5   :  { %2726 = vmatprep.subr.msk.bf16.mxu1 %vm4324_vm5, %v2725_v56 }
 0x3d6   :  { %v2053_v57 = vsel %vm5500_vm12, %v3498_v34, %v3503_v2  ;;  %v2052_v58 = vsel %vm5501_vm2, %v3497_v35, %v3502_v44  ;;  %v2057_v46 = vsel %vm5497_vm1, %v3503_v2, %v3498_v34  ;;  %v2056_v15 = vsel %vm5502_vm11, %v3502_v44, %v3497_v35  ;;  %vm5504_vm12 = vmmov %vm5503_vm6 }
 0x3d7   :  { %v3511_v32 = vpop.permute.xlu1 %3510  ;;  %v3506_v13 = vpop.permute.xlu0 %3505  ;;  %v2837_v16 = vpack.c.bf16 %v2053_v57, %v2052_v58  ;;  %v2840_v60 = vpack.c.bf16 %v2057_v46, %v2056_v15  ;;  %vm5505_vm2 = vmmov %vm5503_vm6 }
 0x3d8   :  { %2729 = vmatpush1.bf16.msk.msra.mxu1 %vm4119_vm10, %v2728_v45  ;;  %v3513_v63 = vunpack.i.h.bf16 %v3511_v32  ;;  %v3512_v3 = vunpack.i.l.bf16 %v3511_v32  ;;  %v3508_v7 = vunpack.i.h.bf16 %v3506_v13  ;;  %v3507_v20 = vunpack.i.l.bf16 %v3506_v13  ;;  %vm5506_vm1 = vmmov %vm5505_vm2 }
 0x3d9   :  { %2832 = vmatprep.subr.msk.bf16.mxu1 %vm4041_vm3, %v2831_v55  ;;  %vm5507_vm11 = vmmov %vm5506_vm1 }
 0x3da   :  { %v2087_v36 = vsel %vm5503_vm6, %v3513_v63, %v3508_v7  ;;  %v2086_v37 = vsel %vm5504_vm12, %v3512_v3, %v3507_v20  ;;  %v2082_v4 = vsel %vm5506_vm1, %v3507_v20, %v3512_v3  ;;  %vm5508_vm6 = vmmov %vm5506_vm1 }
 0x3db   :  { %v3526_v62 = vpop.permute.xlu1 %3525  ;;  %v3516_v19 = vpop.permute.xlu0 %3515  ;;  %2730 = vmatmul.mubr.msk.bf16.vlgmr.msra.gmra.mrb[0].mxu1 %vm310_vm14, %v3660_v27  ;;  %v2843_v42 = vpack.c.bf16 %v2087_v36, %v2086_v37  ;;  %vm5509_vm12 = vmmov %vm5506_vm1 }
 0x3dc   :  { %2835 = vmatpush1.bf16.msk.msra.mxu1 %vm4052_vm4, %v2834_v59  ;;  %1223 = vmatprep.mubr.bf16.mxu1 %v3820_v12  ;;  %v3528_v9 = vunpack.i.h.bf16 %v3526_v62  ;;  %v3527_v8 = vunpack.i.l.bf16 %v3526_v62  ;;  %v3518_v38 = vunpack.i.h.bf16 %v3516_v19  ;;  %v3517_v23 = vunpack.i.l.bf16 %v3516_v19 }
 0x3dd   :  { %2838 = vmatprep.subr.msk.bf16.mxu1 %vm4041_vm3, %v2837_v16  ;;  %v3662_v16 = vld [vmem:[#allocation7 + $0x10] sm:$0xff]  }
 0x3de   :  { %v2088_v56 = vsel %vm5508_vm6, %v3527_v8, %v3517_v23  ;;  %v2085_v24 = vsel %vm5509_vm12, %v3518_v38, %v3528_v9 }
 0x3df   :  { %v3531_v18 = vpop.permute.xlu1 %3530  ;;  %v3521_v10 = vpop.permute.xlu0 %3520 }
 0x3e0   :  { %2841 = vmatpush1.bf16.msk.msra.mxu1 %vm4052_vm4, %v2840_v60  ;;  %v3533_v30 = vunpack.i.h.bf16 %v3531_v18  ;;  %v3532_v29 = vunpack.i.l.bf16 %v3531_v18  ;;  %v3523_v41 = vunpack.i.h.bf16 %v3521_v10  ;;  %v3522_v49 = vunpack.i.l.bf16 %v3521_v10 }
 0x3e1   :  { %2134 = vmatprep.subr.bf16.mxu1 %v4741_v21  ;;  %v2083_v21 = vsel %vm5505_vm2, %v3508_v7, %v3513_v63  ;;  %vm5510_vm2 = vmmov %vm5506_vm1  ;;  %vm5511_vm1 = vcmp.lt.s32.totalorder %v4002_v26, 17 }
 0x3e2   :  { %v2084_v25 = vsel %vm5510_vm2, %v3517_v23, %v3527_v8  ;;  %v1939_v43 = vsel %vm5511_vm1, %v3523_v41, %v3533_v30  ;;  %vm5513_vm6 = vmmov %vm5511_vm1 }
 0x3e3   :  { %v3546_v17 = vpop.permute.xlu1 %3545  ;;  %v3536_v40 = vpop.permute.xlu0 %3535  ;;  %2731 = vmatmul.mubr.msk.bf16.gmra.mrb[4].mxu1 %vm310_vm14, %v3661_v11  ;;  %v2852_v51 = vpack.c.bf16 %v2085_v24, %v2084_v25  ;;  %v1943_v55 = vsel %vm5513_vm6, %v3533_v30, %v3523_v41  ;;  %vm5514_vm12 = vmmov %vm5511_vm1 }
 0x3e4   :  { %2135 = vmatpush1.bf16.msra.mxu1 %v4743_v22  ;;  %2162 = vmatprep.mubr.bf16.mxu1 %v3820_v12  ;;  %v2089_v22 = vsel %vm5507_vm11, %v3528_v9, %v3518_v38  ;;  %vm5512_vm11 = vmmov %vm5511_vm1  ;;  %v3547_v35 = vunpack.i.l.bf16 %v3546_v17  ;;  %v3538_v45 = vunpack.i.h.bf16 %v3536_v40  ;;  %v3537_v47 = vunpack.i.l.bf16 %v3536_v40 }
 0x3e5   :  { %2136 = vmatprep.subr.bf16.mxu1 %v4753_v33  ;;  %v2846_v33 = vpack.c.bf16 %v2083_v21, %v2082_v4  ;;  %v2849_v28 = vpack.c.bf16 %v2089_v22, %v2088_v56  ;;  %v1938_v2 = vsel %vm5512_vm11, %v3522_v49, %v3532_v29  ;;  %v1942_v32 = vsel %vm5514_vm12, %v3532_v29, %v3522_v49  ;;  %vm5515_vm2 = vmmov %vm5511_vm1  ;;  %v3663_v49 = vld [vmem:[#allocation7 + $0x18] sm:$0xff]  }
 0x3e6   :  { %v2859_v13 = vpack.c.bf16 %v1939_v43, %v1938_v2  ;;  %v1940_v19 = vsel %vm5511_vm1, %v3537_v47, %v3547_v35  ;;  %v2862_v60 = vpack.c.bf16 %v1943_v55, %v1942_v32  ;;  %vm5516_vm11 = vmmov %vm5511_vm1  ;;  %vm5518_vm12 = vcmp.lt.s32.totalorder %v4002_v26, 16 }
 0x3e7   :  { %v3551_v50 = vpop.permute.xlu1 %3550  ;;  %v3541_v14 = vpop.permute.xlu0 %3540  ;;  %vm5517_vm6 = vmmov %vm5511_vm1 }
 0x3e8   :  { %2137 = vmatpush1.bf16.msra.mxu1 %v4755_v6  ;;  %v3548_v6 = vunpack.i.h.bf16 %v3546_v17  ;;  %v3553_v27 = vunpack.i.h.bf16 %v3551_v50  ;;  %v3552_v57 = vunpack.i.l.bf16 %v3551_v50  ;;  %v3543_v58 = vunpack.i.h.bf16 %v3541_v14 }
 0x3e9   :  { %2844 = vmatprep.subr.msk.bf16.mxu1 %vm4100_vm8, %v2843_v42  ;;  %v3542_v59 = vunpack.i.l.bf16 %v3541_v14  ;;  %v1944_v3 = vsel %vm5517_vm6, %v3547_v35, %v3537_v47 }
 0x3ea   :  { %v1941_v62 = vsel %vm5515_vm2, %v3538_v45, %v3548_v6  ;;  %v1945_v63 = vsel %vm5516_vm11, %v3548_v6, %v3538_v45  ;;  %vm5519_vm2 = vmmov %vm5518_vm12 }
 0x3eb   :  { %v3566_v44 = vpop.permute.xlu1 %3565  ;;  %v3556_v34 = vpop.permute.xlu0 %3555  ;;  %v2865_v7 = vpack.c.bf16 %v1941_v62, %v1940_v19  ;;  %v1970_v10 = vsel %vm5518_vm12, %v3542_v59, %v3552_v57  ;;  %v1971_v11 = vsel %vm5519_vm2, %v3543_v58, %v3553_v27  ;;  %v2868_v9 = vpack.c.bf16 %v1945_v63, %v1944_v3  ;;  %vm5520_vm1 = vmmov %vm5519_vm2 }
 0x3ec   :  { %2847 = vmatpush1.bf16.msk.msra.mxu1 %vm4119_vm10, %v2846_v33  ;;  %v3568_v36 = vunpack.i.h.bf16 %v3566_v44  ;;  %v3567_v37 = vunpack.i.l.bf16 %v3566_v44  ;;  %v3558_v17 = vunpack.i.h.bf16 %v3556_v34  ;;  %v3557_v40 = vunpack.i.l.bf16 %v3556_v34  ;;  %vm5521_vm11 = vmmov %vm5520_vm1 }
 0x3ed   :  { %2850 = vmatprep.subr.msk.bf16.mxu1 %vm4100_vm8, %v2849_v28  ;;  %v1975_v8 = vsel %vm5520_vm1, %v3553_v27, %v3543_v58  ;;  %v1974_v38 = vsel %vm5521_vm11, %v3552_v57, %v3542_v59  ;;  %v2027_v23 = vpack.c.bf16 %v1971_v11, %v1970_v10  ;;  %vm5523_vm6 = vmmov %vm5520_vm1 }
 0x3ee   :  { %v1973_v50 = vsel %vm5523_vm6, %v3558_v17, %v3568_v36  ;;  %v2871_v14 = vpack.c.bf16 %v1975_v8, %v1974_v38  ;;  %vm5524_vm12 = vmmov %vm5520_vm1  ;;  %v3664_v38 = vld [vmem:[#allocation7] sm:$0xff]  }
 0x3ef   :  { %v3571_v46 = vpop.permute.xlu1 %3570  ;;  %v3561_v15 = vpop.permute.xlu0 %3560  ;;  %v1977_v22 = vsel %vm5524_vm12, %v3568_v36, %v3558_v17  ;;  %vm5525_vm2 = vmmov %vm5520_vm1 }
 0x3f0   :  { %2853 = vmatpush1.bf16.msk.msra.mxu1 %vm4119_vm10, %v2852_v51  ;;  %v3573_v21 = vunpack.i.h.bf16 %v3571_v46  ;;  %v3572_v4 = vunpack.i.l.bf16 %v3571_v46  ;;  %v3563_v42 = vunpack.i.h.bf16 %v3561_v15  ;;  %v3562_v30 = vunpack.i.l.bf16 %v3561_v15 }
 0x3f1   :  { %2860 = vmatprep.subr.msk.bf16.mxu1 %vm4041_vm3, %v2859_v13  ;;  %v1976_v56 = vsel %vm5525_vm2, %v3567_v37, %v3557_v40 }
 0x3f2   :  { %v2874_v6 = vpack.c.bf16 %v1977_v22, %v1976_v56 }
 0x3f3   :  { %v3586_v20 = vpop.permute.xlu1 %3585  ;;  %v3576_v18 = vpop.permute.xlu0 %3575  ;;  %2854 = vmatmul.mubr.msk.bf16.vlgmr.msra.gmra.mrb[8].mxu1 %vm310_vm14, %v3662_v16 }
 0x3f4   :  { %2863 = vmatpush1.bf16.msk.msra.mxu1 %vm4153_vm15, %v2862_v60  ;;  %2172 = vmatprep.mubr.bf16.mxu1 %v3820_v12  ;;  %v3588_v43 = vunpack.i.h.bf16 %v3586_v20  ;;  %v3587_v2 = vunpack.i.l.bf16 %v3586_v20  ;;  %v3578_v44 = vunpack.i.h.bf16 %v3576_v18  ;;  %v3577_v34 = vunpack.i.l.bf16 %v3576_v18 }
 0x3f5   :  { %2866 = vmatprep.subr.msk.bf16.mxu1 %vm4041_vm3, %v2865_v7  ;;  %vm5522_vm3 = vmmov %vm5520_vm1  ;;  %vm5526_vm1 = vcmp.lt.s32.totalorder %v4002_v26, 15 }
 0x3f6   :  { %v1972_v48 = vsel %vm5522_vm3, %v3557_v40, %v3567_v37  ;;  %v2003_v33 = vsel %vm5526_vm1, %v3563_v42, %v3573_v21  ;;  %vm5527_vm11 = vmmov %vm5526_vm1  ;;  %v2008_v16 = vsel %vm5526_vm1, %v3587_v2, %v3577_v34 }
 0x3f7   :  { %v3591_v29 = vpop.permute.xlu1 %3590  ;;  %v3581_v41 = vpop.permute.xlu0 %3580  ;;  %v2002_v39 = vsel %vm5527_vm11, %v3562_v30, %v3572_v4  ;;  %v2029_v28 = vpack.c.bf16 %v1973_v50, %v1972_v48  ;;  %vm5529_vm3 = vmmov %vm5526_vm1  ;;  %vm5533_vm11 = vcmp.lt.s32.totalorder %v4002_v26, 113 }
 0x3f8   :  { %2869 = vmatpush1.bf16.msk.msra.mxu1 %vm4153_vm15, %v2868_v9  ;;  %vm5528_vm15 = vmmov %vm5526_vm1  ;;  %v2006_v45 = vsel %vm5529_vm3, %v3572_v4, %v3562_v30  ;;  %v2877_v47 = vpack.c.bf16 %v2003_v33, %v2002_v39  ;;  %v3593_v51 = vunpack.i.h.bf16 %v3591_v29  ;;  %v3592_v55 = vunpack.i.l.bf16 %v3591_v29 }
 0x3f9   :  { %2203 = vmatprep.subr.bf16.mxu1 %v2027_v23  ;;  %v2007_v35 = vsel %vm5528_vm15, %v3573_v21, %v3563_v42  ;;  %v3583_v32 = vunpack.i.h.bf16 %v3581_v41  ;;  %v3582_v13 = vunpack.i.l.bf16 %v3581_v41  ;;  %vm5530_vm6 = vmmov %vm5526_vm1 }
 0x3fa   :  { %v2005_v58 = vsel %vm5530_vm6, %v3578_v44, %v3588_v43  ;;  %vm5531_vm12 = vmmov %vm5526_vm1  ;;  %v2880_v46 = vpack.c.bf16 %v2007_v35, %v2006_v45 }
 0x3fb   :  { %v3606_v24 = vpop.permute.xlu1 %3605  ;;  %v3596_v25 = vpop.permute.xlu0 %3595  ;;  %2855 = vmatmul.mubr.msk.bf16.gmra.mrb[12].mxu1 %vm310_vm14, %v3663_v49  ;;  %v2004_v59 = vsel %vm5531_vm12, %v3577_v34, %v3587_v2  ;;  %vm5532_vm2 = vmmov %vm5526_vm1  ;;  %v2273_v19 = vsel %vm5533_vm11, %v3593_v51, %v3583_v32  ;;  %vm5541_vm1 = vcmp.lt.s32.totalorder %v4002_v26, 112 }
 0x3fc   :  { %2872 = vmatpush1.bf16.msk.msra.mxu1 %vm4185_vm13, %v2871_v14  ;;  %2231 = vmatprep.mubr.bf16.mxu1 %v3820_v12  ;;  %v2009_v15 = vsel %vm5532_vm2, %v3588_v43, %v3578_v44  ;;  %v2883_v62 = vpack.c.bf16 %v2005_v58, %v2004_v59  ;;  %vm5534_vm15 = vmmov %vm5533_vm11  ;;  %v3608_v63 = vunpack.i.h.bf16 %v3606_v24  ;;  %v3607_v52 = vunpack.i.l.bf16 %v3606_v24  ;;  %v3665_v44 = vld [vmem:[#allocation7 + $0x8] sm:$0xff]  }
 0x3fd   :  { %2205 = vmatprep.subr.bf16.mxu1 %v2029_v28  ;;  %v2272_v60 = vsel %vm5534_vm15, %v3592_v55, %v3582_v13  ;;  %v3598_v3 = vunpack.i.h.bf16 %v3596_v25  ;;  %v3597_v7 = vunpack.i.l.bf16 %v3596_v25  ;;  %v2886_v10 = vpack.c.bf16 %v2009_v15, %v2008_v16  ;;  %vm5536_vm3 = vmmov %vm5533_vm11 }
 0x3fe   :  { %v2268_v36 = vsel %vm5536_vm3, %v3582_v13, %v3592_v55  ;;  %v2893_v37 = vpack.c.bf16 %v2273_v19, %v2272_v60  ;;  %vm5537_vm6 = vmmov %vm5536_vm3 }
 0x3ff   :  { %v3611_v27 = vpop.permute.xlu1 %3610  ;;  %v3601_v57 = vpop.permute.xlu0 %3600  ;;  %v2275_v23 = vsel %vm5537_vm6, %v3608_v63, %v3598_v3  ;;  %vm5538_vm12 = vmmov %vm5536_vm3 }
 0x400   :  { %2875 = vmatpush1.bf16.msk.msra.mxu1 %vm4185_vm13, %v2874_v6  ;;  %vm5535_vm13 = vmmov %vm5533_vm11  ;;  %v3613_v17 = vunpack.i.h.bf16 %v3611_v27  ;;  %v3612_v40 = vunpack.i.l.bf16 %v3611_v27  ;;  %v3603_v9 = vunpack.i.h.bf16 %v3601_v57  ;;  %v3602_v8 = vunpack.i.l.bf16 %v3601_v57 }
 0x401   :  { %2878 = vmatprep.subr.msk.bf16.mxu1 %vm4100_vm8, %v2877_v47  ;;  %v2269_v11 = vsel %vm5535_vm13, %v3583_v32, %v3593_v51  ;;  %v2274_v0 = vsel %vm5538_vm12, %v3607_v52, %v3597_v7  ;;  %vm5540_vm2 = vmmov %vm5536_vm3  ;;  %vm5549_vm12 = vcmp.lt.s32.totalorder %v4002_v26, 111 }
 0x402   :  { %v2896_v21 = vpack.c.bf16 %v2269_v11, %v2268_v36  ;;  %v2270_v42 = vsel %vm5540_vm2, %v3597_v7, %v3607_v52  ;;  %v2899_v30 = vpack.c.bf16 %v2275_v23, %v2274_v0  ;;  %v2305_v29 = vsel %vm5541_vm1, %v3613_v17, %v3603_v9  ;;  %vm5542_vm11 = vmmov %vm5541_vm1  ;;  %v3666_v7 = vld [vmem:[#allocation7 + $0x20] sm:$0xff]  }
 0x403   :  { %v3626_v20 = vpop.permute.xlu1 %3625  ;;  %v3616_v18 = vpop.permute.xlu0 %3615  ;;  %v2304_v41 = vsel %vm5542_vm11, %v3612_v40, %v3602_v8 }
 0x404   :  { %2881 = vmatpush1.bf16.msk.msra.mxu1 %vm4219_vm0, %v2880_v46  ;;  %v3628_v48 = vunpack.i.h.bf16 %v3626_v20  ;;  %v3627_v50 = vunpack.i.l.bf16 %v3626_v20  ;;  %v3618_v14 = vunpack.i.h.bf16 %v3616_v18  ;;  %v3617_v22 = vunpack.i.l.bf16 %v3616_v18  ;;  %v3667_v20 = vld [vmem:[#allocation7 + $0x28] sm:$0xff]  }
 0x405   :  { %2884 = vmatprep.subr.msk.bf16.mxu1 %vm4100_vm8, %v2883_v62  ;;  %vm5539_vm8 = vmmov %vm5536_vm3  ;;  %v2905_v24 = vpack.c.bf16 %v2305_v29, %v2304_v41 }
 0x406   :  { %v2271_v4 = vsel %vm5539_vm8, %v3598_v3, %v3608_v63  ;;  %vm5550_vm8 = vmmov %vm5549_vm12 }
 0x407   :  { %v3631_v49 = vpop.permute.xlu1 %3630  ;;  %v3621_v1 = vpop.permute.xlu0 %3620  ;;  %v2902_v56 = vpack.c.bf16 %v2271_v4, %v2270_v42 }
 0x408   :  { %2887 = vmatpush1.bf16.msk.msra.mxu1 %vm4219_vm0, %v2886_v10  ;;  %vm5543_vm0 = vmmov %vm5541_vm1  ;;  %v3633_v25 = vunpack.i.h.bf16 %v3631_v49  ;;  %v3632_v28 = vunpack.i.l.bf16 %v3631_v49  ;;  %v3623_v43 = vunpack.i.h.bf16 %v3621_v1  ;;  %v3622_v2 = vunpack.i.l.bf16 %v3621_v1 }
 0x409   :  { %2894 = vmatprep.subr.msk.bf16.mxu1 %vm4251_vm9, %v2893_v37  ;;  %v2301_v33 = vsel %vm5543_vm0, %v3603_v9, %v3613_v17  ;;  %vm5544_vm15 = vmmov %vm5543_vm0 }
 0x40a   :  { %v2300_v39 = vsel %vm5544_vm15, %v3602_v8, %v3612_v40  ;;  %vm5545_vm13 = vmmov %vm5543_vm0  ;;  %v2337_v32 = vsel %vm5549_vm12, %v3633_v25, %v3623_v43  ;;  %v2336_v53 = vsel %vm5550_vm8, %v3632_v28, %v3622_v2 }
 0x40b   :  { %2888 = vmatmul.mubr.msk.bf16.vlgmr.msra.gmra.mrb[8].mxu1 %vm310_vm14, %v3664_v38  ;;  %v2307_v34 = vsel %vm5545_vm13, %v3628_v48, %v3618_v14  ;;  %vm5546_vm3 = vmmov %vm5543_vm0  ;;  %v3641_v6 = vpop.permute.xlu1 %3640  ;;  %v3636_v35 = vpop.permute.xlu0 %3635  ;;  %v2356_v45 = vpack.c.bf16 %v2301_v33, %v2300_v39  ;;  %v2911_v16 = vpack.c.bf16 %v2337_v32, %v2336_v53 }
 0x40c   :  { %2897 = vmatpush1.bf16.msk.msra.mxu1 %vm4052_vm4, %v2896_v21  ;;  %2241 = vmatprep.mubr.bf16.mxu1 %v3820_v12  ;;  %v2306_v54 = vsel %vm5546_vm3, %v3627_v50, %v3617_v22  ;;  %vm5548_vm6 = vmmov %vm5543_vm0  ;;  %v3643_v13 = vunpack.i.h.bf16 %v3641_v6  ;;  %v3642_v27 = vunpack.i.l.bf16 %v3641_v6  ;;  %v3638_v57 = vunpack.i.h.bf16 %v3636_v35 }
 0x40d   :  { %2900 = vmatprep.subr.msk.bf16.mxu1 %vm4251_vm9, %v2899_v30  ;;  %vm5547_vm9 = vmmov %vm5543_vm0  ;;  %v2302_v51 = vsel %vm5548_vm6, %v3617_v22, %v3627_v50  ;;  %v2908_v55 = vpack.c.bf16 %v2307_v34, %v2306_v54  ;;  %v3637_v58 = vunpack.i.l.bf16 %v3636_v35 }
 0x40e   :  { %v2303_v47 = vsel %vm5547_vm9, %v3618_v14, %v3628_v48 }
 0x40f   :  { %v2358_v59 = vpack.c.bf16 %v2303_v47, %v2302_v51 }
 0x410   :  { %2903 = vmatpush1.bf16.msk.msra.mxu1 %vm4052_vm4, %v2902_v56  ;;  %vm5551_vm4 = vmmov %vm5550_vm8 }
 0x411   :  { %2906 = vmatprep.subr.msk.bf16.mxu1 %vm4285_vm7, %v2905_v24  ;;  %v2333_v46 = vsel %vm5551_vm4, %v3623_v43, %v3633_v25  ;;  %vm5552_vm2 = vmmov %vm5551_vm4 }
 0x412   :  { %v2332_v15 = vsel %vm5552_vm2, %v3622_v2, %v3632_v28  ;;  %vm5553_vm1 = vmmov %vm5552_vm2 }
 0x413   :  { %2889 = vmatmul.mubr.msk.bf16.gmra.mrb[12].mxu1 %vm310_vm14, %v3665_v44  ;;  %v2339_v62 = vsel %vm5553_vm1, %v3643_v13, %v3638_v57  ;;  %vm5554_vm11 = vmmov %vm5553_vm1  ;;  %v2914_v5 = vpack.c.bf16 %v2333_v46, %v2332_v15 }
 0x414   :  { %2385 = vmatpush1.bf16.msra.mxu1 %v2356_v45  ;;  %2412 = vmatprep.mubr.bf16.mxu1 %v3820_v12  ;;  %v2338_v19 = vsel %vm5554_vm11, %v3642_v27, %v3637_v58  ;;  %vm5556_vm0 = vmmov %vm5553_vm1 }
 0x415   :  { %2909 = vmatprep.subr.msk.bf16.mxu1 %vm4285_vm7, %v2908_v55  ;;  %vm5555_vm7 = vmmov %vm5553_vm1  ;;  %v2334_v63 = vsel %vm5556_vm0, %v3637_v58, %v3642_v27  ;;  %v2917_v52 = vpack.c.bf16 %v2339_v62, %v2338_v19 }
 0x416   :  { %v2335_v60 = vsel %vm5555_vm7, %v3638_v57, %v3643_v13 }
 0x417   :  { %v2920_v3 = vpack.c.bf16 %v2335_v60, %v2334_v63 }
 0x418   :  { %2387 = vmatpush1.bf16.msra.mxu1 %v2358_v59 }
 0x419   :  { %2912 = vmatprep.subr.msk.bf16.mxu1 %vm4324_vm5, %v2911_v16 }
 0x41c   :  { %2915 = vmatpush1.bf16.msk.msra.mxu1 %vm4119_vm10, %v2914_v5 }
 0x41d   :  { %2918 = vmatprep.subr.msk.bf16.mxu1 %vm4324_vm5, %v2917_v52 }
 0x420   :  { %2921 = vmatpush1.bf16.msk.msra.mxu1 %vm4119_vm10, %v2920_v3 }
 0x423   :  { %2922 = vmatmul.mubr.msk.bf16.vlgmr.msra.gmra.mrb[8].mxu1 %vm310_vm14, %v3666_v7 }
 0x424   :  { %2422 = vmatprep.mubr.bf16.mxu1 %v3820_v12 }
 0x42b   :  { %2923 = vmatmul.mubr.msk.bf16.gmra.mrb[12].mxu1 %vm310_vm14, %v3667_v20 }
 0x4ae   :  { %v1215_v26 = vpop.f32.mrb[0].mxu1 }
 0x4af   :  { %v1217_v18 = vpop.f32.mrb[1].mxu1 }
 0x4b0   :  { %v1242_v10 = vadd.f32 %v1217_v18, %v1215_v26  ;;  %v1219_v11 = vpop.f32.mrb[2].mxu1 }
 0x4b1   :  { %v1221_v36 = vpop.f32.mrb[3].mxu1 }
 0x4b2   :  { %v1245_v37 = vadd.f32 %v1221_v36, %v1219_v11  ;;  %1243 = vadd.xlane.f32.xlu0 %v1242_v10 }
 0x4b4   :  { %1246 = vadd.xlane.f32.xlu1 %v1245_v37 }
 0x4b6   :  { %v1225_v61 = vpop.f32.mrb[4].mxu1 }
 0x4b7   :  { %v1227_v17 = vpop.f32.mrb[5].mxu1 }
 0x4b8   :  { %v1248_v40 = vadd.f32 %v1227_v17, %v1225_v61  ;;  %v1229_v31 = vpop.f32.mrb[6].mxu1 }
 0x4b9   :  { %v1231_v9 = vpop.f32.mrb[7].mxu1 }
 0x4ba   :  { %v1251_v8 = vadd.f32 %v1231_v9, %v1229_v31  ;;  %1249 = vadd.xlane.f32.xlu0 %v1248_v40 }
 0x4be   :  { %1252 = vadd.xlane.f32.xlu0 %v1251_v8 }
 0x4f6   :  { %v2414_v12 = vpop.f32.mrb[8].mxu1 }
 0x4f7   :  { %v2416_v38 = vpop.f32.mrb[9].mxu1 }
 0x4f8   :  { %v2441_v23 = vadd.f32 %v2416_v38, %v2414_v12  ;;  %v2418_v0 = vpop.f32.mrb[10].mxu1 }
 0x4f9   :  { %v2420_v21 = vpop.f32.mrb[11].mxu1 }
 0x4fa   :  { %v2444_v4 = vadd.f32 %v2420_v21, %v2418_v0  ;;  %2442 = vadd.xlane.f32.xlu1 %v2441_v23 }
 0x4fc   :  { %2445 = vadd.xlane.f32.xlu0 %v2444_v4 }
 0x4fe   :  { %v2424_v42 = vpop.f32.mrb[12].mxu1 }
 0x4ff   :  { %v2426_v30 = vpop.f32.mrb[13].mxu1 }
 0x500   :  { %v2447_v29 = vadd.f32 %v2426_v30, %v2424_v42  ;;  %v2428_v41 = vpop.f32.mrb[14].mxu1 }
 0x501   :  { %v2430_v49 = vpop.f32.mrb[15].mxu1 }
 0x502   :  { %v2450_v1 = vadd.f32 %v2430_v49, %v2428_v41  ;;  %2448 = vadd.xlane.f32.xlu1 %v2447_v29 }
 0x504   :  { %2451 = vadd.xlane.f32.xlu0 %v2450_v1 }
 0x53f   :  { %v1244_v48 = vpop.xlane.xlu0 %1243 }
 0x540   :  { %v1254_v50 = vmul.f32 0.00390625, %v1244_v48 }
 0x541   :  { %v1247_v14 = vpop.xlane.xlu1 %1246 }
 0x542   :  { %v5240_v22 = vsub.f32 %v1215_v26, %v1254_v50  ;;  %v5242_v56 = vsub.f32 %v1217_v18, %v1254_v50  ;;  %v1255_v33 = vmul.f32 0.00390625, %v1247_v14 }
 0x544   :  { %v1266_v39 = vmul.f32 %v5240_v22, %v5240_v22  ;;  %v1267_v24 = vmul.f32 %v5242_v56, %v5242_v56  ;;  %v5248_v25 = vsub.f32 %v1219_v11, %v1255_v33  ;;  %v5250_v28 = vsub.f32 %v1221_v36, %v1255_v33 }
 0x546   :  { %v1268_v43 = vmul.f32 %v5248_v25, %v5248_v25  ;;  %v1269_v2 = vmul.f32 %v5250_v28, %v5250_v28  ;;  %v1274_v44 = vadd.f32 %v1267_v24, %v1266_v39 }
 0x547   :  { %v1250_v34 = vpop.xlane.xlu0 %1249 }
 0x548   :  { %v1256_v54 = vmul.f32 0.00390625, %v1250_v34  ;;  %1275 = vadd.xlane.f32.xlu1 %v1274_v44  ;;  %v1277_v6 = vadd.f32 %v1269_v2, %v1268_v43  ;;  %v3700_v44 = vld [vmem:[#allocation2] sm:$0xff] }
 0x54a   :  { %v5256_v35 = vsub.f32 %v1225_v61, %v1256_v54  ;;  %v5258_v45 = vsub.f32 %v1227_v17, %v1256_v54  ;;  %1278 = vadd.xlane.f32.xlu0 %v1277_v6  ;;  %v3701_v54 = vld [vmem:[#allocation2 + $0x8] sm:$0xff] }
 0x54b   :  { %v1253_v47 = vpop.xlane.xlu0 %1252 }
 0x54c   :  { %v1270_v51 = vmul.f32 %v5256_v35, %v5256_v35  ;;  %v1271_v55 = vmul.f32 %v5258_v45, %v5258_v45  ;;  %v1257_v32 = vmul.f32 0.00390625, %v1253_v47 }
 0x54e   :  { %v5264_v53 = vsub.f32 %v1229_v31, %v1257_v32  ;;  %v5266_v13 = vsub.f32 %v1231_v9, %v1257_v32  ;;  %v1280_v27 = vadd.f32 %v1271_v55, %v1270_v51  ;;  %v3702_v55 = vld [vmem:[#allocation2 + $0x10] sm:$0xff] }
 0x550   :  { %v1272_v57 = vmul.f32 %v5264_v53, %v5264_v53  ;;  %v1273_v58 = vmul.f32 %v5266_v13, %v5266_v13  ;;  %1281 = vadd.xlane.f32.xlu1 %v1280_v27  ;;  %v3703_v27 = vld [vmem:[#allocation2 + $0x18] sm:$0xff] }
 0x552   :  { %v1283_v59 = vadd.f32 %v1273_v58, %v1272_v57 }
 0x554   :  { %1284 = vadd.xlane.f32.xlu0 %v1283_v59  ;;  %v3704_v59 = vld [vmem:[#allocation2 + $0x20] sm:$0xff] }
 0x587   :  { %v2443_v46 = vpop.xlane.xlu1 %2442 }
 0x588   :  { %v2453_v15 = vmul.f32 0.00390625, %v2443_v46 }
 0x589   :  { %v2446_v16 = vpop.xlane.xlu0 %2445 }
 0x58a   :  { %v5272_v62 = vsub.f32 %v2414_v12, %v2453_v15  ;;  %v5274_v19 = vsub.f32 %v2416_v38, %v2453_v15  ;;  %v2454_v5 = vmul.f32 0.00390625, %v2446_v16  ;;  %v3705_v15 = vld [vmem:[#allocation2 + $0x28] sm:$0xff] }
 0x58c   :  { %v2465_v60 = vmul.f32 %v5272_v62, %v5272_v62  ;;  %v2466_v63 = vmul.f32 %v5274_v19, %v5274_v19  ;;  %v5280_v52 = vsub.f32 %v2418_v0, %v2454_v5  ;;  %v5282_v3 = vsub.f32 %v2420_v21, %v2454_v5 }
 0x58e   :  { %v2467_v7 = vmul.f32 %v5280_v52, %v5280_v52  ;;  %v2468_v20 = vmul.f32 %v5282_v3, %v5282_v3  ;;  %v2473_v26 = vadd.f32 %v2466_v63, %v2465_v60  ;;  %v3706_v60 = vld [vmem:[#allocation2 + $0x30] sm:$0xff] }
 0x58f   :  { %v2449_v18 = vpop.xlane.xlu1 %2448 }
 0x590   :  { %v2455_v10 = vmul.f32 0.00390625, %v2449_v18  ;;  %2474 = vadd.xlane.f32.xlu1 %v2473_v26  ;;  %v2476_v11 = vadd.f32 %v2468_v20, %v2467_v7  ;;  %v3707_v7 = vld [vmem:[#allocation2 + $0x38] sm:$0xff] }
 0x591   :  { %v2452_v36 = vpop.xlane.xlu0 %2451 }
 0x592   :  { %v5288_v37 = vsub.f32 %v2424_v42, %v2455_v10  ;;  %v5290_v61 = vsub.f32 %v2426_v30, %v2455_v10  ;;  %v2456_v17 = vmul.f32 0.00390625, %v2452_v36  ;;  %2477 = vadd.xlane.f32.xlu0 %v2476_v11 }
 0x594   :  { %v2469_v40 = vmul.f32 %v5288_v37, %v5288_v37  ;;  %v2470_v31 = vmul.f32 %v5290_v61, %v5290_v61  ;;  %v5296_v9 = vsub.f32 %v2428_v41, %v2456_v17  ;;  %v5298_v8 = vsub.f32 %v2430_v49, %v2456_v17 }
 0x596   :  { %v2471_v12 = vmul.f32 %v5296_v9, %v5296_v9  ;;  %v2472_v38 = vmul.f32 %v5298_v8, %v5298_v8  ;;  %v2479_v23 = vadd.f32 %v2470_v31, %v2469_v40 }
 0x598   :  { %2480 = vadd.xlane.f32.xlu1 %v2479_v23  ;;  %v2482_v0 = vadd.f32 %v2472_v38, %v2471_v12 }
 0x59a   :  { %2483 = vadd.xlane.f32.xlu0 %v2482_v0 }
 0x5d5   :  { %v1276_v21 = vpop.xlane.xlu1 %1275 }
 0x5d6   :  { %v1286_v4 = vmul.f32 0.00390625, %v1276_v21  ;;  %v3708_v21 = vld [vmem:[#allocation2 + $0x40] sm:$0xff] }
 0x5d7   :  { %v1279_v42 = vpop.xlane.xlu0 %1278 }
 0x5d8   :  { %v1290_v30 = vadd.f32 1e-05, %v1286_v4  ;;  %v1287_v29 = vmul.f32 0.00390625, %v1279_v42  ;;  %v3709_v42 = vld [vmem:[#allocation2 + $0x48] sm:$0xff] }
 0x5da   :  { %3684 = vrsqrt.f32 %v1290_v30  ;;  %v1291_v41 = vadd.f32 1e-05, %v1287_v29 }
 0x5dc   :  { %3686 = vrsqrt.f32 %v1291_v41 }
 0x5dd   :  { %v1282_v49 = vpop.xlane.xlu1 %1281 }
 0x5de   :  { %v1288_v1 = vmul.f32 0.00390625, %v1282_v49  ;;  %v3710_v49 = vld [vmem:[#allocation2 + $0x50] sm:$0xff] }
 0x5e0   :  { %v1292_v48 = vadd.f32 1e-05, %v1288_v1 }
 0x5e1   :  { %v1285_v50 = vpop.xlane.xlu0 %1284 }
 0x5e2   :  { %3688 = vrsqrt.f32 %v1292_v48  ;;  %v1289_v14 = vmul.f32 0.00390625, %v1285_v50  ;;  %v3711_v48 = vld [vmem:[#allocation2 + $0x58] sm:$0xff] }
 0x5e4   :  { %v3685_v33 = vpop.eup %3684  ;;  %v1293_v39 = vadd.f32 1e-05, %v1289_v14 }
 0x5e5   :  { %v1298_v24 = vmul.f32 %v3685_v33, %v5240_v22  ;;  %v1299_v43 = vmul.f32 %v3685_v33, %v5242_v56 }
 0x5e6   :  { %v3687_v2 = vpop.eup %3686  ;;  %3690 = vrsqrt.f32 %v1293_v39  ;;  %v3712_v39 = vld [vmem:[#allocation2 + $0x60] sm:$0xff] }
 0x5e7   :  { %v1306_v34 = vadd.f32 %v3700_v44, %v1298_v24  ;;  %v1307_v6 = vadd.f32 %v3701_v54, %v1299_v43  ;;  %v1300_v47 = vmul.f32 %v3687_v2, %v5248_v25  ;;  %v1301_v51 = vmul.f32 %v3687_v2, %v5250_v28  ;;  %v3713_v24 = vld [vmem:[#allocation2 + $0x68] sm:$0xff]  ;;  %v3714_v44 = vld [vmem:[#allocation2 + $0x70] sm:$0xff]  ;;  %v3715_v54 = vld [vmem:[#allocation2 + $0x78] sm:$0xff] }
 0x5e9   :  { %1314 = vst [vmem:[#allocation8] sm:$0xff] %v1306_v34  ;;  %1315 = vst [vmem:[#allocation8 + $0x8] sm:$0xff] %v1307_v6  ;;  %v1308_v32 = vadd.f32 %v3702_v55, %v1300_v47  ;;  %v1309_v57 = vadd.f32 %v3703_v27, %v1301_v51 }
 0x5eb   :  { %1316 = vst [vmem:[#allocation8 + $0x10] sm:$0xff] %v1308_v32  ;;  %1317 = vst [vmem:[#allocation8 + $0x18] sm:$0xff] %v1309_v57 }
 0x5ec   :  { %v3689_v22 = vpop.eup %3688 }
 0x5ed   :  { %v1302_v56 = vmul.f32 %v3689_v22, %v5256_v35  ;;  %v1303_v58 = vmul.f32 %v3689_v22, %v5258_v45 }
 0x5ef   :  { %v1310_v46 = vadd.f32 %v3704_v59, %v1302_v56  ;;  %v1311_v16 = vadd.f32 %v3705_v15, %v1303_v58 }
 0x5f0   :  { %v3691_v25 = vpop.eup %3690 }
 0x5f1   :  { %1318 = vst [vmem:[#allocation8 + $0x20] sm:$0xff] %v1310_v46  ;;  %1319 = vst [vmem:[#allocation8 + $0x28] sm:$0xff] %v1311_v16  ;;  %v1304_v28 = vmul.f32 %v3691_v25, %v5264_v53  ;;  %v1305_v5 = vmul.f32 %v3691_v25, %v5266_v13 }
 0x5f3   :  { %v1312_v63 = vadd.f32 %v3706_v60, %v1304_v28  ;;  %v1313_v20 = vadd.f32 %v3707_v7, %v1305_v5 }
 0x5f5   :  { %1320 = vst [vmem:[#allocation8 + $0x30] sm:$0xff] %v1312_v63  ;;  %1321 = vst [vmem:[#allocation8 + $0x38] sm:$0xff] %v1313_v20 }
 0x61d   :  { %v2475_v35 = vpop.xlane.xlu1 %2474 }
 0x61e   :  { %v2485_v26 = vmul.f32 0.00390625, %v2475_v35 }
 0x61f   :  { %v2478_v45 = vpop.xlane.xlu0 %2477 }
 0x620   :  { %v2489_v18 = vadd.f32 1e-05, %v2485_v26  ;;  %v2486_v10 = vmul.f32 0.00390625, %v2478_v45 }
 0x622   :  { %3692 = vrsqrt.f32 %v2489_v18  ;;  %v2490_v11 = vadd.f32 1e-05, %v2486_v10 }
 0x624   :  { %3694 = vrsqrt.f32 %v2490_v11 }
 0x625   :  { %v2481_v36 = vpop.xlane.xlu1 %2480 }
 0x626   :  { %v2487_v17 = vmul.f32 0.00390625, %v2481_v36 }
 0x627   :  { %v2484_v40 = vpop.xlane.xlu0 %2483 }
 0x628   :  { %v2491_v53 = vadd.f32 1e-05, %v2487_v17  ;;  %v2488_v31 = vmul.f32 0.00390625, %v2484_v40 }
 0x62a   :  { %3696 = vrsqrt.f32 %v2491_v53  ;;  %v2492_v13 = vadd.f32 1e-05, %v2488_v31 }
 0x62c   :  { %v3693_v12 = vpop.eup %3692  ;;  %3698 = vrsqrt.f32 %v2492_v13 }
 0x62d   :  { %v2497_v38 = vmul.f32 %v3693_v12, %v5272_v62  ;;  %v2498_v23 = vmul.f32 %v3693_v12, %v5274_v19 }
 0x62e   :  { %v3695_v0 = vpop.eup %3694 }
 0x62f   :  { %v2505_v4 = vadd.f32 %v3708_v21, %v2497_v38  ;;  %v2506_v30 = vadd.f32 %v3709_v42, %v2498_v23  ;;  %v2499_v29 = vmul.f32 %v3695_v0, %v5280_v52  ;;  %v2500_v41 = vmul.f32 %v3695_v0, %v5282_v3 }
 0x631   :  { %2514 = vst [vmem:[#allocation8 + $0x40] sm:$0xff] %v2505_v4  ;;  %2515 = vst [vmem:[#allocation8 + $0x48] sm:$0xff] %v2506_v30  ;;  %v2507_v1 = vadd.f32 %v3710_v49, %v2499_v29  ;;  %v2508_v50 = vadd.f32 %v3711_v48, %v2500_v41 }
 0x633   :  { %2516 = vst [vmem:[#allocation8 + $0x50] sm:$0xff] %v2507_v1  ;;  %2517 = vst [vmem:[#allocation8 + $0x58] sm:$0xff] %v2508_v50 }
 0x634   :  { %v3697_v62 = vpop.eup %3696 }
 0x635   :  { %v2501_v19 = vmul.f32 %v3697_v62, %v5288_v37  ;;  %v2502_v14 = vmul.f32 %v3697_v62, %v5290_v61 }
 0x636   :  { %v3699_v33 = vpop.eup %3698 }
 0x637   :  { %v2509_v52 = vadd.f32 %v3712_v39, %v2501_v19  ;;  %v2510_v3 = vadd.f32 %v3713_v24, %v2502_v14  ;;  %v2503_v43 = vmul.f32 %v3699_v33, %v5296_v9  ;;  %v2504_v2 = vmul.f32 %v3699_v33, %v5298_v8 }
 0x639   :  { %2518 = vst [vmem:[#allocation8 + $0x60] sm:$0xff] %v2509_v52  ;;  %2519 = vst [vmem:[#allocation8 + $0x68] sm:$0xff] %v2510_v3  ;;  %v2511_v34 = vadd.f32 %v3714_v44, %v2503_v43  ;;  %v2512_v6 = vadd.f32 %v3715_v54, %v2504_v2 }
 0x63b   :  { %2520 = vst [vmem:[#allocation8 + $0x70] sm:$0xff] %v2511_v34  ;;  %2521 = vst [vmem:[#allocation8 + $0x78] sm:$0xff] %v2512_v6 }
 0x63c   :  { %3793 = shalt.err (!%p3790_p0)
}
 0x63d   :  { %s3794_s7 = scalar_lea.hbm %s5338_s3, 2048 }
 0x63e   :  { %p3795_p1 = scmp.ne.s32.totalorder %s5338_s3, %s3794_s7  ;;  %p3798_p2 = scmp.lt.u32.totalorder %s3794_s7, %s5338_s3 }
 0x640   :  { %p3800_p3 = pnand %p3798_p2, %p3795_p1 }
 0x642   :  { %3803 = shalt.err (!%p3800_p3)
}
 0x643   :  { %2533 = dma.vmem_to_hbm [thread:$0]  %s2528_s30, 2048, %s5338_s3, [#allocation4], %s3814_s1, %s3814_s1, %s3815_s9  }
 0x644   :  { %3808 = dma.done.wait [#allocation4], 2048  }
 0x645   :  { %3809 = vsyncadd [#allocation4], 4294965248 }
 0x646   :  { %2537 = vsyncpa [#allocation3], 1 }
 0x647   :  { %2538 = vsyncpa [#allocation6], 1 }
 0x648   :  { %2539 = vsyncpa [#allocation4], 1 }

</bundles_post_ra>
